<compile_context>
chip_gen: v7x
topology: tpu7x:2x2x1
jax: 0.10.0
libtpu: 0.0.40
codegen_flags: <defaults>
</compile_context>

<pallas_src>
import jax
import jax.numpy as jnp
from jax import lax
from jax.experimental import pallas as pl
from jax.experimental.pallas import tpu as pltpu


def _lrelu(x):
    # LeakyReLU(negative_slope=0.2)
    return jnp.where(x >= 0, x, 0.2 * x)


def _atomnet_kernel(x_ref, pT_ref, pA_ref, pB_ref, out_ref, td_ref):
    """One tile of `TP` points, channels on sublanes, points on lanes.

    x_ref : (K, D+1, TP)   packed [atom_type (D rows); dist (1 row)]
    pT_ref: (D+1, D+2)     [Wt1_aug | bt1_aug]   (transform_types Linear1 + dist passthrough)
    pA_ref: (L, H, 2D+2)   [W1at_fused (D) | w1d (1) | W1pe (D) | b1_fused (1)]
    pB_ref: (L, D, H+3)    [W2 (H) | K*b2 (1) | gn_gamma (1) | gn_beta (1)]
    out_ref: (D, TP)       point embeddings
    td_ref : (K, D+1, TP)  scratch: [lrelu(Wt1 @ atom + bt1) ; dist]
    """
    f32 = jnp.float32
    D, TP = out_ref.shape
    K, Caug, _ = x_ref.shape          # Caug = D + 1
    L, H, _ = pA_ref.shape            # H = 2D + 1
    half = D // 2
    eps = 1e-5

    pT = pT_ref[...]
    wt1a = pT[:, :Caug]               # (D+1, D+1)
    bt1a = pT[:, Caug:Caug + 1]       # (D+1, 1)

    # LeakyReLU only on the first D rows (atom channels); dist row passes through.
    row_a = lax.broadcasted_iota(jnp.int32, (Caug, 1), 0) < D

    # ---- transform_types first Linear (+ dist passthrough), once per tile ----
    for k in range(K):
        xk = x_ref[k].astype(f32)                                   # (D+1, TP)
        z = jnp.dot(wt1a, xk, preferred_element_type=f32) + bt1a
        td_ref[k] = jnp.where(row_a, _lrelu(z), z)

    # ---- 3 message-passing layers --------------------------------------------
    emb = jnp.ones((D, TP), f32)
    in_g1 = lax.broadcasted_iota(jnp.int32, (D, 1), 0) < half       # GroupNorm groups

    for i in range(L):
        pa = pA_ref[i]                                  # (H, 2D+2)
        w1atd = pa[:, :Caug]                            # (H, D+1) fused atom cols + dist col
        w1pe = pa[:, Caug:Caug + D]                     # (H, D)
        b1f = pa[:, Caug + D:Caug + D + 1]              # (H, 1)
        pb = pB_ref[i]                                  # (D, H+3)
        w2 = pb[:, :H]                                  # (D, H)
        kb2 = pb[:, H:H + 1]                            # (D, 1)  (= K * b2)
        gg = pb[:, H + 1:H + 2]                         # (D, 1)
        gb = pb[:, H + 2:H + 3]                         # (D, 1)

        # point_emb contribution + fused bias, once per layer
        pe_b = jnp.dot(w1pe, emb, preferred_element_type=f32) + b1f     # (H, TP)

        # sum over neighbours k as K adds of contiguous (H, TP) slices
        hsum = jnp.zeros((H, TP), f32)
        for k in range(K):
            h = _lrelu(jnp.dot(w1atd, td_ref[k], preferred_element_type=f32) + pe_b)
            hsum = hsum + h

        # second Linear, k-sum hoisted (exact algebra; K*b2 precomputed host-side)
        msg = jnp.dot(w2, hsum, preferred_element_type=f32) + kb2       # (D, TP)

        # GroupNorm(2, D) per point column (biased variance, eps=1e-5)
        s_all = jnp.sum(msg, axis=0, keepdims=True)
        s1 = jnp.sum(jnp.where(in_g1, msg, 0.0), axis=0, keepdims=True)
        mu = jnp.where(in_g1, s1, s_all - s1) * (1.0 / half)
        c = msg - mu
        csq = c * c
        q_all = jnp.sum(csq, axis=0, keepdims=True)
        q1 = jnp.sum(jnp.where(in_g1, csq, 0.0), axis=0, keepdims=True)
        var = jnp.where(in_g1, q1, q_all - q1) * (1.0 / half)
        gn = c * lax.rsqrt(var + eps) * gg + gb

        emb = emb + _lrelu(gn)

    out_ref[...] = emb


def atomnet_forward(curvature, dist, atom_type, params, *,
                    tile_p=512, num_tc=1, stream_dtype=jnp.float32):
    """AtomNet_MP forward.  atom_type: (B,P,K,D), dist: (B,P,K,1) -> (B,P,D)."""
    del curvature  # unused by the PyTorch forward
    B, P, K, D = atom_type.shape
    H = 2 * D + 1
    Caug = D + 1
    BP = B * P
    f32 = jnp.float32

    # ---- tile-size / grid selection (points live on the 128-lane axis) -------
    tile_p = max(128, (int(tile_p) // 128) * 128)
    bp_min = ((BP + 127) // 128) * 128
    tile_p = min(tile_p, bp_min)
    n_tiles = -(-BP // tile_p)
    # pad the tile count to a multiple of num_tc (v7x: num_tc=2 keeps the
    # "parallel" axis balanced across both TensorCores; default 1 = no-op).
    n_tiles = -(-n_tiles // max(1, int(num_tc))) * max(1, int(num_tc))
    BPp = n_tiles * tile_p

    # ---- data: channels on sublanes, points on lanes (lane-dense) ------------
    x = jnp.concatenate([atom_type.astype(f32), dist.astype(f32)], axis=-1)   # (B,P,K,D+1)
    x = x.reshape(BP, K, Caug).transpose(1, 2, 0)                              # (K, D+1, BP)
    if BPp > BP:
        x = jnp.pad(x, ((0, 0), (0, 0), (0, BPp - BP)))
    x = x.astype(stream_dtype)

    # ---- weight prep (column-vector convention: y = W @ x + b) ---------------
    wt1 = params["t1_w"].astype(f32)          # (D, D)
    bt1 = params["t1_b"].astype(f32)          # (D,)
    wt2 = params["t2_w"].astype(f32)          # (D, D)
    bt2 = params["t2_b"].astype(f32)          # (D,)
    w1 = params["mlp1_w"].astype(f32)         # (L, H, H)
    b1 = params["mlp1_b"].astype(f32)         # (L, H)
    w2 = params["mlp2_w"].astype(f32)         # (L, D, H)
    b2 = params["mlp2_b"].astype(f32)         # (L, D)
    gg = params["gn_gamma"].astype(f32)       # (L, D)
    gb = params["gn_beta"].astype(f32)        # (L, D)
    L = w1.shape[0]

    # transform_types Linear1, augmented with a dist passthrough row
    wt1a = jnp.zeros((Caug, Caug), f32).at[:D, :D].set(wt1).at[D, D].set(1.0)
    bt1a = jnp.concatenate([bt1, jnp.zeros((1,), f32)])
    packT = jnp.concatenate([wt1a, bt1a[:, None]], axis=1)                    # (D+1, D+2)

    w1pe = w1[:, :, :D]                        # (L, H, D)  point_emb columns
    w1at = w1[:, :, D:2 * D]                   # (L, H, D)  atomtypes columns
    w1d = w1[:, :, 2 * D:]                     # (L, H, 1)  dist column
    # fold transform_types' second Linear into the atomtypes part of Linear1
    w1at_f = jnp.einsum("lhd,de->lhe", w1at, wt2)                             # (L, H, D)
    b1_f = b1 + jnp.einsum("lhd,d->lh", w1at, bt2)                            # (L, H)
    packA = jnp.concatenate([w1at_f, w1d, w1pe, b1_f[:, :, None]], axis=2)    # (L, H, 2D+2)

    kb2 = float(K) * b2
    packB = jnp.concatenate([w2, kb2[:, :, None], gg[:, :, None], gb[:, :, None]],
                            axis=2)                                            # (L, D, H+3)

    # ---- cost / VMEM hints ----------------------------------------------------
    rows = BPp * K
    flops = (2 * rows * Caug * Caug
             + L * (2 * BPp * H * D            # point_emb matmul
                    + 2 * rows * H * Caug      # fused per-(layer,k) matmul
                    + 2 * BPp * D * H))        # Linear2 (k-sum hoisted)
    itemsize = jnp.dtype(stream_dtype).itemsize
    weight_bytes = 4 * (packT.size + packA.size + packB.size)
    bytes_accessed = rows * Caug * itemsize + 4 * BPp * D + weight_bytes

    in_tile_bytes = K * 8 * tile_p * itemsize          # sublane-padded input block
    td_bytes = K * 8 * tile_p * 4                      # f32 scratch
    interm_bytes = 48 * 16 * tile_p * 4                # headroom for (16, tile_p) temps
    vmem_limit = int(min(32 * 2 ** 20,
                         max(8 * 2 ** 20,
                             2 * in_tile_bytes + td_bytes + interm_bytes + (2 << 20))))

    out = pl.pallas_call(
        _atomnet_kernel,
        out_shape=jax.ShapeDtypeStruct((D, BPp), f32),
        grid_spec=pltpu.PrefetchScalarGridSpec(
            num_scalar_prefetch=0,
            grid=(n_tiles,),
            in_specs=[
                pl.BlockSpec((K, Caug, tile_p), lambda i: (0, 0, i)),   # packed atom+dist
                pl.BlockSpec(packT.shape, lambda i: (0, 0)),            # transform_types L1
                pl.BlockSpec(packA.shape, lambda i: (0, 0, 0)),         # Linear1 packs
                pl.BlockSpec(packB.shape, lambda i: (0, 0, 0)),         # Linear2 + GN packs
            ],
            out_specs=pl.BlockSpec((D, tile_p), lambda i: (0, i)),
            scratch_shapes=[pltpu.VMEM((K, Caug, tile_p), jnp.float32)],
        ),
        compiler_params=pltpu.CompilerParams(
            dimension_semantics=("parallel",),
            vmem_limit_bytes=vmem_limit),
        cost_estimate=pl.CostEstimate(flops=int(flops), transcendentals=0,
                                      bytes_accessed=int(bytes_accessed)),
    )(x, packT, packA, packB)

    return out[:, :BP].T.reshape(B, P, D)


# --- pure-JAX reference mirroring the PyTorch forward ---------------------------
def reference_forward(curvature, dist, atom_type, params):
    del curvature
    B, P, K, D = atom_type.shape
    t = _lrelu(atom_type @ params["t1_w"].T + params["t1_b"])
    at = t @ params["t2_w"].T + params["t2_b"]                          # (B,P,K,D)
    emb = jnp.ones((B, P, D), jnp.float32)
    L = params["mlp1_w"].shape[0]
    for i in range(L):
        feats = jnp.concatenate(
            [jnp.broadcast_to(emb[:, :, None, :], at.shape), at, dist], axis=-1)
        h = _lrelu(feats @ params["mlp1_w"][i].T + params["mlp1_b"][i])
        m = h @ params["mlp2_w"][i].T + params["mlp2_b"][i]
        msg = m.sum(axis=2)                                             # (B,P,D)
        xg = msg.reshape(-1, 2, D // 2)
        mu = xg.mean(-1, keepdims=True)
        var = ((xg - mu) ** 2).mean(-1, keepdims=True)
        gn = ((xg - mu) / jnp.sqrt(var + 1e-5)).reshape(-1, D)
        gn = gn * params["gn_gamma"][i] + params["gn_beta"][i]
        emb = emb + _lrelu(gn).reshape(B, P, D)
    return emb


def init_params(key, D):
    H = 2 * D + 1
    L = 3
    ks = jax.random.split(key, 10)

    def nrm(k, shape, scale=0.1):
        return scale * jax.random.normal(k, shape, jnp.float32)

    return dict(
        t1_w=nrm(ks[0], (D, D)), t1_b=nrm(ks[1], (D,)),
        t2_w=nrm(ks[2], (D, D)), t2_b=nrm(ks[3], (D,)),
        mlp1_w=nrm(ks[4], (L, H, H)), mlp1_b=nrm(ks[5], (L, H)),
        mlp2_w=nrm(ks[6], (L, D, H)), mlp2_b=nrm(ks[7], (L, D)),
        gn_gamma=1.0 + nrm(ks[8], (L, D)), gn_beta=nrm(ks[9], (L, D)),
    )


if __name__ == "__main__":
    # atom_dims must be 6 (the PyTorch module hardcodes reshape(-1, 6)); k=16.
    B, P, K, D = 2, 96, 16, 6

    key = jax.random.PRNGKey(0)
    k1, k2, k3, kp = jax.random.split(key, 4)
    atom_type = jax.random.normal(k1, (B, P, K, D), jnp.float32)
    dist = jnp.abs(jax.random.normal(k2, (B, P, K, 1), jnp.float32))
    curvature = jax.random.normal(k3, (B, P, 1), jnp.float32)   # unused by forward

    params = init_params(kp, D)

    ref = jax.block_until_ready(reference_forward(curvature, dist, atom_type, params))

    # default tiling (single tile, ragged tail padded to the 128-lane boundary)
    out = jax.block_until_ready(atomnet_forward(curvature, dist, atom_type, params))
    assert out.shape == (B, P, D), out.shape
    err = float(jnp.max(jnp.abs(out - ref)))
    assert jnp.allclose(out, ref, atol=2e-4, rtol=2e-4), err

    # multi-tile grid + ragged-tail path
    out2 = jax.block_until_ready(
        atomnet_forward(curvature, dist, atom_type, params, tile_p=128))
    err2 = float(jnp.max(jnp.abs(out2 - ref)))
    assert jnp.allclose(out2, ref, atol=2e-4, rtol=2e-4), err2

    print("KERNEL_OK")
</pallas_src>

<mosaic_0001>
module attributes {stable_mosaic.version = 11 : i64} {
  func.func @_atomnet_kernel(%arg0: i32, %arg1: memref<16x7x256xf32, #tpu.memory_space<vmem>>, %arg2: memref<7x8xf32, #tpu.memory_space<vmem>>, %arg3: memref<3x13x14xf32, #tpu.memory_space<vmem>>, %arg4: memref<3x6x16xf32, #tpu.memory_space<vmem>>, %arg5: memref<6x256xf32, #tpu.memory_space<vmem>>, %arg6: memref<16x7x256xf32, #tpu.memory_space<vmem>>) attributes {dimension_semantics = [#tpu.dimension_semantics<parallel>], iteration_bounds = array<i64: 1>, scalar_prefetch = 0 : i64, scratch_operands = 1 : i64, tpu.core_type = #tpu.core_type<tc>, window_params = [{transform_indices = @transform_0, window_bounds = array<i64: 16, 7, 256>}, {pipeline_mode = #tpu.pipeline_mode<synchronous>, transform_indices = @transform_1, window_bounds = array<i64: 7, 8>}, {pipeline_mode = #tpu.pipeline_mode<synchronous>, transform_indices = @transform_2, window_bounds = array<i64: 3, 13, 14>}, {pipeline_mode = #tpu.pipeline_mode<synchronous>, transform_indices = @transform_3, window_bounds = array<i64: 3, 6, 16>}, {transform_indices = @transform_4, window_bounds = array<i64: 6, 256>}]} {
    %c0 = arith.constant 0 : index
    %c0_0 = arith.constant 0 : index
    %0 = vector.load %arg2[%c0, %c0_0] : memref<7x8xf32, #tpu.memory_space<vmem>>, vector<7x8xf32>
    %1 = vector.extract_strided_slice %0 {offsets = [0, 0], sizes = [7, 7], strides = [1, 1]} : vector<7x8xf32> to vector<7x7xf32>
    %2 = vector.extract_strided_slice %0 {offsets = [0, 7], sizes = [7, 1], strides = [1, 1]} : vector<7x8xf32> to vector<7x1xf32>
    %3 = tpu.iota {dimensions = array<i32: 0>} : vector<7x1xi32>
    %c6_i32 = arith.constant 6 : i32
    %4 = vector.broadcast %c6_i32 : i32 to vector<7x1xi32>
    %5 = arith.cmpi slt, %3, %4 : vector<7x1xi32>
    %c0_1 = arith.constant 0 : index
    %c0_2 = arith.constant 0 : index
    %c0_3 = arith.constant 0 : index
    %6 = vector.load %arg1[%c0_1, %c0_2, %c0_3] : memref<16x7x256xf32, #tpu.memory_space<vmem>>, vector<1x7x256xf32>
    %7 = vector.shape_cast %6 : vector<1x7x256xf32> to vector<7x256xf32>
    %cst = arith.constant dense<0.000000e+00> : vector<7x256xf32>
    %8 = tpu.matmul %1, %7, %cst {dimension_numbers = #tpu.dot_dimension_numbers<[1], [0], [0], [1], [0, 0, 1, 1], [], []>} : vector<7x7xf32>, vector<7x256xf32>, vector<7x256xf32> -> vector<7x256xf32>
    %9 = vector.broadcast %2 : vector<7x1xf32> to vector<7x256xf32>
    %10 = arith.addf %8, %9 : vector<7x256xf32>
    %cst_4 = arith.constant 0.000000e+00 : f32
    %11 = vector.broadcast %cst_4 : f32 to vector<7x256xf32>
    %12 = arith.cmpf oge, %10, %11 : vector<7x256xf32>
    %cst_5 = arith.constant 2.000000e-01 : f32
    %13 = vector.broadcast %cst_5 : f32 to vector<7x256xf32>
    %14 = arith.mulf %13, %10 : vector<7x256xf32>
    %15 = arith.select %12, %10, %14 : vector<7x256xi1>, vector<7x256xf32>
    %16 = vector.shape_cast %5 : vector<7x1xi1> to vector<7x1xi1>
    %17 = vector.broadcast %16 : vector<7x1xi1> to vector<7x256xi1>
    %18 = arith.select %17, %15, %10 : vector<7x256xi1>, vector<7x256xf32>
    %c0_6 = arith.constant 0 : index
    %c0_7 = arith.constant 0 : index
    %c0_8 = arith.constant 0 : index
    %19 = vector.load %arg6[%c0_6, %c0_7, %c0_8] : memref<16x7x256xf32, #tpu.memory_space<vmem>>, vector<1x7x256xf32>
    %20 = vector.shape_cast %19 : vector<1x7x256xf32> to vector<7x256xf32>
    %21 = vector.shape_cast %18 : vector<7x256xf32> to vector<1x7x256xf32>
    tpu.vector_store %arg6[%c0_6, %c0_7, %c0_8], %21 {strides = array<i32>} : memref<16x7x256xf32, #tpu.memory_space<vmem>>, vector<1x7x256xf32>,
    %c1 = arith.constant 1 : index
    %c0_9 = arith.constant 0 : index
    %c0_10 = arith.constant 0 : index
    %22 = vector.load %arg1[%c1, %c0_9, %c0_10] : memref<16x7x256xf32, #tpu.memory_space<vmem>>, vector<1x7x256xf32>
    %23 = vector.shape_cast %22 : vector<1x7x256xf32> to vector<7x256xf32>
    %cst_11 = arith.constant dense<0.000000e+00> : vector<7x256xf32>
    %24 = tpu.matmul %1, %23, %cst_11 {dimension_numbers = #tpu.dot_dimension_numbers<[1], [0], [0], [1], [0, 0, 1, 1], [], []>} : vector<7x7xf32>, vector<7x256xf32>, vector<7x256xf32> -> vector<7x256xf32>
    %25 = vector.broadcast %2 : vector<7x1xf32> to vector<7x256xf32>
    %26 = arith.addf %24, %25 : vector<7x256xf32>
    %cst_12 = arith.constant 0.000000e+00 : f32
    %27 = vector.broadcast %cst_12 : f32 to vector<7x256xf32>
    %28 = arith.cmpf oge, %26, %27 : vector<7x256xf32>
    %cst_13 = arith.constant 2.000000e-01 : f32
    %29 = vector.broadcast %cst_13 : f32 to vector<7x256xf32>
    %30 = arith.mulf %29, %26 : vector<7x256xf32>
    %31 = arith.select %28, %26, %30 : vector<7x256xi1>, vector<7x256xf32>
    %32 = vector.shape_cast %5 : vector<7x1xi1> to vector<7x1xi1>
    %33 = vector.broadcast %32 : vector<7x1xi1> to vector<7x256xi1>
    %34 = arith.select %33, %31, %26 : vector<7x256xi1>, vector<7x256xf32>
    %c1_14 = arith.constant 1 : index
    %c0_15 = arith.constant 0 : index
    %c0_16 = arith.constant 0 : index
    %35 = vector.load %arg6[%c1_14, %c0_15, %c0_16] : memref<16x7x256xf32, #tpu.memory_space<vmem>>, vector<1x7x256xf32>
    %36 = vector.shape_cast %35 : vector<1x7x256xf32> to vector<7x256xf32>
    %37 = vector.shape_cast %34 : vector<7x256xf32> to vector<1x7x256xf32>
    tpu.vector_store %arg6[%c1_14, %c0_15, %c0_16], %37 {strides = array<i32>} : memref<16x7x256xf32, #tpu.memory_space<vmem>>, vector<1x7x256xf32>,
    %c2 = arith.constant 2 : index
    %c0_17 = arith.constant 0 : index
    %c0_18 = arith.constant 0 : index
    %38 = vector.load %arg1[%c2, %c0_17, %c0_18] : memref<16x7x256xf32, #tpu.memory_space<vmem>>, vector<1x7x256xf32>
    %39 = vector.shape_cast %38 : vector<1x7x256xf32> to vector<7x256xf32>
    %cst_19 = arith.constant dense<0.000000e+00> : vector<7x256xf32>
    %40 = tpu.matmul %1, %39, %cst_19 {dimension_numbers = #tpu.dot_dimension_numbers<[1], [0], [0], [1], [0, 0, 1, 1], [], []>} : vector<7x7xf32>, vector<7x256xf32>, vector<7x256xf32> -> vector<7x256xf32>
    %41 = vector.broadcast %2 : vector<7x1xf32> to vector<7x256xf32>
    %42 = arith.addf %40, %41 : vector<7x256xf32>
    %cst_20 = arith.constant 0.000000e+00 : f32
    %43 = vector.broadcast %cst_20 : f32 to vector<7x256xf32>
    %44 = arith.cmpf oge, %42, %43 : vector<7x256xf32>
    %cst_21 = arith.constant 2.000000e-01 : f32
    %45 = vector.broadcast %cst_21 : f32 to vector<7x256xf32>
    %46 = arith.mulf %45, %42 : vector<7x256xf32>
    %47 = arith.select %44, %42, %46 : vector<7x256xi1>, vector<7x256xf32>
    %48 = vector.shape_cast %5 : vector<7x1xi1> to vector<7x1xi1>
    %49 = vector.broadcast %48 : vector<7x1xi1> to vector<7x256xi1>
    %50 = arith.select %49, %47, %42 : vector<7x256xi1>, vector<7x256xf32>
    %c2_22 = arith.constant 2 : index
    %c0_23 = arith.constant 0 : index
    %c0_24 = arith.constant 0 : index
    %51 = vector.load %arg6[%c2_22, %c0_23, %c0_24] : memref<16x7x256xf32, #tpu.memory_space<vmem>>, vector<1x7x256xf32>
    %52 = vector.shape_cast %51 : vector<1x7x256xf32> to vector<7x256xf32>
    %53 = vector.shape_cast %50 : vector<7x256xf32> to vector<1x7x256xf32>
    tpu.vector_store %arg6[%c2_22, %c0_23, %c0_24], %53 {strides = array<i32>} : memref<16x7x256xf32, #tpu.memory_space<vmem>>, vector<1x7x256xf32>,
    %c3 = arith.constant 3 : index
    %c0_25 = arith.constant 0 : index
    %c0_26 = arith.constant 0 : index
    %54 = vector.load %arg1[%c3, %c0_25, %c0_26] : memref<16x7x256xf32, #tpu.memory_space<vmem>>, vector<1x7x256xf32>
    %55 = vector.shape_cast %54 : vector<1x7x256xf32> to vector<7x256xf32>
    %cst_27 = arith.constant dense<0.000000e+00> : vector<7x256xf32>
    %56 = tpu.matmul %1, %55, %cst_27 {dimension_numbers = #tpu.dot_dimension_numbers<[1], [0], [0], [1], [0, 0, 1, 1], [], []>} : vector<7x7xf32>, vector<7x256xf32>, vector<7x256xf32> -> vector<7x256xf32>
    %57 = vector.broadcast %2 : vector<7x1xf32> to vector<7x256xf32>
    %58 = arith.addf %56, %57 : vector<7x256xf32>
    %cst_28 = arith.constant 0.000000e+00 : f32
    %59 = vector.broadcast %cst_28 : f32 to vector<7x256xf32>
    %60 = arith.cmpf oge, %58, %59 : vector<7x256xf32>
    %cst_29 = arith.constant 2.000000e-01 : f32
    %61 = vector.broadcast %cst_29 : f32 to vector<7x256xf32>
    %62 = arith.mulf %61, %58 : vector<7x256xf32>
    %63 = arith.select %60, %58, %62 : vector<7x256xi1>, vector<7x256xf32>
    %64 = vector.shape_cast %5 : vector<7x1xi1> to vector<7x1xi1>
    %65 = vector.broadcast %64 : vector<7x1xi1> to vector<7x256xi1>
    %66 = arith.select %65, %63, %58 : vector<7x256xi1>, vector<7x256xf32>
    %c3_30 = arith.constant 3 : index
    %c0_31 = arith.constant 0 : index
    %c0_32 = arith.constant 0 : index
    %67 = vector.load %arg6[%c3_30, %c0_31, %c0_32] : memref<16x7x256xf32, #tpu.memory_space<vmem>>, vector<1x7x256xf32>
    %68 = vector.shape_cast %67 : vector<1x7x256xf32> to vector<7x256xf32>
    %69 = vector.shape_cast %66 : vector<7x256xf32> to vector<1x7x256xf32>
    tpu.vector_store %arg6[%c3_30, %c0_31, %c0_32], %69 {strides = array<i32>} : memref<16x7x256xf32, #tpu.memory_space<vmem>>, vector<1x7x256xf32>,
    %c4 = arith.constant 4 : index
    %c0_33 = arith.constant 0 : index
    %c0_34 = arith.constant 0 : index
    %70 = vector.load %arg1[%c4, %c0_33, %c0_34] : memref<16x7x256xf32, #tpu.memory_space<vmem>>, vector<1x7x256xf32>
    %71 = vector.shape_cast %70 : vector<1x7x256xf32> to vector<7x256xf32>
    %cst_35 = arith.constant dense<0.000000e+00> : vector<7x256xf32>
    %72 = tpu.matmul %1, %71, %cst_35 {dimension_numbers = #tpu.dot_dimension_numbers<[1], [0], [0], [1], [0, 0, 1, 1], [], []>} : vector<7x7xf32>, vector<7x256xf32>, vector<7x256xf32> -> vector<7x256xf32>
    %73 = vector.broadcast %2 : vector<7x1xf32> to vector<7x256xf32>
    %74 = arith.addf %72, %73 : vector<7x256xf32>
    %cst_36 = arith.constant 0.000000e+00 : f32
    %75 = vector.broadcast %cst_36 : f32 to vector<7x256xf32>
    %76 = arith.cmpf oge, %74, %75 : vector<7x256xf32>
    %cst_37 = arith.constant 2.000000e-01 : f32
    %77 = vector.broadcast %cst_37 : f32 to vector<7x256xf32>
    %78 = arith.mulf %77, %74 : vector<7x256xf32>
    %79 = arith.select %76, %74, %78 : vector<7x256xi1>, vector<7x256xf32>
    %80 = vector.shape_cast %5 : vector<7x1xi1> to vector<7x1xi1>
    %81 = vector.broadcast %80 : vector<7x1xi1> to vector<7x256xi1>
    %82 = arith.select %81, %79, %74 : vector<7x256xi1>, vector<7x256xf32>
    %c4_38 = arith.constant 4 : index
    %c0_39 = arith.constant 0 : index
    %c0_40 = arith.constant 0 : index
    %83 = vector.load %arg6[%c4_38, %c0_39, %c0_40] : memref<16x7x256xf32, #tpu.memory_space<vmem>>, vector<1x7x256xf32>
    %84 = vector.shape_cast %83 : vector<1x7x256xf32> to vector<7x256xf32>
    %85 = vector.shape_cast %82 : vector<7x256xf32> to vector<1x7x256xf32>
    tpu.vector_store %arg6[%c4_38, %c0_39, %c0_40], %85 {strides = array<i32>} : memref<16x7x256xf32, #tpu.memory_space<vmem>>, vector<1x7x256xf32>,
    %c5 = arith.constant 5 : index
    %c0_41 = arith.constant 0 : index
    %c0_42 = arith.constant 0 : index
    %86 = vector.load %arg1[%c5, %c0_41, %c0_42] : memref<16x7x256xf32, #tpu.memory_space<vmem>>, vector<1x7x256xf32>
    %87 = vector.shape_cast %86 : vector<1x7x256xf32> to vector<7x256xf32>
    %cst_43 = arith.constant dense<0.000000e+00> : vector<7x256xf32>
    %88 = tpu.matmul %1, %87, %cst_43 {dimension_numbers = #tpu.dot_dimension_numbers<[1], [0], [0], [1], [0, 0, 1, 1], [], []>} : vector<7x7xf32>, vector<7x256xf32>, vector<7x256xf32> -> vector<7x256xf32>
    %89 = vector.broadcast %2 : vector<7x1xf32> to vector<7x256xf32>
    %90 = arith.addf %88, %89 : vector<7x256xf32>
    %cst_44 = arith.constant 0.000000e+00 : f32
    %91 = vector.broadcast %cst_44 : f32 to vector<7x256xf32>
    %92 = arith.cmpf oge, %90, %91 : vector<7x256xf32>
    %cst_45 = arith.constant 2.000000e-01 : f32
    %93 = vector.broadcast %cst_45 : f32 to vector<7x256xf32>
    %94 = arith.mulf %93, %90 : vector<7x256xf32>
    %95 = arith.select %92, %90, %94 : vector<7x256xi1>, vector<7x256xf32>
    %96 = vector.shape_cast %5 : vector<7x1xi1> to vector<7x1xi1>
    %97 = vector.broadcast %96 : vector<7x1xi1> to vector<7x256xi1>
    %98 = arith.select %97, %95, %90 : vector<7x256xi1>, vector<7x256xf32>
    %c5_46 = arith.constant 5 : index
    %c0_47 = arith.constant 0 : index
    %c0_48 = arith.constant 0 : index
    %99 = vector.load %arg6[%c5_46, %c0_47, %c0_48] : memref<16x7x256xf32, #tpu.memory_space<vmem>>, vector<1x7x256xf32>
    %100 = vector.shape_cast %99 : vector<1x7x256xf32> to vector<7x256xf32>
    %101 = vector.shape_cast %98 : vector<7x256xf32> to vector<1x7x256xf32>
    tpu.vector_store %arg6[%c5_46, %c0_47, %c0_48], %101 {strides = array<i32>} : memref<16x7x256xf32, #tpu.memory_space<vmem>>, vector<1x7x256xf32>,
    %c6 = arith.constant 6 : index
    %c0_49 = arith.constant 0 : index
    %c0_50 = arith.constant 0 : index
    %102 = vector.load %arg1[%c6, %c0_49, %c0_50] : memref<16x7x256xf32, #tpu.memory_space<vmem>>, vector<1x7x256xf32>
    %103 = vector.shape_cast %102 : vector<1x7x256xf32> to vector<7x256xf32>
    %cst_51 = arith.constant dense<0.000000e+00> : vector<7x256xf32>
    %104 = tpu.matmul %1, %103, %cst_51 {dimension_numbers = #tpu.dot_dimension_numbers<[1], [0], [0], [1], [0, 0, 1, 1], [], []>} : vector<7x7xf32>, vector<7x256xf32>, vector<7x256xf32> -> vector<7x256xf32>
    %105 = vector.broadcast %2 : vector<7x1xf32> to vector<7x256xf32>
    %106 = arith.addf %104, %105 : vector<7x256xf32>
    %cst_52 = arith.constant 0.000000e+00 : f32
    %107 = vector.broadcast %cst_52 : f32 to vector<7x256xf32>
    %108 = arith.cmpf oge, %106, %107 : vector<7x256xf32>
    %cst_53 = arith.constant 2.000000e-01 : f32
    %109 = vector.broadcast %cst_53 : f32 to vector<7x256xf32>
    %110 = arith.mulf %109, %106 : vector<7x256xf32>
    %111 = arith.select %108, %106, %110 : vector<7x256xi1>, vector<7x256xf32>
    %112 = vector.shape_cast %5 : vector<7x1xi1> to vector<7x1xi1>
    %113 = vector.broadcast %112 : vector<7x1xi1> to vector<7x256xi1>
    %114 = arith.select %113, %111, %106 : vector<7x256xi1>, vector<7x256xf32>
    %c6_54 = arith.constant 6 : index
    %c0_55 = arith.constant 0 : index
    %c0_56 = arith.constant 0 : index
    %115 = vector.load %arg6[%c6_54, %c0_55, %c0_56] : memref<16x7x256xf32, #tpu.memory_space<vmem>>, vector<1x7x256xf32>
    %116 = vector.shape_cast %115 : vector<1x7x256xf32> to vector<7x256xf32>
    %117 = vector.shape_cast %114 : vector<7x256xf32> to vector<1x7x256xf32>
    tpu.vector_store %arg6[%c6_54, %c0_55, %c0_56], %117 {strides = array<i32>} : memref<16x7x256xf32, #tpu.memory_space<vmem>>, vector<1x7x256xf32>,
    %c7 = arith.constant 7 : index
    %c0_57 = arith.constant 0 : index
    %c0_58 = arith.constant 0 : index
    %118 = vector.load %arg1[%c7, %c0_57, %c0_58] : memref<16x7x256xf32, #tpu.memory_space<vmem>>, vector<1x7x256xf32>
    %119 = vector.shape_cast %118 : vector<1x7x256xf32> to vector<7x256xf32>
    %cst_59 = arith.constant dense<0.000000e+00> : vector<7x256xf32>
    %120 = tpu.matmul %1, %119, %cst_59 {dimension_numbers = #tpu.dot_dimension_numbers<[1], [0], [0], [1], [0, 0, 1, 1], [], []>} : vector<7x7xf32>, vector<7x256xf32>, vector<7x256xf32> -> vector<7x256xf32>
    %121 = vector.broadcast %2 : vector<7x1xf32> to vector<7x256xf32>
    %122 = arith.addf %120, %121 : vector<7x256xf32>
    %cst_60 = arith.constant 0.000000e+00 : f32
    %123 = vector.broadcast %cst_60 : f32 to vector<7x256xf32>
    %124 = arith.cmpf oge, %122, %123 : vector<7x256xf32>
    %cst_61 = arith.constant 2.000000e-01 : f32
    %125 = vector.broadcast %cst_61 : f32 to vector<7x256xf32>
    %126 = arith.mulf %125, %122 : vector<7x256xf32>
    %127 = arith.select %124, %122, %126 : vector<7x256xi1>, vector<7x256xf32>
    %128 = vector.shape_cast %5 : vector<7x1xi1> to vector<7x1xi1>
    %129 = vector.broadcast %128 : vector<7x1xi1> to vector<7x256xi1>
    %130 = arith.select %129, %127, %122 : vector<7x256xi1>, vector<7x256xf32>
    %c7_62 = arith.constant 7 : index
    %c0_63 = arith.constant 0 : index
    %c0_64 = arith.constant 0 : index
    %131 = vector.load %arg6[%c7_62, %c0_63, %c0_64] : memref<16x7x256xf32, #tpu.memory_space<vmem>>, vector<1x7x256xf32>
    %132 = vector.shape_cast %131 : vector<1x7x256xf32> to vector<7x256xf32>
    %133 = vector.shape_cast %130 : vector<7x256xf32> to vector<1x7x256xf32>
    tpu.vector_store %arg6[%c7_62, %c0_63, %c0_64], %133 {strides = array<i32>} : memref<16x7x256xf32, #tpu.memory_space<vmem>>, vector<1x7x256xf32>,
    %c8 = arith.constant 8 : index
    %c0_65 = arith.constant 0 : index
    %c0_66 = arith.constant 0 : index
    %134 = vector.load %arg1[%c8, %c0_65, %c0_66] : memref<16x7x256xf32, #tpu.memory_space<vmem>>, vector<1x7x256xf32>
    %135 = vector.shape_cast %134 : vector<1x7x256xf32> to vector<7x256xf32>
    %cst_67 = arith.constant dense<0.000000e+00> : vector<7x256xf32>
    %136 = tpu.matmul %1, %135, %cst_67 {dimension_numbers = #tpu.dot_dimension_numbers<[1], [0], [0], [1], [0, 0, 1, 1], [], []>} : vector<7x7xf32>, vector<7x256xf32>, vector<7x256xf32> -> vector<7x256xf32>
    %137 = vector.broadcast %2 : vector<7x1xf32> to vector<7x256xf32>
    %138 = arith.addf %136, %137 : vector<7x256xf32>
    %cst_68 = arith.constant 0.000000e+00 : f32
    %139 = vector.broadcast %cst_68 : f32 to vector<7x256xf32>
    %140 = arith.cmpf oge, %138, %139 : vector<7x256xf32>
    %cst_69 = arith.constant 2.000000e-01 : f32
    %141 = vector.broadcast %cst_69 : f32 to vector<7x256xf32>
    %142 = arith.mulf %141, %138 : vector<7x256xf32>
    %143 = arith.select %140, %138, %142 : vector<7x256xi1>, vector<7x256xf32>
    %144 = vector.shape_cast %5 : vector<7x1xi1> to vector<7x1xi1>
    %145 = vector.broadcast %144 : vector<7x1xi1> to vector<7x256xi1>
    %146 = arith.select %145, %143, %138 : vector<7x256xi1>, vector<7x256xf32>
    %c8_70 = arith.constant 8 : index
    %c0_71 = arith.constant 0 : index
    %c0_72 = arith.constant 0 : index
    %147 = vector.load %arg6[%c8_70, %c0_71, %c0_72] : memref<16x7x256xf32, #tpu.memory_space<vmem>>, vector<1x7x256xf32>
    %148 = vector.shape_cast %147 : vector<1x7x256xf32> to vector<7x256xf32>
    %149 = vector.shape_cast %146 : vector<7x256xf32> to vector<1x7x256xf32>
    tpu.vector_store %arg6[%c8_70, %c0_71, %c0_72], %149 {strides = array<i32>} : memref<16x7x256xf32, #tpu.memory_space<vmem>>, vector<1x7x256xf32>,
    %c9 = arith.constant 9 : index
    %c0_73 = arith.constant 0 : index
    %c0_74 = arith.constant 0 : index
    %150 = vector.load %arg1[%c9, %c0_73, %c0_74] : memref<16x7x256xf32, #tpu.memory_space<vmem>>, vector<1x7x256xf32>
    %151 = vector.shape_cast %150 : vector<1x7x256xf32> to vector<7x256xf32>
    %cst_75 = arith.constant dense<0.000000e+00> : vector<7x256xf32>
    %152 = tpu.matmul %1, %151, %cst_75 {dimension_numbers = #tpu.dot_dimension_numbers<[1], [0], [0], [1], [0, 0, 1, 1], [], []>} : vector<7x7xf32>, vector<7x256xf32>, vector<7x256xf32> -> vector<7x256xf32>
    %153 = vector.broadcast %2 : vector<7x1xf32> to vector<7x256xf32>
    %154 = arith.addf %152, %153 : vector<7x256xf32>
    %cst_76 = arith.constant 0.000000e+00 : f32
    %155 = vector.broadcast %cst_76 : f32 to vector<7x256xf32>
    %156 = arith.cmpf oge, %154, %155 : vector<7x256xf32>
    %cst_77 = arith.constant 2.000000e-01 : f32
    %157 = vector.broadcast %cst_77 : f32 to vector<7x256xf32>
    %158 = arith.mulf %157, %154 : vector<7x256xf32>
    %159 = arith.select %156, %154, %158 : vector<7x256xi1>, vector<7x256xf32>
    %160 = vector.shape_cast %5 : vector<7x1xi1> to vector<7x1xi1>
    %161 = vector.broadcast %160 : vector<7x1xi1> to vector<7x256xi1>
    %162 = arith.select %161, %159, %154 : vector<7x256xi1>, vector<7x256xf32>
    %c9_78 = arith.constant 9 : index
    %c0_79 = arith.constant 0 : index
    %c0_80 = arith.constant 0 : index
    %163 = vector.load %arg6[%c9_78, %c0_79, %c0_80] : memref<16x7x256xf32, #tpu.memory_space<vmem>>, vector<1x7x256xf32>
    %164 = vector.shape_cast %163 : vector<1x7x256xf32> to vector<7x256xf32>
    %165 = vector.shape_cast %162 : vector<7x256xf32> to vector<1x7x256xf32>
    tpu.vector_store %arg6[%c9_78, %c0_79, %c0_80], %165 {strides = array<i32>} : memref<16x7x256xf32, #tpu.memory_space<vmem>>, vector<1x7x256xf32>,
    %c10 = arith.constant 10 : index
    %c0_81 = arith.constant 0 : index
    %c0_82 = arith.constant 0 : index
    %166 = vector.load %arg1[%c10, %c0_81, %c0_82] : memref<16x7x256xf32, #tpu.memory_space<vmem>>, vector<1x7x256xf32>
    %167 = vector.shape_cast %166 : vector<1x7x256xf32> to vector<7x256xf32>
    %cst_83 = arith.constant dense<0.000000e+00> : vector<7x256xf32>
    %168 = tpu.matmul %1, %167, %cst_83 {dimension_numbers = #tpu.dot_dimension_numbers<[1], [0], [0], [1], [0, 0, 1, 1], [], []>} : vector<7x7xf32>, vector<7x256xf32>, vector<7x256xf32> -> vector<7x256xf32>
    %169 = vector.broadcast %2 : vector<7x1xf32> to vector<7x256xf32>
    %170 = arith.addf %168, %169 : vector<7x256xf32>
    %cst_84 = arith.constant 0.000000e+00 : f32
    %171 = vector.broadcast %cst_84 : f32 to vector<7x256xf32>
    %172 = arith.cmpf oge, %170, %171 : vector<7x256xf32>
    %cst_85 = arith.constant 2.000000e-01 : f32
    %173 = vector.broadcast %cst_85 : f32 to vector<7x256xf32>
    %174 = arith.mulf %173, %170 : vector<7x256xf32>
    %175 = arith.select %172, %170, %174 : vector<7x256xi1>, vector<7x256xf32>
    %176 = vector.shape_cast %5 : vector<7x1xi1> to vector<7x1xi1>
    %177 = vector.broadcast %176 : vector<7x1xi1> to vector<7x256xi1>
    %178 = arith.select %177, %175, %170 : vector<7x256xi1>, vector<7x256xf32>
    %c10_86 = arith.constant 10 : index
    %c0_87 = arith.constant 0 : index
    %c0_88 = arith.constant 0 : index
    %179 = vector.load %arg6[%c10_86, %c0_87, %c0_88] : memref<16x7x256xf32, #tpu.memory_space<vmem>>, vector<1x7x256xf32>
    %180 = vector.shape_cast %179 : vector<1x7x256xf32> to vector<7x256xf32>
    %181 = vector.shape_cast %178 : vector<7x256xf32> to vector<1x7x256xf32>
    tpu.vector_store %arg6[%c10_86, %c0_87, %c0_88], %181 {strides = array<i32>} : memref<16x7x256xf32, #tpu.memory_space<vmem>>, vector<1x7x256xf32>,
    %c11 = arith.constant 11 : index
    %c0_89 = arith.constant 0 : index
    %c0_90 = arith.constant 0 : index
    %182 = vector.load %arg1[%c11, %c0_89, %c0_90] : memref<16x7x256xf32, #tpu.memory_space<vmem>>, vector<1x7x256xf32>
    %183 = vector.shape_cast %182 : vector<1x7x256xf32> to vector<7x256xf32>
    %cst_91 = arith.constant dense<0.000000e+00> : vector<7x256xf32>
    %184 = tpu.matmul %1, %183, %cst_91 {dimension_numbers = #tpu.dot_dimension_numbers<[1], [0], [0], [1], [0, 0, 1, 1], [], []>} : vector<7x7xf32>, vector<7x256xf32>, vector<7x256xf32> -> vector<7x256xf32>
    %185 = vector.broadcast %2 : vector<7x1xf32> to vector<7x256xf32>
    %186 = arith.addf %184, %185 : vector<7x256xf32>
    %cst_92 = arith.constant 0.000000e+00 : f32
    %187 = vector.broadcast %cst_92 : f32 to vector<7x256xf32>
    %188 = arith.cmpf oge, %186, %187 : vector<7x256xf32>
    %cst_93 = arith.constant 2.000000e-01 : f32
    %189 = vector.broadcast %cst_93 : f32 to vector<7x256xf32>
    %190 = arith.mulf %189, %186 : vector<7x256xf32>
    %191 = arith.select %188, %186, %190 : vector<7x256xi1>, vector<7x256xf32>
    %192 = vector.shape_cast %5 : vector<7x1xi1> to vector<7x1xi1>
    %193 = vector.broadcast %192 : vector<7x1xi1> to vector<7x256xi1>
    %194 = arith.select %193, %191, %186 : vector<7x256xi1>, vector<7x256xf32>
    %c11_94 = arith.constant 11 : index
    %c0_95 = arith.constant 0 : index
    %c0_96 = arith.constant 0 : index
    %195 = vector.load %arg6[%c11_94, %c0_95, %c0_96] : memref<16x7x256xf32, #tpu.memory_space<vmem>>, vector<1x7x256xf32>
    %196 = vector.shape_cast %195 : vector<1x7x256xf32> to vector<7x256xf32>
    %197 = vector.shape_cast %194 : vector<7x256xf32> to vector<1x7x256xf32>
    tpu.vector_store %arg6[%c11_94, %c0_95, %c0_96], %197 {strides = array<i32>} : memref<16x7x256xf32, #tpu.memory_space<vmem>>, vector<1x7x256xf32>,
    %c12 = arith.constant 12 : index
    %c0_97 = arith.constant 0 : index
    %c0_98 = arith.constant 0 : index
    %198 = vector.load %arg1[%c12, %c0_97, %c0_98] : memref<16x7x256xf32, #tpu.memory_space<vmem>>, vector<1x7x256xf32>
    %199 = vector.shape_cast %198 : vector<1x7x256xf32> to vector<7x256xf32>
    %cst_99 = arith.constant dense<0.000000e+00> : vector<7x256xf32>
    %200 = tpu.matmul %1, %199, %cst_99 {dimension_numbers = #tpu.dot_dimension_numbers<[1], [0], [0], [1], [0, 0, 1, 1], [], []>} : vector<7x7xf32>, vector<7x256xf32>, vector<7x256xf32> -> vector<7x256xf32>
    %201 = vector.broadcast %2 : vector<7x1xf32> to vector<7x256xf32>
    %202 = arith.addf %200, %201 : vector<7x256xf32>
    %cst_100 = arith.constant 0.000000e+00 : f32
    %203 = vector.broadcast %cst_100 : f32 to vector<7x256xf32>
    %204 = arith.cmpf oge, %202, %203 : vector<7x256xf32>
    %cst_101 = arith.constant 2.000000e-01 : f32
    %205 = vector.broadcast %cst_101 : f32 to vector<7x256xf32>
    %206 = arith.mulf %205, %202 : vector<7x256xf32>
    %207 = arith.select %204, %202, %206 : vector<7x256xi1>, vector<7x256xf32>
    %208 = vector.shape_cast %5 : vector<7x1xi1> to vector<7x1xi1>
    %209 = vector.broadcast %208 : vector<7x1xi1> to vector<7x256xi1>
    %210 = arith.select %209, %207, %202 : vector<7x256xi1>, vector<7x256xf32>
    %c12_102 = arith.constant 12 : index
    %c0_103 = arith.constant 0 : index
    %c0_104 = arith.constant 0 : index
    %211 = vector.load %arg6[%c12_102, %c0_103, %c0_104] : memref<16x7x256xf32, #tpu.memory_space<vmem>>, vector<1x7x256xf32>
    %212 = vector.shape_cast %211 : vector<1x7x256xf32> to vector<7x256xf32>
    %213 = vector.shape_cast %210 : vector<7x256xf32> to vector<1x7x256xf32>
    tpu.vector_store %arg6[%c12_102, %c0_103, %c0_104], %213 {strides = array<i32>} : memref<16x7x256xf32, #tpu.memory_space<vmem>>, vector<1x7x256xf32>,
    %c13 = arith.constant 13 : index
    %c0_105 = arith.constant 0 : index
    %c0_106 = arith.constant 0 : index
    %214 = vector.load %arg1[%c13, %c0_105, %c0_106] : memref<16x7x256xf32, #tpu.memory_space<vmem>>, vector<1x7x256xf32>
    %215 = vector.shape_cast %214 : vector<1x7x256xf32> to vector<7x256xf32>
    %cst_107 = arith.constant dense<0.000000e+00> : vector<7x256xf32>
    %216 = tpu.matmul %1, %215, %cst_107 {dimension_numbers = #tpu.dot_dimension_numbers<[1], [0], [0], [1], [0, 0, 1, 1], [], []>} : vector<7x7xf32>, vector<7x256xf32>, vector<7x256xf32> -> vector<7x256xf32>
    %217 = vector.broadcast %2 : vector<7x1xf32> to vector<7x256xf32>
    %218 = arith.addf %216, %217 : vector<7x256xf32>
    %cst_108 = arith.constant 0.000000e+00 : f32
    %219 = vector.broadcast %cst_108 : f32 to vector<7x256xf32>
    %220 = arith.cmpf oge, %218, %219 : vector<7x256xf32>
    %cst_109 = arith.constant 2.000000e-01 : f32
    %221 = vector.broadcast %cst_109 : f32 to vector<7x256xf32>
    %222 = arith.mulf %221, %218 : vector<7x256xf32>
    %223 = arith.select %220, %218, %222 : vector<7x256xi1>, vector<7x256xf32>
    %224 = vector.shape_cast %5 : vector<7x1xi1> to vector<7x1xi1>
    %225 = vector.broadcast %224 : vector<7x1xi1> to vector<7x256xi1>
    %226 = arith.select %225, %223, %218 : vector<7x256xi1>, vector<7x256xf32>
    %c13_110 = arith.constant 13 : index
    %c0_111 = arith.constant 0 : index
    %c0_112 = arith.constant 0 : index
    %227 = vector.load %arg6[%c13_110, %c0_111, %c0_112] : memref<16x7x256xf32, #tpu.memory_space<vmem>>, vector<1x7x256xf32>
    %228 = vector.shape_cast %227 : vector<1x7x256xf32> to vector<7x256xf32>
    %229 = vector.shape_cast %226 : vector<7x256xf32> to vector<1x7x256xf32>
    tpu.vector_store %arg6[%c13_110, %c0_111, %c0_112], %229 {strides = array<i32>} : memref<16x7x256xf32, #tpu.memory_space<vmem>>, vector<1x7x256xf32>,
    %c14 = arith.constant 14 : index
    %c0_113 = arith.constant 0 : index
    %c0_114 = arith.constant 0 : index
    %230 = vector.load %arg1[%c14, %c0_113, %c0_114] : memref<16x7x256xf32, #tpu.memory_space<vmem>>, vector<1x7x256xf32>
    %231 = vector.shape_cast %230 : vector<1x7x256xf32> to vector<7x256xf32>
    %cst_115 = arith.constant dense<0.000000e+00> : vector<7x256xf32>
    %232 = tpu.matmul %1, %231, %cst_115 {dimension_numbers = #tpu.dot_dimension_numbers<[1], [0], [0], [1], [0, 0, 1, 1], [], []>} : vector<7x7xf32>, vector<7x256xf32>, vector<7x256xf32> -> vector<7x256xf32>
    %233 = vector.broadcast %2 : vector<7x1xf32> to vector<7x256xf32>
    %234 = arith.addf %232, %233 : vector<7x256xf32>
    %cst_116 = arith.constant 0.000000e+00 : f32
    %235 = vector.broadcast %cst_116 : f32 to vector<7x256xf32>
    %236 = arith.cmpf oge, %234, %235 : vector<7x256xf32>
    %cst_117 = arith.constant 2.000000e-01 : f32
    %237 = vector.broadcast %cst_117 : f32 to vector<7x256xf32>
    %238 = arith.mulf %237, %234 : vector<7x256xf32>
    %239 = arith.select %236, %234, %238 : vector<7x256xi1>, vector<7x256xf32>
    %240 = vector.shape_cast %5 : vector<7x1xi1> to vector<7x1xi1>
    %241 = vector.broadcast %240 : vector<7x1xi1> to vector<7x256xi1>
    %242 = arith.select %241, %239, %234 : vector<7x256xi1>, vector<7x256xf32>
    %c14_118 = arith.constant 14 : index
    %c0_119 = arith.constant 0 : index
    %c0_120 = arith.constant 0 : index
    %243 = vector.load %arg6[%c14_118, %c0_119, %c0_120] : memref<16x7x256xf32, #tpu.memory_space<vmem>>, vector<1x7x256xf32>
    %244 = vector.shape_cast %243 : vector<1x7x256xf32> to vector<7x256xf32>
    %245 = vector.shape_cast %242 : vector<7x256xf32> to vector<1x7x256xf32>
    tpu.vector_store %arg6[%c14_118, %c0_119, %c0_120], %245 {strides = array<i32>} : memref<16x7x256xf32, #tpu.memory_space<vmem>>, vector<1x7x256xf32>,
    %c15 = arith.constant 15 : index
    %c0_121 = arith.constant 0 : index
    %c0_122 = arith.constant 0 : index
    %246 = vector.load %arg1[%c15, %c0_121, %c0_122] : memref<16x7x256xf32, #tpu.memory_space<vmem>>, vector<1x7x256xf32>
    %247 = vector.shape_cast %246 : vector<1x7x256xf32> to vector<7x256xf32>
    %cst_123 = arith.constant dense<0.000000e+00> : vector<7x256xf32>
    %248 = tpu.matmul %1, %247, %cst_123 {dimension_numbers = #tpu.dot_dimension_numbers<[1], [0], [0], [1], [0, 0, 1, 1], [], []>} : vector<7x7xf32>, vector<7x256xf32>, vector<7x256xf32> -> vector<7x256xf32>
    %249 = vector.broadcast %2 : vector<7x1xf32> to vector<7x256xf32>
    %250 = arith.addf %248, %249 : vector<7x256xf32>
    %cst_124 = arith.constant 0.000000e+00 : f32
    %251 = vector.broadcast %cst_124 : f32 to vector<7x256xf32>
    %252 = arith.cmpf oge, %250, %251 : vector<7x256xf32>
    %cst_125 = arith.constant 2.000000e-01 : f32
    %253 = vector.broadcast %cst_125 : f32 to vector<7x256xf32>
    %254 = arith.mulf %253, %250 : vector<7x256xf32>
    %255 = arith.select %252, %250, %254 : vector<7x256xi1>, vector<7x256xf32>
    %256 = vector.shape_cast %5 : vector<7x1xi1> to vector<7x1xi1>
    %257 = vector.broadcast %256 : vector<7x1xi1> to vector<7x256xi1>
    %258 = arith.select %257, %255, %250 : vector<7x256xi1>, vector<7x256xf32>
    %c15_126 = arith.constant 15 : index
    %c0_127 = arith.constant 0 : index
    %c0_128 = arith.constant 0 : index
    %259 = vector.load %arg6[%c15_126, %c0_127, %c0_128] : memref<16x7x256xf32, #tpu.memory_space<vmem>>, vector<1x7x256xf32>
    %260 = vector.shape_cast %259 : vector<1x7x256xf32> to vector<7x256xf32>
    %261 = vector.shape_cast %258 : vector<7x256xf32> to vector<1x7x256xf32>
    tpu.vector_store %arg6[%c15_126, %c0_127, %c0_128], %261 {strides = array<i32>} : memref<16x7x256xf32, #tpu.memory_space<vmem>>, vector<1x7x256xf32>,
    %cst_129 = arith.constant 1.000000e+00 : f32
    %262 = vector.broadcast %cst_129 : f32 to vector<6x256xf32>
    %263 = tpu.iota {dimensions = array<i32: 0>} : vector<6x1xi32>
    %c3_i32 = arith.constant 3 : i32
    %264 = vector.broadcast %c3_i32 : i32 to vector<6x1xi32>
    %265 = arith.cmpi slt, %263, %264 : vector<6x1xi32>
    %c0_130 = arith.constant 0 : index
    %c0_131 = arith.constant 0 : index
    %c0_132 = arith.constant 0 : index
    %266 = vector.load %arg3[%c0_130, %c0_131, %c0_132] : memref<3x13x14xf32, #tpu.memory_space<vmem>>, vector<1x13x14xf32>
    %267 = vector.shape_cast %266 : vector<1x13x14xf32> to vector<13x14xf32>
    %268 = vector.extract_strided_slice %267 {offsets = [0, 0], sizes = [13, 7], strides = [1, 1]} : vector<13x14xf32> to vector<13x7xf32>
    %269 = vector.extract_strided_slice %267 {offsets = [0, 7], sizes = [13, 6], strides = [1, 1]} : vector<13x14xf32> to vector<13x6xf32>
    %270 = vector.extract_strided_slice %267 {offsets = [0, 13], sizes = [13, 1], strides = [1, 1]} : vector<13x14xf32> to vector<13x1xf32>
    %c0_133 = arith.constant 0 : index
    %c0_134 = arith.constant 0 : index
    %c0_135 = arith.constant 0 : index
    %271 = vector.load %arg4[%c0_133, %c0_134, %c0_135] : memref<3x6x16xf32, #tpu.memory_space<vmem>>, vector<1x6x16xf32>
    %272 = vector.shape_cast %271 : vector<1x6x16xf32> to vector<6x16xf32>
    %273 = vector.extract_strided_slice %272 {offsets = [0, 0], sizes = [6, 13], strides = [1, 1]} : vector<6x16xf32> to vector<6x13xf32>
    %274 = vector.extract_strided_slice %272 {offsets = [0, 13], sizes = [6, 1], strides = [1, 1]} : vector<6x16xf32> to vector<6x1xf32>
    %275 = vector.extract_strided_slice %272 {offsets = [0, 14], sizes = [6, 1], strides = [1, 1]} : vector<6x16xf32> to vector<6x1xf32>
    %276 = vector.extract_strided_slice %272 {offsets = [0, 15], sizes = [6, 1], strides = [1, 1]} : vector<6x16xf32> to vector<6x1xf32>
    %cst_136 = arith.constant dense<0.000000e+00> : vector<13x256xf32>
    %277 = tpu.matmul %269, %262, %cst_136 {dimension_numbers = #tpu.dot_dimension_numbers<[1], [0], [0], [1], [0, 0, 1, 1], [], []>} : vector<13x6xf32>, vector<6x256xf32>, vector<13x256xf32> -> vector<13x256xf32>
    %278 = vector.broadcast %270 : vector<13x1xf32> to vector<13x256xf32>
    %279 = arith.addf %277, %278 : vector<13x256xf32>
    %cst_137 = arith.constant 0.000000e+00 : f32
    %280 = vector.broadcast %cst_137 : f32 to vector<13x256xf32>
    %c0_138 = arith.constant 0 : index
    %c0_139 = arith.constant 0 : index
    %c0_140 = arith.constant 0 : index
    %281 = vector.load %arg6[%c0_138, %c0_139, %c0_140] : memref<16x7x256xf32, #tpu.memory_space<vmem>>, vector<1x7x256xf32>
    %282 = vector.shape_cast %281 : vector<1x7x256xf32> to vector<7x256xf32>
    %cst_141 = arith.constant dense<0.000000e+00> : vector<13x256xf32>
    %283 = tpu.matmul %268, %282, %cst_141 {dimension_numbers = #tpu.dot_dimension_numbers<[1], [0], [0], [1], [0, 0, 1, 1], [], []>} : vector<13x7xf32>, vector<7x256xf32>, vector<13x256xf32> -> vector<13x256xf32>
    %284 = arith.addf %283, %279 : vector<13x256xf32>
    %cst_142 = arith.constant 0.000000e+00 : f32
    %285 = vector.broadcast %cst_142 : f32 to vector<13x256xf32>
    %286 = arith.cmpf oge, %284, %285 : vector<13x256xf32>
    %cst_143 = arith.constant 2.000000e-01 : f32
    %287 = vector.broadcast %cst_143 : f32 to vector<13x256xf32>
    %288 = arith.mulf %287, %284 : vector<13x256xf32>
    %289 = arith.select %286, %284, %288 : vector<13x256xi1>, vector<13x256xf32>
    %290 = arith.addf %280, %289 : vector<13x256xf32>
    %c1_144 = arith.constant 1 : index
    %c0_145 = arith.constant 0 : index
    %c0_146 = arith.constant 0 : index
    %291 = vector.load %arg6[%c1_144, %c0_145, %c0_146] : memref<16x7x256xf32, #tpu.memory_space<vmem>>, vector<1x7x256xf32>
    %292 = vector.shape_cast %291 : vector<1x7x256xf32> to vector<7x256xf32>
    %cst_147 = arith.constant dense<0.000000e+00> : vector<13x256xf32>
    %293 = tpu.matmul %268, %292, %cst_147 {dimension_numbers = #tpu.dot_dimension_numbers<[1], [0], [0], [1], [0, 0, 1, 1], [], []>} : vector<13x7xf32>, vector<7x256xf32>, vector<13x256xf32> -> vector<13x256xf32>
    %294 = arith.addf %293, %279 : vector<13x256xf32>
    %cst_148 = arith.constant 0.000000e+00 : f32
    %295 = vector.broadcast %cst_148 : f32 to vector<13x256xf32>
    %296 = arith.cmpf oge, %294, %295 : vector<13x256xf32>
    %cst_149 = arith.constant 2.000000e-01 : f32
    %297 = vector.broadcast %cst_149 : f32 to vector<13x256xf32>
    %298 = arith.mulf %297, %294 : vector<13x256xf32>
    %299 = arith.select %296, %294, %298 : vector<13x256xi1>, vector<13x256xf32>
    %300 = arith.addf %290, %299 : vector<13x256xf32>
    %c2_150 = arith.constant 2 : index
    %c0_151 = arith.constant 0 : index
    %c0_152 = arith.constant 0 : index
    %301 = vector.load %arg6[%c2_150, %c0_151, %c0_152] : memref<16x7x256xf32, #tpu.memory_space<vmem>>, vector<1x7x256xf32>
    %302 = vector.shape_cast %301 : vector<1x7x256xf32> to vector<7x256xf32>
    %cst_153 = arith.constant dense<0.000000e+00> : vector<13x256xf32>
    %303 = tpu.matmul %268, %302, %cst_153 {dimension_numbers = #tpu.dot_dimension_numbers<[1], [0], [0], [1], [0, 0, 1, 1], [], []>} : vector<13x7xf32>, vector<7x256xf32>, vector<13x256xf32> -> vector<13x256xf32>
    %304 = arith.addf %303, %279 : vector<13x256xf32>
    %cst_154 = arith.constant 0.000000e+00 : f32
    %305 = vector.broadcast %cst_154 : f32 to vector<13x256xf32>
    %306 = arith.cmpf oge, %304, %305 : vector<13x256xf32>
    %cst_155 = arith.constant 2.000000e-01 : f32
    %307 = vector.broadcast %cst_155 : f32 to vector<13x256xf32>
    %308 = arith.mulf %307, %304 : vector<13x256xf32>
    %309 = arith.select %306, %304, %308 : vector<13x256xi1>, vector<13x256xf32>
    %310 = arith.addf %300, %309 : vector<13x256xf32>
    %c3_156 = arith.constant 3 : index
    %c0_157 = arith.constant 0 : index
    %c0_158 = arith.constant 0 : index
    %311 = vector.load %arg6[%c3_156, %c0_157, %c0_158] : memref<16x7x256xf32, #tpu.memory_space<vmem>>, vector<1x7x256xf32>
    %312 = vector.shape_cast %311 : vector<1x7x256xf32> to vector<7x256xf32>
    %cst_159 = arith.constant dense<0.000000e+00> : vector<13x256xf32>
    %313 = tpu.matmul %268, %312, %cst_159 {dimension_numbers = #tpu.dot_dimension_numbers<[1], [0], [0], [1], [0, 0, 1, 1], [], []>} : vector<13x7xf32>, vector<7x256xf32>, vector<13x256xf32> -> vector<13x256xf32>
    %314 = arith.addf %313, %279 : vector<13x256xf32>
    %cst_160 = arith.constant 0.000000e+00 : f32
    %315 = vector.broadcast %cst_160 : f32 to vector<13x256xf32>
    %316 = arith.cmpf oge, %314, %315 : vector<13x256xf32>
    %cst_161 = arith.constant 2.000000e-01 : f32
    %317 = vector.broadcast %cst_161 : f32 to vector<13x256xf32>
    %318 = arith.mulf %317, %314 : vector<13x256xf32>
    %319 = arith.select %316, %314, %318 : vector<13x256xi1>, vector<13x256xf32>
    %320 = arith.addf %310, %319 : vector<13x256xf32>
    %c4_162 = arith.constant 4 : index
    %c0_163 = arith.constant 0 : index
    %c0_164 = arith.constant 0 : index
    %321 = vector.load %arg6[%c4_162, %c0_163, %c0_164] : memref<16x7x256xf32, #tpu.memory_space<vmem>>, vector<1x7x256xf32>
    %322 = vector.shape_cast %321 : vector<1x7x256xf32> to vector<7x256xf32>
    %cst_165 = arith.constant dense<0.000000e+00> : vector<13x256xf32>
    %323 = tpu.matmul %268, %322, %cst_165 {dimension_numbers = #tpu.dot_dimension_numbers<[1], [0], [0], [1], [0, 0, 1, 1], [], []>} : vector<13x7xf32>, vector<7x256xf32>, vector<13x256xf32> -> vector<13x256xf32>
    %324 = arith.addf %323, %279 : vector<13x256xf32>
    %cst_166 = arith.constant 0.000000e+00 : f32
    %325 = vector.broadcast %cst_166 : f32 to vector<13x256xf32>
    %326 = arith.cmpf oge, %324, %325 : vector<13x256xf32>
    %cst_167 = arith.constant 2.000000e-01 : f32
    %327 = vector.broadcast %cst_167 : f32 to vector<13x256xf32>
    %328 = arith.mulf %327, %324 : vector<13x256xf32>
    %329 = arith.select %326, %324, %328 : vector<13x256xi1>, vector<13x256xf32>
    %330 = arith.addf %320, %329 : vector<13x256xf32>
    %c5_168 = arith.constant 5 : index
    %c0_169 = arith.constant 0 : index
    %c0_170 = arith.constant 0 : index
    %331 = vector.load %arg6[%c5_168, %c0_169, %c0_170] : memref<16x7x256xf32, #tpu.memory_space<vmem>>, vector<1x7x256xf32>
    %332 = vector.shape_cast %331 : vector<1x7x256xf32> to vector<7x256xf32>
    %cst_171 = arith.constant dense<0.000000e+00> : vector<13x256xf32>
    %333 = tpu.matmul %268, %332, %cst_171 {dimension_numbers = #tpu.dot_dimension_numbers<[1], [0], [0], [1], [0, 0, 1, 1], [], []>} : vector<13x7xf32>, vector<7x256xf32>, vector<13x256xf32> -> vector<13x256xf32>
    %334 = arith.addf %333, %279 : vector<13x256xf32>
    %cst_172 = arith.constant 0.000000e+00 : f32
    %335 = vector.broadcast %cst_172 : f32 to vector<13x256xf32>
    %336 = arith.cmpf oge, %334, %335 : vector<13x256xf32>
    %cst_173 = arith.constant 2.000000e-01 : f32
    %337 = vector.broadcast %cst_173 : f32 to vector<13x256xf32>
    %338 = arith.mulf %337, %334 : vector<13x256xf32>
    %339 = arith.select %336, %334, %338 : vector<13x256xi1>, vector<13x256xf32>
    %340 = arith.addf %330, %339 : vector<13x256xf32>
    %c6_174 = arith.constant 6 : index
    %c0_175 = arith.constant 0 : index
    %c0_176 = arith.constant 0 : index
    %341 = vector.load %arg6[%c6_174, %c0_175, %c0_176] : memref<16x7x256xf32, #tpu.memory_space<vmem>>, vector<1x7x256xf32>
    %342 = vector.shape_cast %341 : vector<1x7x256xf32> to vector<7x256xf32>
    %cst_177 = arith.constant dense<0.000000e+00> : vector<13x256xf32>
    %343 = tpu.matmul %268, %342, %cst_177 {dimension_numbers = #tpu.dot_dimension_numbers<[1], [0], [0], [1], [0, 0, 1, 1], [], []>} : vector<13x7xf32>, vector<7x256xf32>, vector<13x256xf32> -> vector<13x256xf32>
    %344 = arith.addf %343, %279 : vector<13x256xf32>
    %cst_178 = arith.constant 0.000000e+00 : f32
    %345 = vector.broadcast %cst_178 : f32 to vector<13x256xf32>
    %346 = arith.cmpf oge, %344, %345 : vector<13x256xf32>
    %cst_179 = arith.constant 2.000000e-01 : f32
    %347 = vector.broadcast %cst_179 : f32 to vector<13x256xf32>
    %348 = arith.mulf %347, %344 : vector<13x256xf32>
    %349 = arith.select %346, %344, %348 : vector<13x256xi1>, vector<13x256xf32>
    %350 = arith.addf %340, %349 : vector<13x256xf32>
    %c7_180 = arith.constant 7 : index
    %c0_181 = arith.constant 0 : index
    %c0_182 = arith.constant 0 : index
    %351 = vector.load %arg6[%c7_180, %c0_181, %c0_182] : memref<16x7x256xf32, #tpu.memory_space<vmem>>, vector<1x7x256xf32>
    %352 = vector.shape_cast %351 : vector<1x7x256xf32> to vector<7x256xf32>
    %cst_183 = arith.constant dense<0.000000e+00> : vector<13x256xf32>
    %353 = tpu.matmul %268, %352, %cst_183 {dimension_numbers = #tpu.dot_dimension_numbers<[1], [0], [0], [1], [0, 0, 1, 1], [], []>} : vector<13x7xf32>, vector<7x256xf32>, vector<13x256xf32> -> vector<13x256xf32>
    %354 = arith.addf %353, %279 : vector<13x256xf32>
    %cst_184 = arith.constant 0.000000e+00 : f32
    %355 = vector.broadcast %cst_184 : f32 to vector<13x256xf32>
    %356 = arith.cmpf oge, %354, %355 : vector<13x256xf32>
    %cst_185 = arith.constant 2.000000e-01 : f32
    %357 = vector.broadcast %cst_185 : f32 to vector<13x256xf32>
    %358 = arith.mulf %357, %354 : vector<13x256xf32>
    %359 = arith.select %356, %354, %358 : vector<13x256xi1>, vector<13x256xf32>
    %360 = arith.addf %350, %359 : vector<13x256xf32>
    %c8_186 = arith.constant 8 : index
    %c0_187 = arith.constant 0 : index
    %c0_188 = arith.constant 0 : index
    %361 = vector.load %arg6[%c8_186, %c0_187, %c0_188] : memref<16x7x256xf32, #tpu.memory_space<vmem>>, vector<1x7x256xf32>
    %362 = vector.shape_cast %361 : vector<1x7x256xf32> to vector<7x256xf32>
    %cst_189 = arith.constant dense<0.000000e+00> : vector<13x256xf32>
    %363 = tpu.matmul %268, %362, %cst_189 {dimension_numbers = #tpu.dot_dimension_numbers<[1], [0], [0], [1], [0, 0, 1, 1], [], []>} : vector<13x7xf32>, vector<7x256xf32>, vector<13x256xf32> -> vector<13x256xf32>
    %364 = arith.addf %363, %279 : vector<13x256xf32>
    %cst_190 = arith.constant 0.000000e+00 : f32
    %365 = vector.broadcast %cst_190 : f32 to vector<13x256xf32>
    %366 = arith.cmpf oge, %364, %365 : vector<13x256xf32>
    %cst_191 = arith.constant 2.000000e-01 : f32
    %367 = vector.broadcast %cst_191 : f32 to vector<13x256xf32>
    %368 = arith.mulf %367, %364 : vector<13x256xf32>
    %369 = arith.select %366, %364, %368 : vector<13x256xi1>, vector<13x256xf32>
    %370 = arith.addf %360, %369 : vector<13x256xf32>
    %c9_192 = arith.constant 9 : index
    %c0_193 = arith.constant 0 : index
    %c0_194 = arith.constant 0 : index
    %371 = vector.load %arg6[%c9_192, %c0_193, %c0_194] : memref<16x7x256xf32, #tpu.memory_space<vmem>>, vector<1x7x256xf32>
    %372 = vector.shape_cast %371 : vector<1x7x256xf32> to vector<7x256xf32>
    %cst_195 = arith.constant dense<0.000000e+00> : vector<13x256xf32>
    %373 = tpu.matmul %268, %372, %cst_195 {dimension_numbers = #tpu.dot_dimension_numbers<[1], [0], [0], [1], [0, 0, 1, 1], [], []>} : vector<13x7xf32>, vector<7x256xf32>, vector<13x256xf32> -> vector<13x256xf32>
    %374 = arith.addf %373, %279 : vector<13x256xf32>
    %cst_196 = arith.constant 0.000000e+00 : f32
    %375 = vector.broadcast %cst_196 : f32 to vector<13x256xf32>
    %376 = arith.cmpf oge, %374, %375 : vector<13x256xf32>
    %cst_197 = arith.constant 2.000000e-01 : f32
    %377 = vector.broadcast %cst_197 : f32 to vector<13x256xf32>
    %378 = arith.mulf %377, %374 : vector<13x256xf32>
    %379 = arith.select %376, %374, %378 : vector<13x256xi1>, vector<13x256xf32>
    %380 = arith.addf %370, %379 : vector<13x256xf32>
    %c10_198 = arith.constant 10 : index
    %c0_199 = arith.constant 0 : index
    %c0_200 = arith.constant 0 : index
    %381 = vector.load %arg6[%c10_198, %c0_199, %c0_200] : memref<16x7x256xf32, #tpu.memory_space<vmem>>, vector<1x7x256xf32>
    %382 = vector.shape_cast %381 : vector<1x7x256xf32> to vector<7x256xf32>
    %cst_201 = arith.constant dense<0.000000e+00> : vector<13x256xf32>
    %383 = tpu.matmul %268, %382, %cst_201 {dimension_numbers = #tpu.dot_dimension_numbers<[1], [0], [0], [1], [0, 0, 1, 1], [], []>} : vector<13x7xf32>, vector<7x256xf32>, vector<13x256xf32> -> vector<13x256xf32>
    %384 = arith.addf %383, %279 : vector<13x256xf32>
    %cst_202 = arith.constant 0.000000e+00 : f32
    %385 = vector.broadcast %cst_202 : f32 to vector<13x256xf32>
    %386 = arith.cmpf oge, %384, %385 : vector<13x256xf32>
    %cst_203 = arith.constant 2.000000e-01 : f32
    %387 = vector.broadcast %cst_203 : f32 to vector<13x256xf32>
    %388 = arith.mulf %387, %384 : vector<13x256xf32>
    %389 = arith.select %386, %384, %388 : vector<13x256xi1>, vector<13x256xf32>
    %390 = arith.addf %380, %389 : vector<13x256xf32>
    %c11_204 = arith.constant 11 : index
    %c0_205 = arith.constant 0 : index
    %c0_206 = arith.constant 0 : index
    %391 = vector.load %arg6[%c11_204, %c0_205, %c0_206] : memref<16x7x256xf32, #tpu.memory_space<vmem>>, vector<1x7x256xf32>
    %392 = vector.shape_cast %391 : vector<1x7x256xf32> to vector<7x256xf32>
    %cst_207 = arith.constant dense<0.000000e+00> : vector<13x256xf32>
    %393 = tpu.matmul %268, %392, %cst_207 {dimension_numbers = #tpu.dot_dimension_numbers<[1], [0], [0], [1], [0, 0, 1, 1], [], []>} : vector<13x7xf32>, vector<7x256xf32>, vector<13x256xf32> -> vector<13x256xf32>
    %394 = arith.addf %393, %279 : vector<13x256xf32>
    %cst_208 = arith.constant 0.000000e+00 : f32
    %395 = vector.broadcast %cst_208 : f32 to vector<13x256xf32>
    %396 = arith.cmpf oge, %394, %395 : vector<13x256xf32>
    %cst_209 = arith.constant 2.000000e-01 : f32
    %397 = vector.broadcast %cst_209 : f32 to vector<13x256xf32>
    %398 = arith.mulf %397, %394 : vector<13x256xf32>
    %399 = arith.select %396, %394, %398 : vector<13x256xi1>, vector<13x256xf32>
    %400 = arith.addf %390, %399 : vector<13x256xf32>
    %c12_210 = arith.constant 12 : index
    %c0_211 = arith.constant 0 : index
    %c0_212 = arith.constant 0 : index
    %401 = vector.load %arg6[%c12_210, %c0_211, %c0_212] : memref<16x7x256xf32, #tpu.memory_space<vmem>>, vector<1x7x256xf32>
    %402 = vector.shape_cast %401 : vector<1x7x256xf32> to vector<7x256xf32>
    %cst_213 = arith.constant dense<0.000000e+00> : vector<13x256xf32>
    %403 = tpu.matmul %268, %402, %cst_213 {dimension_numbers = #tpu.dot_dimension_numbers<[1], [0], [0], [1], [0, 0, 1, 1], [], []>} : vector<13x7xf32>, vector<7x256xf32>, vector<13x256xf32> -> vector<13x256xf32>
    %404 = arith.addf %403, %279 : vector<13x256xf32>
    %cst_214 = arith.constant 0.000000e+00 : f32
    %405 = vector.broadcast %cst_214 : f32 to vector<13x256xf32>
    %406 = arith.cmpf oge, %404, %405 : vector<13x256xf32>
    %cst_215 = arith.constant 2.000000e-01 : f32
    %407 = vector.broadcast %cst_215 : f32 to vector<13x256xf32>
    %408 = arith.mulf %407, %404 : vector<13x256xf32>
    %409 = arith.select %406, %404, %408 : vector<13x256xi1>, vector<13x256xf32>
    %410 = arith.addf %400, %409 : vector<13x256xf32>
    %c13_216 = arith.constant 13 : index
    %c0_217 = arith.constant 0 : index
    %c0_218 = arith.constant 0 : index
    %411 = vector.load %arg6[%c13_216, %c0_217, %c0_218] : memref<16x7x256xf32, #tpu.memory_space<vmem>>, vector<1x7x256xf32>
    %412 = vector.shape_cast %411 : vector<1x7x256xf32> to vector<7x256xf32>
    %cst_219 = arith.constant dense<0.000000e+00> : vector<13x256xf32>
    %413 = tpu.matmul %268, %412, %cst_219 {dimension_numbers = #tpu.dot_dimension_numbers<[1], [0], [0], [1], [0, 0, 1, 1], [], []>} : vector<13x7xf32>, vector<7x256xf32>, vector<13x256xf32> -> vector<13x256xf32>
    %414 = arith.addf %413, %279 : vector<13x256xf32>
    %cst_220 = arith.constant 0.000000e+00 : f32
    %415 = vector.broadcast %cst_220 : f32 to vector<13x256xf32>
    %416 = arith.cmpf oge, %414, %415 : vector<13x256xf32>
    %cst_221 = arith.constant 2.000000e-01 : f32
    %417 = vector.broadcast %cst_221 : f32 to vector<13x256xf32>
    %418 = arith.mulf %417, %414 : vector<13x256xf32>
    %419 = arith.select %416, %414, %418 : vector<13x256xi1>, vector<13x256xf32>
    %420 = arith.addf %410, %419 : vector<13x256xf32>
    %c14_222 = arith.constant 14 : index
    %c0_223 = arith.constant 0 : index
    %c0_224 = arith.constant 0 : index
    %421 = vector.load %arg6[%c14_222, %c0_223, %c0_224] : memref<16x7x256xf32, #tpu.memory_space<vmem>>, vector<1x7x256xf32>
    %422 = vector.shape_cast %421 : vector<1x7x256xf32> to vector<7x256xf32>
    %cst_225 = arith.constant dense<0.000000e+00> : vector<13x256xf32>
    %423 = tpu.matmul %268, %422, %cst_225 {dimension_numbers = #tpu.dot_dimension_numbers<[1], [0], [0], [1], [0, 0, 1, 1], [], []>} : vector<13x7xf32>, vector<7x256xf32>, vector<13x256xf32> -> vector<13x256xf32>
    %424 = arith.addf %423, %279 : vector<13x256xf32>
    %cst_226 = arith.constant 0.000000e+00 : f32
    %425 = vector.broadcast %cst_226 : f32 to vector<13x256xf32>
    %426 = arith.cmpf oge, %424, %425 : vector<13x256xf32>
    %cst_227 = arith.constant 2.000000e-01 : f32
    %427 = vector.broadcast %cst_227 : f32 to vector<13x256xf32>
    %428 = arith.mulf %427, %424 : vector<13x256xf32>
    %429 = arith.select %426, %424, %428 : vector<13x256xi1>, vector<13x256xf32>
    %430 = arith.addf %420, %429 : vector<13x256xf32>
    %c15_228 = arith.constant 15 : index
    %c0_229 = arith.constant 0 : index
    %c0_230 = arith.constant 0 : index
    %431 = vector.load %arg6[%c15_228, %c0_229, %c0_230] : memref<16x7x256xf32, #tpu.memory_space<vmem>>, vector<1x7x256xf32>
    %432 = vector.shape_cast %431 : vector<1x7x256xf32> to vector<7x256xf32>
    %cst_231 = arith.constant dense<0.000000e+00> : vector<13x256xf32>
    %433 = tpu.matmul %268, %432, %cst_231 {dimension_numbers = #tpu.dot_dimension_numbers<[1], [0], [0], [1], [0, 0, 1, 1], [], []>} : vector<13x7xf32>, vector<7x256xf32>, vector<13x256xf32> -> vector<13x256xf32>
    %434 = arith.addf %433, %279 : vector<13x256xf32>
    %cst_232 = arith.constant 0.000000e+00 : f32
    %435 = vector.broadcast %cst_232 : f32 to vector<13x256xf32>
    %436 = arith.cmpf oge, %434, %435 : vector<13x256xf32>
    %cst_233 = arith.constant 2.000000e-01 : f32
    %437 = vector.broadcast %cst_233 : f32 to vector<13x256xf32>
    %438 = arith.mulf %437, %434 : vector<13x256xf32>
    %439 = arith.select %436, %434, %438 : vector<13x256xi1>, vector<13x256xf32>
    %440 = arith.addf %430, %439 : vector<13x256xf32>
    %cst_234 = arith.constant dense<0.000000e+00> : vector<6x256xf32>
    %441 = tpu.matmul %273, %440, %cst_234 {dimension_numbers = #tpu.dot_dimension_numbers<[1], [0], [0], [1], [0, 0, 1, 1], [], []>} : vector<6x13xf32>, vector<13x256xf32>, vector<6x256xf32> -> vector<6x256xf32>
    %442 = vector.broadcast %274 : vector<6x1xf32> to vector<6x256xf32>
    %443 = arith.addf %441, %442 : vector<6x256xf32>
    %cst_235 = arith.constant dense<0.000000e+00> : vector<256xf32>
    %444 = vector.multi_reduction <add>, %443, %cst_235 [0] : vector<6x256xf32> to vector<256xf32>
    %445 = vector.shape_cast %444 : vector<256xf32> to vector<1x256xf32>
    %cst_236 = arith.constant 0.000000e+00 : f32
    %446 = vector.shape_cast %265 : vector<6x1xi1> to vector<6x1xi1>
    %447 = vector.broadcast %446 : vector<6x1xi1> to vector<6x256xi1>
    %448 = vector.broadcast %cst_236 : f32 to vector<6x256xf32>
    %449 = arith.select %447, %443, %448 : vector<6x256xi1>, vector<6x256xf32>
    %cst_237 = arith.constant dense<0.000000e+00> : vector<256xf32>
    %450 = vector.multi_reduction <add>, %449, %cst_237 [0] : vector<6x256xf32> to vector<256xf32>
    %451 = vector.shape_cast %450 : vector<256xf32> to vector<1x256xf32>
    %452 = arith.subf %445, %451 : vector<1x256xf32>
    %453 = vector.shape_cast %265 : vector<6x1xi1> to vector<6x1xi1>
    %454 = vector.broadcast %453 : vector<6x1xi1> to vector<6x256xi1>
    %455 = vector.shape_cast %451 : vector<1x256xf32> to vector<1x256xf32>
    %456 = vector.broadcast %455 : vector<1x256xf32> to vector<6x256xf32>
    %457 = vector.shape_cast %452 : vector<1x256xf32> to vector<1x256xf32>
    %458 = vector.broadcast %457 : vector<1x256xf32> to vector<6x256xf32>
    %459 = arith.select %454, %456, %458 : vector<6x256xi1>, vector<6x256xf32>
    %cst_238 = arith.constant 0.333333343 : f32
    %460 = vector.broadcast %cst_238 : f32 to vector<6x256xf32>
    %461 = arith.mulf %459, %460 : vector<6x256xf32>
    %462 = arith.subf %443, %461 : vector<6x256xf32>
    %463 = arith.mulf %462, %462 : vector<6x256xf32>
    %cst_239 = arith.constant dense<0.000000e+00> : vector<256xf32>
    %464 = vector.multi_reduction <add>, %463, %cst_239 [0] : vector<6x256xf32> to vector<256xf32>
    %465 = vector.shape_cast %464 : vector<256xf32> to vector<1x256xf32>
    %cst_240 = arith.constant 0.000000e+00 : f32
    %466 = vector.shape_cast %265 : vector<6x1xi1> to vector<6x1xi1>
    %467 = vector.broadcast %466 : vector<6x1xi1> to vector<6x256xi1>
    %468 = vector.broadcast %cst_240 : f32 to vector<6x256xf32>
    %469 = arith.select %467, %463, %468 : vector<6x256xi1>, vector<6x256xf32>
    %cst_241 = arith.constant dense<0.000000e+00> : vector<256xf32>
    %470 = vector.multi_reduction <add>, %469, %cst_241 [0] : vector<6x256xf32> to vector<256xf32>
    %471 = vector.shape_cast %470 : vector<256xf32> to vector<1x256xf32>
    %472 = arith.subf %465, %471 : vector<1x256xf32>
    %473 = vector.shape_cast %265 : vector<6x1xi1> to vector<6x1xi1>
    %474 = vector.broadcast %473 : vector<6x1xi1> to vector<6x256xi1>
    %475 = vector.shape_cast %471 : vector<1x256xf32> to vector<1x256xf32>
    %476 = vector.broadcast %475 : vector<1x256xf32> to vector<6x256xf32>
    %477 = vector.shape_cast %472 : vector<1x256xf32> to vector<1x256xf32>
    %478 = vector.broadcast %477 : vector<1x256xf32> to vector<6x256xf32>
    %479 = arith.select %474, %476, %478 : vector<6x256xi1>, vector<6x256xf32>
    %cst_242 = arith.constant 0.333333343 : f32
    %480 = vector.broadcast %cst_242 : f32 to vector<6x256xf32>
    %481 = arith.mulf %479, %480 : vector<6x256xf32>
    %cst_243 = arith.constant 9.99999974E-6 : f32
    %482 = vector.broadcast %cst_243 : f32 to vector<6x256xf32>
    %483 = arith.addf %481, %482 : vector<6x256xf32>
    %484 = math.rsqrt %483 : vector<6x256xf32>
    %485 = arith.mulf %462, %484 : vector<6x256xf32>
    %486 = vector.broadcast %275 : vector<6x1xf32> to vector<6x256xf32>
    %487 = arith.mulf %485, %486 : vector<6x256xf32>
    %488 = vector.broadcast %276 : vector<6x1xf32> to vector<6x256xf32>
    %489 = arith.addf %487, %488 : vector<6x256xf32>
    %cst_244 = arith.constant 0.000000e+00 : f32
    %490 = vector.broadcast %cst_244 : f32 to vector<6x256xf32>
    %491 = arith.cmpf oge, %489, %490 : vector<6x256xf32>
    %cst_245 = arith.constant 2.000000e-01 : f32
    %492 = vector.broadcast %cst_245 : f32 to vector<6x256xf32>
    %493 = arith.mulf %492, %489 : vector<6x256xf32>
    %494 = arith.select %491, %489, %493 : vector<6x256xi1>, vector<6x256xf32>
    %495 = arith.addf %262, %494 : vector<6x256xf32>
    %c1_246 = arith.constant 1 : index
    %c0_247 = arith.constant 0 : index
    %c0_248 = arith.constant 0 : index
    %496 = vector.load %arg3[%c1_246, %c0_247, %c0_248] : memref<3x13x14xf32, #tpu.memory_space<vmem>>, vector<1x13x14xf32>
    %497 = vector.shape_cast %496 : vector<1x13x14xf32> to vector<13x14xf32>
    %498 = vector.extract_strided_slice %497 {offsets = [0, 0], sizes = [13, 7], strides = [1, 1]} : vector<13x14xf32> to vector<13x7xf32>
    %499 = vector.extract_strided_slice %497 {offsets = [0, 7], sizes = [13, 6], strides = [1, 1]} : vector<13x14xf32> to vector<13x6xf32>
    %500 = vector.extract_strided_slice %497 {offsets = [0, 13], sizes = [13, 1], strides = [1, 1]} : vector<13x14xf32> to vector<13x1xf32>
    %c1_249 = arith.constant 1 : index
    %c0_250 = arith.constant 0 : index
    %c0_251 = arith.constant 0 : index
    %501 = vector.load %arg4[%c1_249, %c0_250, %c0_251] : memref<3x6x16xf32, #tpu.memory_space<vmem>>, vector<1x6x16xf32>
    %502 = vector.shape_cast %501 : vector<1x6x16xf32> to vector<6x16xf32>
    %503 = vector.extract_strided_slice %502 {offsets = [0, 0], sizes = [6, 13], strides = [1, 1]} : vector<6x16xf32> to vector<6x13xf32>
    %504 = vector.extract_strided_slice %502 {offsets = [0, 13], sizes = [6, 1], strides = [1, 1]} : vector<6x16xf32> to vector<6x1xf32>
    %505 = vector.extract_strided_slice %502 {offsets = [0, 14], sizes = [6, 1], strides = [1, 1]} : vector<6x16xf32> to vector<6x1xf32>
    %506 = vector.extract_strided_slice %502 {offsets = [0, 15], sizes = [6, 1], strides = [1, 1]} : vector<6x16xf32> to vector<6x1xf32>
    %cst_252 = arith.constant dense<0.000000e+00> : vector<13x256xf32>
    %507 = tpu.matmul %499, %495, %cst_252 {dimension_numbers = #tpu.dot_dimension_numbers<[1], [0], [0], [1], [0, 0, 1, 1], [], []>} : vector<13x6xf32>, vector<6x256xf32>, vector<13x256xf32> -> vector<13x256xf32>
    %508 = vector.broadcast %500 : vector<13x1xf32> to vector<13x256xf32>
    %509 = arith.addf %507, %508 : vector<13x256xf32>
    %cst_253 = arith.constant 0.000000e+00 : f32
    %510 = vector.broadcast %cst_253 : f32 to vector<13x256xf32>
    %c0_254 = arith.constant 0 : index
    %c0_255 = arith.constant 0 : index
    %c0_256 = arith.constant 0 : index
    %511 = vector.load %arg6[%c0_254, %c0_255, %c0_256] : memref<16x7x256xf32, #tpu.memory_space<vmem>>, vector<1x7x256xf32>
    %512 = vector.shape_cast %511 : vector<1x7x256xf32> to vector<7x256xf32>
    %cst_257 = arith.constant dense<0.000000e+00> : vector<13x256xf32>
    %513 = tpu.matmul %498, %512, %cst_257 {dimension_numbers = #tpu.dot_dimension_numbers<[1], [0], [0], [1], [0, 0, 1, 1], [], []>} : vector<13x7xf32>, vector<7x256xf32>, vector<13x256xf32> -> vector<13x256xf32>
    %514 = arith.addf %513, %509 : vector<13x256xf32>
    %cst_258 = arith.constant 0.000000e+00 : f32
    %515 = vector.broadcast %cst_258 : f32 to vector<13x256xf32>
    %516 = arith.cmpf oge, %514, %515 : vector<13x256xf32>
    %cst_259 = arith.constant 2.000000e-01 : f32
    %517 = vector.broadcast %cst_259 : f32 to vector<13x256xf32>
    %518 = arith.mulf %517, %514 : vector<13x256xf32>
    %519 = arith.select %516, %514, %518 : vector<13x256xi1>, vector<13x256xf32>
    %520 = arith.addf %510, %519 : vector<13x256xf32>
    %c1_260 = arith.constant 1 : index
    %c0_261 = arith.constant 0 : index
    %c0_262 = arith.constant 0 : index
    %521 = vector.load %arg6[%c1_260, %c0_261, %c0_262] : memref<16x7x256xf32, #tpu.memory_space<vmem>>, vector<1x7x256xf32>
    %522 = vector.shape_cast %521 : vector<1x7x256xf32> to vector<7x256xf32>
    %cst_263 = arith.constant dense<0.000000e+00> : vector<13x256xf32>
    %523 = tpu.matmul %498, %522, %cst_263 {dimension_numbers = #tpu.dot_dimension_numbers<[1], [0], [0], [1], [0, 0, 1, 1], [], []>} : vector<13x7xf32>, vector<7x256xf32>, vector<13x256xf32> -> vector<13x256xf32>
    %524 = arith.addf %523, %509 : vector<13x256xf32>
    %cst_264 = arith.constant 0.000000e+00 : f32
    %525 = vector.broadcast %cst_264 : f32 to vector<13x256xf32>
    %526 = arith.cmpf oge, %524, %525 : vector<13x256xf32>
    %cst_265 = arith.constant 2.000000e-01 : f32
    %527 = vector.broadcast %cst_265 : f32 to vector<13x256xf32>
    %528 = arith.mulf %527, %524 : vector<13x256xf32>
    %529 = arith.select %526, %524, %528 : vector<13x256xi1>, vector<13x256xf32>
    %530 = arith.addf %520, %529 : vector<13x256xf32>
    %c2_266 = arith.constant 2 : index
    %c0_267 = arith.constant 0 : index
    %c0_268 = arith.constant 0 : index
    %531 = vector.load %arg6[%c2_266, %c0_267, %c0_268] : memref<16x7x256xf32, #tpu.memory_space<vmem>>, vector<1x7x256xf32>
    %532 = vector.shape_cast %531 : vector<1x7x256xf32> to vector<7x256xf32>
    %cst_269 = arith.constant dense<0.000000e+00> : vector<13x256xf32>
    %533 = tpu.matmul %498, %532, %cst_269 {dimension_numbers = #tpu.dot_dimension_numbers<[1], [0], [0], [1], [0, 0, 1, 1], [], []>} : vector<13x7xf32>, vector<7x256xf32>, vector<13x256xf32> -> vector<13x256xf32>
    %534 = arith.addf %533, %509 : vector<13x256xf32>
    %cst_270 = arith.constant 0.000000e+00 : f32
    %535 = vector.broadcast %cst_270 : f32 to vector<13x256xf32>
    %536 = arith.cmpf oge, %534, %535 : vector<13x256xf32>
    %cst_271 = arith.constant 2.000000e-01 : f32
    %537 = vector.broadcast %cst_271 : f32 to vector<13x256xf32>
    %538 = arith.mulf %537, %534 : vector<13x256xf32>
    %539 = arith.select %536, %534, %538 : vector<13x256xi1>, vector<13x256xf32>
    %540 = arith.addf %530, %539 : vector<13x256xf32>
    %c3_272 = arith.constant 3 : index
    %c0_273 = arith.constant 0 : index
    %c0_274 = arith.constant 0 : index
    %541 = vector.load %arg6[%c3_272, %c0_273, %c0_274] : memref<16x7x256xf32, #tpu.memory_space<vmem>>, vector<1x7x256xf32>
    %542 = vector.shape_cast %541 : vector<1x7x256xf32> to vector<7x256xf32>
    %cst_275 = arith.constant dense<0.000000e+00> : vector<13x256xf32>
    %543 = tpu.matmul %498, %542, %cst_275 {dimension_numbers = #tpu.dot_dimension_numbers<[1], [0], [0], [1], [0, 0, 1, 1], [], []>} : vector<13x7xf32>, vector<7x256xf32>, vector<13x256xf32> -> vector<13x256xf32>
    %544 = arith.addf %543, %509 : vector<13x256xf32>
    %cst_276 = arith.constant 0.000000e+00 : f32
    %545 = vector.broadcast %cst_276 : f32 to vector<13x256xf32>
    %546 = arith.cmpf oge, %544, %545 : vector<13x256xf32>
    %cst_277 = arith.constant 2.000000e-01 : f32
    %547 = vector.broadcast %cst_277 : f32 to vector<13x256xf32>
    %548 = arith.mulf %547, %544 : vector<13x256xf32>
    %549 = arith.select %546, %544, %548 : vector<13x256xi1>, vector<13x256xf32>
    %550 = arith.addf %540, %549 : vector<13x256xf32>
    %c4_278 = arith.constant 4 : index
    %c0_279 = arith.constant 0 : index
    %c0_280 = arith.constant 0 : index
    %551 = vector.load %arg6[%c4_278, %c0_279, %c0_280] : memref<16x7x256xf32, #tpu.memory_space<vmem>>, vector<1x7x256xf32>
    %552 = vector.shape_cast %551 : vector<1x7x256xf32> to vector<7x256xf32>
    %cst_281 = arith.constant dense<0.000000e+00> : vector<13x256xf32>
    %553 = tpu.matmul %498, %552, %cst_281 {dimension_numbers = #tpu.dot_dimension_numbers<[1], [0], [0], [1], [0, 0, 1, 1], [], []>} : vector<13x7xf32>, vector<7x256xf32>, vector<13x256xf32> -> vector<13x256xf32>
    %554 = arith.addf %553, %509 : vector<13x256xf32>
    %cst_282 = arith.constant 0.000000e+00 : f32
    %555 = vector.broadcast %cst_282 : f32 to vector<13x256xf32>
    %556 = arith.cmpf oge, %554, %555 : vector<13x256xf32>
    %cst_283 = arith.constant 2.000000e-01 : f32
    %557 = vector.broadcast %cst_283 : f32 to vector<13x256xf32>
    %558 = arith.mulf %557, %554 : vector<13x256xf32>
    %559 = arith.select %556, %554, %558 : vector<13x256xi1>, vector<13x256xf32>
    %560 = arith.addf %550, %559 : vector<13x256xf32>
    %c5_284 = arith.constant 5 : index
    %c0_285 = arith.constant 0 : index
    %c0_286 = arith.constant 0 : index
    %561 = vector.load %arg6[%c5_284, %c0_285, %c0_286] : memref<16x7x256xf32, #tpu.memory_space<vmem>>, vector<1x7x256xf32>
    %562 = vector.shape_cast %561 : vector<1x7x256xf32> to vector<7x256xf32>
    %cst_287 = arith.constant dense<0.000000e+00> : vector<13x256xf32>
    %563 = tpu.matmul %498, %562, %cst_287 {dimension_numbers = #tpu.dot_dimension_numbers<[1], [0], [0], [1], [0, 0, 1, 1], [], []>} : vector<13x7xf32>, vector<7x256xf32>, vector<13x256xf32> -> vector<13x256xf32>
    %564 = arith.addf %563, %509 : vector<13x256xf32>
    %cst_288 = arith.constant 0.000000e+00 : f32
    %565 = vector.broadcast %cst_288 : f32 to vector<13x256xf32>
    %566 = arith.cmpf oge, %564, %565 : vector<13x256xf32>
    %cst_289 = arith.constant 2.000000e-01 : f32
    %567 = vector.broadcast %cst_289 : f32 to vector<13x256xf32>
    %568 = arith.mulf %567, %564 : vector<13x256xf32>
    %569 = arith.select %566, %564, %568 : vector<13x256xi1>, vector<13x256xf32>
    %570 = arith.addf %560, %569 : vector<13x256xf32>
    %c6_290 = arith.constant 6 : index
    %c0_291 = arith.constant 0 : index
    %c0_292 = arith.constant 0 : index
    %571 = vector.load %arg6[%c6_290, %c0_291, %c0_292] : memref<16x7x256xf32, #tpu.memory_space<vmem>>, vector<1x7x256xf32>
    %572 = vector.shape_cast %571 : vector<1x7x256xf32> to vector<7x256xf32>
    %cst_293 = arith.constant dense<0.000000e+00> : vector<13x256xf32>
    %573 = tpu.matmul %498, %572, %cst_293 {dimension_numbers = #tpu.dot_dimension_numbers<[1], [0], [0], [1], [0, 0, 1, 1], [], []>} : vector<13x7xf32>, vector<7x256xf32>, vector<13x256xf32> -> vector<13x256xf32>
    %574 = arith.addf %573, %509 : vector<13x256xf32>
    %cst_294 = arith.constant 0.000000e+00 : f32
    %575 = vector.broadcast %cst_294 : f32 to vector<13x256xf32>
    %576 = arith.cmpf oge, %574, %575 : vector<13x256xf32>
    %cst_295 = arith.constant 2.000000e-01 : f32
    %577 = vector.broadcast %cst_295 : f32 to vector<13x256xf32>
    %578 = arith.mulf %577, %574 : vector<13x256xf32>
    %579 = arith.select %576, %574, %578 : vector<13x256xi1>, vector<13x256xf32>
    %580 = arith.addf %570, %579 : vector<13x256xf32>
    %c7_296 = arith.constant 7 : index
    %c0_297 = arith.constant 0 : index
    %c0_298 = arith.constant 0 : index
    %581 = vector.load %arg6[%c7_296, %c0_297, %c0_298] : memref<16x7x256xf32, #tpu.memory_space<vmem>>, vector<1x7x256xf32>
    %582 = vector.shape_cast %581 : vector<1x7x256xf32> to vector<7x256xf32>
    %cst_299 = arith.constant dense<0.000000e+00> : vector<13x256xf32>
    %583 = tpu.matmul %498, %582, %cst_299 {dimension_numbers = #tpu.dot_dimension_numbers<[1], [0], [0], [1], [0, 0, 1, 1], [], []>} : vector<13x7xf32>, vector<7x256xf32>, vector<13x256xf32> -> vector<13x256xf32>
    %584 = arith.addf %583, %509 : vector<13x256xf32>
    %cst_300 = arith.constant 0.000000e+00 : f32
    %585 = vector.broadcast %cst_300 : f32 to vector<13x256xf32>
    %586 = arith.cmpf oge, %584, %585 : vector<13x256xf32>
    %cst_301 = arith.constant 2.000000e-01 : f32
    %587 = vector.broadcast %cst_301 : f32 to vector<13x256xf32>
    %588 = arith.mulf %587, %584 : vector<13x256xf32>
    %589 = arith.select %586, %584, %588 : vector<13x256xi1>, vector<13x256xf32>
    %590 = arith.addf %580, %589 : vector<13x256xf32>
    %c8_302 = arith.constant 8 : index
    %c0_303 = arith.constant 0 : index
    %c0_304 = arith.constant 0 : index
    %591 = vector.load %arg6[%c8_302, %c0_303, %c0_304] : memref<16x7x256xf32, #tpu.memory_space<vmem>>, vector<1x7x256xf32>
    %592 = vector.shape_cast %591 : vector<1x7x256xf32> to vector<7x256xf32>
    %cst_305 = arith.constant dense<0.000000e+00> : vector<13x256xf32>
    %593 = tpu.matmul %498, %592, %cst_305 {dimension_numbers = #tpu.dot_dimension_numbers<[1], [0], [0], [1], [0, 0, 1, 1], [], []>} : vector<13x7xf32>, vector<7x256xf32>, vector<13x256xf32> -> vector<13x256xf32>
    %594 = arith.addf %593, %509 : vector<13x256xf32>
    %cst_306 = arith.constant 0.000000e+00 : f32
    %595 = vector.broadcast %cst_306 : f32 to vector<13x256xf32>
    %596 = arith.cmpf oge, %594, %595 : vector<13x256xf32>
    %cst_307 = arith.constant 2.000000e-01 : f32
    %597 = vector.broadcast %cst_307 : f32 to vector<13x256xf32>
    %598 = arith.mulf %597, %594 : vector<13x256xf32>
    %599 = arith.select %596, %594, %598 : vector<13x256xi1>, vector<13x256xf32>
    %600 = arith.addf %590, %599 : vector<13x256xf32>
    %c9_308 = arith.constant 9 : index
    %c0_309 = arith.constant 0 : index
    %c0_310 = arith.constant 0 : index
    %601 = vector.load %arg6[%c9_308, %c0_309, %c0_310] : memref<16x7x256xf32, #tpu.memory_space<vmem>>, vector<1x7x256xf32>
    %602 = vector.shape_cast %601 : vector<1x7x256xf32> to vector<7x256xf32>
    %cst_311 = arith.constant dense<0.000000e+00> : vector<13x256xf32>
    %603 = tpu.matmul %498, %602, %cst_311 {dimension_numbers = #tpu.dot_dimension_numbers<[1], [0], [0], [1], [0, 0, 1, 1], [], []>} : vector<13x7xf32>, vector<7x256xf32>, vector<13x256xf32> -> vector<13x256xf32>
    %604 = arith.addf %603, %509 : vector<13x256xf32>
    %cst_312 = arith.constant 0.000000e+00 : f32
    %605 = vector.broadcast %cst_312 : f32 to vector<13x256xf32>
    %606 = arith.cmpf oge, %604, %605 : vector<13x256xf32>
    %cst_313 = arith.constant 2.000000e-01 : f32
    %607 = vector.broadcast %cst_313 : f32 to vector<13x256xf32>
    %608 = arith.mulf %607, %604 : vector<13x256xf32>
    %609 = arith.select %606, %604, %608 : vector<13x256xi1>, vector<13x256xf32>
    %610 = arith.addf %600, %609 : vector<13x256xf32>
    %c10_314 = arith.constant 10 : index
    %c0_315 = arith.constant 0 : index
    %c0_316 = arith.constant 0 : index
    %611 = vector.load %arg6[%c10_314, %c0_315, %c0_316] : memref<16x7x256xf32, #tpu.memory_space<vmem>>, vector<1x7x256xf32>
    %612 = vector.shape_cast %611 : vector<1x7x256xf32> to vector<7x256xf32>
    %cst_317 = arith.constant dense<0.000000e+00> : vector<13x256xf32>
    %613 = tpu.matmul %498, %612, %cst_317 {dimension_numbers = #tpu.dot_dimension_numbers<[1], [0], [0], [1], [0, 0, 1, 1], [], []>} : vector<13x7xf32>, vector<7x256xf32>, vector<13x256xf32> -> vector<13x256xf32>
    %614 = arith.addf %613, %509 : vector<13x256xf32>
    %cst_318 = arith.constant 0.000000e+00 : f32
    %615 = vector.broadcast %cst_318 : f32 to vector<13x256xf32>
    %616 = arith.cmpf oge, %614, %615 : vector<13x256xf32>
    %cst_319 = arith.constant 2.000000e-01 : f32
    %617 = vector.broadcast %cst_319 : f32 to vector<13x256xf32>
    %618 = arith.mulf %617, %614 : vector<13x256xf32>
    %619 = arith.select %616, %614, %618 : vector<13x256xi1>, vector<13x256xf32>
    %620 = arith.addf %610, %619 : vector<13x256xf32>
    %c11_320 = arith.constant 11 : index
    %c0_321 = arith.constant 0 : index
    %c0_322 = arith.constant 0 : index
    %621 = vector.load %arg6[%c11_320, %c0_321, %c0_322] : memref<16x7x256xf32, #tpu.memory_space<vmem>>, vector<1x7x256xf32>
    %622 = vector.shape_cast %621 : vector<1x7x256xf32> to vector<7x256xf32>
    %cst_323 = arith.constant dense<0.000000e+00> : vector<13x256xf32>
    %623 = tpu.matmul %498, %622, %cst_323 {dimension_numbers = #tpu.dot_dimension_numbers<[1], [0], [0], [1], [0, 0, 1, 1], [], []>} : vector<13x7xf32>, vector<7x256xf32>, vector<13x256xf32> -> vector<13x256xf32>
    %624 = arith.addf %623, %509 : vector<13x256xf32>
    %cst_324 = arith.constant 0.000000e+00 : f32
    %625 = vector.broadcast %cst_324 : f32 to vector<13x256xf32>
    %626 = arith.cmpf oge, %624, %625 : vector<13x256xf32>
    %cst_325 = arith.constant 2.000000e-01 : f32
    %627 = vector.broadcast %cst_325 : f32 to vector<13x256xf32>
    %628 = arith.mulf %627, %624 : vector<13x256xf32>
    %629 = arith.select %626, %624, %628 : vector<13x256xi1>, vector<13x256xf32>
    %630 = arith.addf %620, %629 : vector<13x256xf32>
    %c12_326 = arith.constant 12 : index
    %c0_327 = arith.constant 0 : index
    %c0_328 = arith.constant 0 : index
    %631 = vector.load %arg6[%c12_326, %c0_327, %c0_328] : memref<16x7x256xf32, #tpu.memory_space<vmem>>, vector<1x7x256xf32>
    %632 = vector.shape_cast %631 : vector<1x7x256xf32> to vector<7x256xf32>
    %cst_329 = arith.constant dense<0.000000e+00> : vector<13x256xf32>
    %633 = tpu.matmul %498, %632, %cst_329 {dimension_numbers = #tpu.dot_dimension_numbers<[1], [0], [0], [1], [0, 0, 1, 1], [], []>} : vector<13x7xf32>, vector<7x256xf32>, vector<13x256xf32> -> vector<13x256xf32>
    %634 = arith.addf %633, %509 : vector<13x256xf32>
    %cst_330 = arith.constant 0.000000e+00 : f32
    %635 = vector.broadcast %cst_330 : f32 to vector<13x256xf32>
    %636 = arith.cmpf oge, %634, %635 : vector<13x256xf32>
    %cst_331 = arith.constant 2.000000e-01 : f32
    %637 = vector.broadcast %cst_331 : f32 to vector<13x256xf32>
    %638 = arith.mulf %637, %634 : vector<13x256xf32>
    %639 = arith.select %636, %634, %638 : vector<13x256xi1>, vector<13x256xf32>
    %640 = arith.addf %630, %639 : vector<13x256xf32>
    %c13_332 = arith.constant 13 : index
    %c0_333 = arith.constant 0 : index
    %c0_334 = arith.constant 0 : index
    %641 = vector.load %arg6[%c13_332, %c0_333, %c0_334] : memref<16x7x256xf32, #tpu.memory_space<vmem>>, vector<1x7x256xf32>
    %642 = vector.shape_cast %641 : vector<1x7x256xf32> to vector<7x256xf32>
    %cst_335 = arith.constant dense<0.000000e+00> : vector<13x256xf32>
    %643 = tpu.matmul %498, %642, %cst_335 {dimension_numbers = #tpu.dot_dimension_numbers<[1], [0], [0], [1], [0, 0, 1, 1], [], []>} : vector<13x7xf32>, vector<7x256xf32>, vector<13x256xf32> -> vector<13x256xf32>
    %644 = arith.addf %643, %509 : vector<13x256xf32>
    %cst_336 = arith.constant 0.000000e+00 : f32
    %645 = vector.broadcast %cst_336 : f32 to vector<13x256xf32>
    %646 = arith.cmpf oge, %644, %645 : vector<13x256xf32>
    %cst_337 = arith.constant 2.000000e-01 : f32
    %647 = vector.broadcast %cst_337 : f32 to vector<13x256xf32>
    %648 = arith.mulf %647, %644 : vector<13x256xf32>
    %649 = arith.select %646, %644, %648 : vector<13x256xi1>, vector<13x256xf32>
    %650 = arith.addf %640, %649 : vector<13x256xf32>
    %c14_338 = arith.constant 14 : index
    %c0_339 = arith.constant 0 : index
    %c0_340 = arith.constant 0 : index
    %651 = vector.load %arg6[%c14_338, %c0_339, %c0_340] : memref<16x7x256xf32, #tpu.memory_space<vmem>>, vector<1x7x256xf32>
    %652 = vector.shape_cast %651 : vector<1x7x256xf32> to vector<7x256xf32>
    %cst_341 = arith.constant dense<0.000000e+00> : vector<13x256xf32>
    %653 = tpu.matmul %498, %652, %cst_341 {dimension_numbers = #tpu.dot_dimension_numbers<[1], [0], [0], [1], [0, 0, 1, 1], [], []>} : vector<13x7xf32>, vector<7x256xf32>, vector<13x256xf32> -> vector<13x256xf32>
    %654 = arith.addf %653, %509 : vector<13x256xf32>
    %cst_342 = arith.constant 0.000000e+00 : f32
    %655 = vector.broadcast %cst_342 : f32 to vector<13x256xf32>
    %656 = arith.cmpf oge, %654, %655 : vector<13x256xf32>
    %cst_343 = arith.constant 2.000000e-01 : f32
    %657 = vector.broadcast %cst_343 : f32 to vector<13x256xf32>
    %658 = arith.mulf %657, %654 : vector<13x256xf32>
    %659 = arith.select %656, %654, %658 : vector<13x256xi1>, vector<13x256xf32>
    %660 = arith.addf %650, %659 : vector<13x256xf32>
    %c15_344 = arith.constant 15 : index
    %c0_345 = arith.constant 0 : index
    %c0_346 = arith.constant 0 : index
    %661 = vector.load %arg6[%c15_344, %c0_345, %c0_346] : memref<16x7x256xf32, #tpu.memory_space<vmem>>, vector<1x7x256xf32>
    %662 = vector.shape_cast %661 : vector<1x7x256xf32> to vector<7x256xf32>
    %cst_347 = arith.constant dense<0.000000e+00> : vector<13x256xf32>
    %663 = tpu.matmul %498, %662, %cst_347 {dimension_numbers = #tpu.dot_dimension_numbers<[1], [0], [0], [1], [0, 0, 1, 1], [], []>} : vector<13x7xf32>, vector<7x256xf32>, vector<13x256xf32> -> vector<13x256xf32>
    %664 = arith.addf %663, %509 : vector<13x256xf32>
    %cst_348 = arith.constant 0.000000e+00 : f32
    %665 = vector.broadcast %cst_348 : f32 to vector<13x256xf32>
    %666 = arith.cmpf oge, %664, %665 : vector<13x256xf32>
    %cst_349 = arith.constant 2.000000e-01 : f32
    %667 = vector.broadcast %cst_349 : f32 to vector<13x256xf32>
    %668 = arith.mulf %667, %664 : vector<13x256xf32>
    %669 = arith.select %666, %664, %668 : vector<13x256xi1>, vector<13x256xf32>
    %670 = arith.addf %660, %669 : vector<13x256xf32>
    %cst_350 = arith.constant dense<0.000000e+00> : vector<6x256xf32>
    %671 = tpu.matmul %503, %670, %cst_350 {dimension_numbers = #tpu.dot_dimension_numbers<[1], [0], [0], [1], [0, 0, 1, 1], [], []>} : vector<6x13xf32>, vector<13x256xf32>, vector<6x256xf32> -> vector<6x256xf32>
    %672 = vector.broadcast %504 : vector<6x1xf32> to vector<6x256xf32>
    %673 = arith.addf %671, %672 : vector<6x256xf32>
    %cst_351 = arith.constant dense<0.000000e+00> : vector<256xf32>
    %674 = vector.multi_reduction <add>, %673, %cst_351 [0] : vector<6x256xf32> to vector<256xf32>
    %675 = vector.shape_cast %674 : vector<256xf32> to vector<1x256xf32>
    %cst_352 = arith.constant 0.000000e+00 : f32
    %676 = vector.shape_cast %265 : vector<6x1xi1> to vector<6x1xi1>
    %677 = vector.broadcast %676 : vector<6x1xi1> to vector<6x256xi1>
    %678 = vector.broadcast %cst_352 : f32 to vector<6x256xf32>
    %679 = arith.select %677, %673, %678 : vector<6x256xi1>, vector<6x256xf32>
    %cst_353 = arith.constant dense<0.000000e+00> : vector<256xf32>
    %680 = vector.multi_reduction <add>, %679, %cst_353 [0] : vector<6x256xf32> to vector<256xf32>
    %681 = vector.shape_cast %680 : vector<256xf32> to vector<1x256xf32>
    %682 = arith.subf %675, %681 : vector<1x256xf32>
    %683 = vector.shape_cast %265 : vector<6x1xi1> to vector<6x1xi1>
    %684 = vector.broadcast %683 : vector<6x1xi1> to vector<6x256xi1>
    %685 = vector.shape_cast %681 : vector<1x256xf32> to vector<1x256xf32>
    %686 = vector.broadcast %685 : vector<1x256xf32> to vector<6x256xf32>
    %687 = vector.shape_cast %682 : vector<1x256xf32> to vector<1x256xf32>
    %688 = vector.broadcast %687 : vector<1x256xf32> to vector<6x256xf32>
    %689 = arith.select %684, %686, %688 : vector<6x256xi1>, vector<6x256xf32>
    %cst_354 = arith.constant 0.333333343 : f32
    %690 = vector.broadcast %cst_354 : f32 to vector<6x256xf32>
    %691 = arith.mulf %689, %690 : vector<6x256xf32>
    %692 = arith.subf %673, %691 : vector<6x256xf32>
    %693 = arith.mulf %692, %692 : vector<6x256xf32>
    %cst_355 = arith.constant dense<0.000000e+00> : vector<256xf32>
    %694 = vector.multi_reduction <add>, %693, %cst_355 [0] : vector<6x256xf32> to vector<256xf32>
    %695 = vector.shape_cast %694 : vector<256xf32> to vector<1x256xf32>
    %cst_356 = arith.constant 0.000000e+00 : f32
    %696 = vector.shape_cast %265 : vector<6x1xi1> to vector<6x1xi1>
    %697 = vector.broadcast %696 : vector<6x1xi1> to vector<6x256xi1>
    %698 = vector.broadcast %cst_356 : f32 to vector<6x256xf32>
    %699 = arith.select %697, %693, %698 : vector<6x256xi1>, vector<6x256xf32>
    %cst_357 = arith.constant dense<0.000000e+00> : vector<256xf32>
    %700 = vector.multi_reduction <add>, %699, %cst_357 [0] : vector<6x256xf32> to vector<256xf32>
    %701 = vector.shape_cast %700 : vector<256xf32> to vector<1x256xf32>
    %702 = arith.subf %695, %701 : vector<1x256xf32>
    %703 = vector.shape_cast %265 : vector<6x1xi1> to vector<6x1xi1>
    %704 = vector.broadcast %703 : vector<6x1xi1> to vector<6x256xi1>
    %705 = vector.shape_cast %701 : vector<1x256xf32> to vector<1x256xf32>
    %706 = vector.broadcast %705 : vector<1x256xf32> to vector<6x256xf32>
    %707 = vector.shape_cast %702 : vector<1x256xf32> to vector<1x256xf32>
    %708 = vector.broadcast %707 : vector<1x256xf32> to vector<6x256xf32>
    %709 = arith.select %704, %706, %708 : vector<6x256xi1>, vector<6x256xf32>
    %cst_358 = arith.constant 0.333333343 : f32
    %710 = vector.broadcast %cst_358 : f32 to vector<6x256xf32>
    %711 = arith.mulf %709, %710 : vector<6x256xf32>
    %cst_359 = arith.constant 9.99999974E-6 : f32
    %712 = vector.broadcast %cst_359 : f32 to vector<6x256xf32>
    %713 = arith.addf %711, %712 : vector<6x256xf32>
    %714 = math.rsqrt %713 : vector<6x256xf32>
    %715 = arith.mulf %692, %714 : vector<6x256xf32>
    %716 = vector.broadcast %505 : vector<6x1xf32> to vector<6x256xf32>
    %717 = arith.mulf %715, %716 : vector<6x256xf32>
    %718 = vector.broadcast %506 : vector<6x1xf32> to vector<6x256xf32>
    %719 = arith.addf %717, %718 : vector<6x256xf32>
    %cst_360 = arith.constant 0.000000e+00 : f32
    %720 = vector.broadcast %cst_360 : f32 to vector<6x256xf32>
    %721 = arith.cmpf oge, %719, %720 : vector<6x256xf32>
    %cst_361 = arith.constant 2.000000e-01 : f32
    %722 = vector.broadcast %cst_361 : f32 to vector<6x256xf32>
    %723 = arith.mulf %722, %719 : vector<6x256xf32>
    %724 = arith.select %721, %719, %723 : vector<6x256xi1>, vector<6x256xf32>
    %725 = arith.addf %495, %724 : vector<6x256xf32>
    %c2_362 = arith.constant 2 : index
    %c0_363 = arith.constant 0 : index
    %c0_364 = arith.constant 0 : index
    %726 = vector.load %arg3[%c2_362, %c0_363, %c0_364] : memref<3x13x14xf32, #tpu.memory_space<vmem>>, vector<1x13x14xf32>
    %727 = vector.shape_cast %726 : vector<1x13x14xf32> to vector<13x14xf32>
    %728 = vector.extract_strided_slice %727 {offsets = [0, 0], sizes = [13, 7], strides = [1, 1]} : vector<13x14xf32> to vector<13x7xf32>
    %729 = vector.extract_strided_slice %727 {offsets = [0, 7], sizes = [13, 6], strides = [1, 1]} : vector<13x14xf32> to vector<13x6xf32>
    %730 = vector.extract_strided_slice %727 {offsets = [0, 13], sizes = [13, 1], strides = [1, 1]} : vector<13x14xf32> to vector<13x1xf32>
    %c2_365 = arith.constant 2 : index
    %c0_366 = arith.constant 0 : index
    %c0_367 = arith.constant 0 : index
    %731 = vector.load %arg4[%c2_365, %c0_366, %c0_367] : memref<3x6x16xf32, #tpu.memory_space<vmem>>, vector<1x6x16xf32>
    %732 = vector.shape_cast %731 : vector<1x6x16xf32> to vector<6x16xf32>
    %733 = vector.extract_strided_slice %732 {offsets = [0, 0], sizes = [6, 13], strides = [1, 1]} : vector<6x16xf32> to vector<6x13xf32>
    %734 = vector.extract_strided_slice %732 {offsets = [0, 13], sizes = [6, 1], strides = [1, 1]} : vector<6x16xf32> to vector<6x1xf32>
    %735 = vector.extract_strided_slice %732 {offsets = [0, 14], sizes = [6, 1], strides = [1, 1]} : vector<6x16xf32> to vector<6x1xf32>
    %736 = vector.extract_strided_slice %732 {offsets = [0, 15], sizes = [6, 1], strides = [1, 1]} : vector<6x16xf32> to vector<6x1xf32>
    %cst_368 = arith.constant dense<0.000000e+00> : vector<13x256xf32>
    %737 = tpu.matmul %729, %725, %cst_368 {dimension_numbers = #tpu.dot_dimension_numbers<[1], [0], [0], [1], [0, 0, 1, 1], [], []>} : vector<13x6xf32>, vector<6x256xf32>, vector<13x256xf32> -> vector<13x256xf32>
    %738 = vector.broadcast %730 : vector<13x1xf32> to vector<13x256xf32>
    %739 = arith.addf %737, %738 : vector<13x256xf32>
    %cst_369 = arith.constant 0.000000e+00 : f32
    %740 = vector.broadcast %cst_369 : f32 to vector<13x256xf32>
    %c0_370 = arith.constant 0 : index
    %c0_371 = arith.constant 0 : index
    %c0_372 = arith.constant 0 : index
    %741 = vector.load %arg6[%c0_370, %c0_371, %c0_372] : memref<16x7x256xf32, #tpu.memory_space<vmem>>, vector<1x7x256xf32>
    %742 = vector.shape_cast %741 : vector<1x7x256xf32> to vector<7x256xf32>
    %cst_373 = arith.constant dense<0.000000e+00> : vector<13x256xf32>
    %743 = tpu.matmul %728, %742, %cst_373 {dimension_numbers = #tpu.dot_dimension_numbers<[1], [0], [0], [1], [0, 0, 1, 1], [], []>} : vector<13x7xf32>, vector<7x256xf32>, vector<13x256xf32> -> vector<13x256xf32>
    %744 = arith.addf %743, %739 : vector<13x256xf32>
    %cst_374 = arith.constant 0.000000e+00 : f32
    %745 = vector.broadcast %cst_374 : f32 to vector<13x256xf32>
    %746 = arith.cmpf oge, %744, %745 : vector<13x256xf32>
    %cst_375 = arith.constant 2.000000e-01 : f32
    %747 = vector.broadcast %cst_375 : f32 to vector<13x256xf32>
    %748 = arith.mulf %747, %744 : vector<13x256xf32>
    %749 = arith.select %746, %744, %748 : vector<13x256xi1>, vector<13x256xf32>
    %750 = arith.addf %740, %749 : vector<13x256xf32>
    %c1_376 = arith.constant 1 : index
    %c0_377 = arith.constant 0 : index
    %c0_378 = arith.constant 0 : index
    %751 = vector.load %arg6[%c1_376, %c0_377, %c0_378] : memref<16x7x256xf32, #tpu.memory_space<vmem>>, vector<1x7x256xf32>
    %752 = vector.shape_cast %751 : vector<1x7x256xf32> to vector<7x256xf32>
    %cst_379 = arith.constant dense<0.000000e+00> : vector<13x256xf32>
    %753 = tpu.matmul %728, %752, %cst_379 {dimension_numbers = #tpu.dot_dimension_numbers<[1], [0], [0], [1], [0, 0, 1, 1], [], []>} : vector<13x7xf32>, vector<7x256xf32>, vector<13x256xf32> -> vector<13x256xf32>
    %754 = arith.addf %753, %739 : vector<13x256xf32>
    %cst_380 = arith.constant 0.000000e+00 : f32
    %755 = vector.broadcast %cst_380 : f32 to vector<13x256xf32>
    %756 = arith.cmpf oge, %754, %755 : vector<13x256xf32>
    %cst_381 = arith.constant 2.000000e-01 : f32
    %757 = vector.broadcast %cst_381 : f32 to vector<13x256xf32>
    %758 = arith.mulf %757, %754 : vector<13x256xf32>
    %759 = arith.select %756, %754, %758 : vector<13x256xi1>, vector<13x256xf32>
    %760 = arith.addf %750, %759 : vector<13x256xf32>
    %c2_382 = arith.constant 2 : index
    %c0_383 = arith.constant 0 : index
    %c0_384 = arith.constant 0 : index
    %761 = vector.load %arg6[%c2_382, %c0_383, %c0_384] : memref<16x7x256xf32, #tpu.memory_space<vmem>>, vector<1x7x256xf32>
    %762 = vector.shape_cast %761 : vector<1x7x256xf32> to vector<7x256xf32>
    %cst_385 = arith.constant dense<0.000000e+00> : vector<13x256xf32>
    %763 = tpu.matmul %728, %762, %cst_385 {dimension_numbers = #tpu.dot_dimension_numbers<[1], [0], [0], [1], [0, 0, 1, 1], [], []>} : vector<13x7xf32>, vector<7x256xf32>, vector<13x256xf32> -> vector<13x256xf32>
    %764 = arith.addf %763, %739 : vector<13x256xf32>
    %cst_386 = arith.constant 0.000000e+00 : f32
    %765 = vector.broadcast %cst_386 : f32 to vector<13x256xf32>
    %766 = arith.cmpf oge, %764, %765 : vector<13x256xf32>
    %cst_387 = arith.constant 2.000000e-01 : f32
    %767 = vector.broadcast %cst_387 : f32 to vector<13x256xf32>
    %768 = arith.mulf %767, %764 : vector<13x256xf32>
    %769 = arith.select %766, %764, %768 : vector<13x256xi1>, vector<13x256xf32>
    %770 = arith.addf %760, %769 : vector<13x256xf32>
    %c3_388 = arith.constant 3 : index
    %c0_389 = arith.constant 0 : index
    %c0_390 = arith.constant 0 : index
    %771 = vector.load %arg6[%c3_388, %c0_389, %c0_390] : memref<16x7x256xf32, #tpu.memory_space<vmem>>, vector<1x7x256xf32>
    %772 = vector.shape_cast %771 : vector<1x7x256xf32> to vector<7x256xf32>
    %cst_391 = arith.constant dense<0.000000e+00> : vector<13x256xf32>
    %773 = tpu.matmul %728, %772, %cst_391 {dimension_numbers = #tpu.dot_dimension_numbers<[1], [0], [0], [1], [0, 0, 1, 1], [], []>} : vector<13x7xf32>, vector<7x256xf32>, vector<13x256xf32> -> vector<13x256xf32>
    %774 = arith.addf %773, %739 : vector<13x256xf32>
    %cst_392 = arith.constant 0.000000e+00 : f32
    %775 = vector.broadcast %cst_392 : f32 to vector<13x256xf32>
    %776 = arith.cmpf oge, %774, %775 : vector<13x256xf32>
    %cst_393 = arith.constant 2.000000e-01 : f32
    %777 = vector.broadcast %cst_393 : f32 to vector<13x256xf32>
    %778 = arith.mulf %777, %774 : vector<13x256xf32>
    %779 = arith.select %776, %774, %778 : vector<13x256xi1>, vector<13x256xf32>
    %780 = arith.addf %770, %779 : vector<13x256xf32>
    %c4_394 = arith.constant 4 : index
    %c0_395 = arith.constant 0 : index
    %c0_396 = arith.constant 0 : index
    %781 = vector.load %arg6[%c4_394, %c0_395, %c0_396] : memref<16x7x256xf32, #tpu.memory_space<vmem>>, vector<1x7x256xf32>
    %782 = vector.shape_cast %781 : vector<1x7x256xf32> to vector<7x256xf32>
    %cst_397 = arith.constant dense<0.000000e+00> : vector<13x256xf32>
    %783 = tpu.matmul %728, %782, %cst_397 {dimension_numbers = #tpu.dot_dimension_numbers<[1], [0], [0], [1], [0, 0, 1, 1], [], []>} : vector<13x7xf32>, vector<7x256xf32>, vector<13x256xf32> -> vector<13x256xf32>
    %784 = arith.addf %783, %739 : vector<13x256xf32>
    %cst_398 = arith.constant 0.000000e+00 : f32
    %785 = vector.broadcast %cst_398 : f32 to vector<13x256xf32>
    %786 = arith.cmpf oge, %784, %785 : vector<13x256xf32>
    %cst_399 = arith.constant 2.000000e-01 : f32
    %787 = vector.broadcast %cst_399 : f32 to vector<13x256xf32>
    %788 = arith.mulf %787, %784 : vector<13x256xf32>
    %789 = arith.select %786, %784, %788 : vector<13x256xi1>, vector<13x256xf32>
    %790 = arith.addf %780, %789 : vector<13x256xf32>
    %c5_400 = arith.constant 5 : index
    %c0_401 = arith.constant 0 : index
    %c0_402 = arith.constant 0 : index
    %791 = vector.load %arg6[%c5_400, %c0_401, %c0_402] : memref<16x7x256xf32, #tpu.memory_space<vmem>>, vector<1x7x256xf32>
    %792 = vector.shape_cast %791 : vector<1x7x256xf32> to vector<7x256xf32>
    %cst_403 = arith.constant dense<0.000000e+00> : vector<13x256xf32>
    %793 = tpu.matmul %728, %792, %cst_403 {dimension_numbers = #tpu.dot_dimension_numbers<[1], [0], [0], [1], [0, 0, 1, 1], [], []>} : vector<13x7xf32>, vector<7x256xf32>, vector<13x256xf32> -> vector<13x256xf32>
    %794 = arith.addf %793, %739 : vector<13x256xf32>
    %cst_404 = arith.constant 0.000000e+00 : f32
    %795 = vector.broadcast %cst_404 : f32 to vector<13x256xf32>
    %796 = arith.cmpf oge, %794, %795 : vector<13x256xf32>
    %cst_405 = arith.constant 2.000000e-01 : f32
    %797 = vector.broadcast %cst_405 : f32 to vector<13x256xf32>
    %798 = arith.mulf %797, %794 : vector<13x256xf32>
    %799 = arith.select %796, %794, %798 : vector<13x256xi1>, vector<13x256xf32>
    %800 = arith.addf %790, %799 : vector<13x256xf32>
    %c6_406 = arith.constant 6 : index
    %c0_407 = arith.constant 0 : index
    %c0_408 = arith.constant 0 : index
    %801 = vector.load %arg6[%c6_406, %c0_407, %c0_408] : memref<16x7x256xf32, #tpu.memory_space<vmem>>, vector<1x7x256xf32>
    %802 = vector.shape_cast %801 : vector<1x7x256xf32> to vector<7x256xf32>
    %cst_409 = arith.constant dense<0.000000e+00> : vector<13x256xf32>
    %803 = tpu.matmul %728, %802, %cst_409 {dimension_numbers = #tpu.dot_dimension_numbers<[1], [0], [0], [1], [0, 0, 1, 1], [], []>} : vector<13x7xf32>, vector<7x256xf32>, vector<13x256xf32> -> vector<13x256xf32>
    %804 = arith.addf %803, %739 : vector<13x256xf32>
    %cst_410 = arith.constant 0.000000e+00 : f32
    %805 = vector.broadcast %cst_410 : f32 to vector<13x256xf32>
    %806 = arith.cmpf oge, %804, %805 : vector<13x256xf32>
    %cst_411 = arith.constant 2.000000e-01 : f32
    %807 = vector.broadcast %cst_411 : f32 to vector<13x256xf32>
    %808 = arith.mulf %807, %804 : vector<13x256xf32>
    %809 = arith.select %806, %804, %808 : vector<13x256xi1>, vector<13x256xf32>
    %810 = arith.addf %800, %809 : vector<13x256xf32>
    %c7_412 = arith.constant 7 : index
    %c0_413 = arith.constant 0 : index
    %c0_414 = arith.constant 0 : index
    %811 = vector.load %arg6[%c7_412, %c0_413, %c0_414] : memref<16x7x256xf32, #tpu.memory_space<vmem>>, vector<1x7x256xf32>
    %812 = vector.shape_cast %811 : vector<1x7x256xf32> to vector<7x256xf32>
    %cst_415 = arith.constant dense<0.000000e+00> : vector<13x256xf32>
    %813 = tpu.matmul %728, %812, %cst_415 {dimension_numbers = #tpu.dot_dimension_numbers<[1], [0], [0], [1], [0, 0, 1, 1], [], []>} : vector<13x7xf32>, vector<7x256xf32>, vector<13x256xf32> -> vector<13x256xf32>
    %814 = arith.addf %813, %739 : vector<13x256xf32>
    %cst_416 = arith.constant 0.000000e+00 : f32
    %815 = vector.broadcast %cst_416 : f32 to vector<13x256xf32>
    %816 = arith.cmpf oge, %814, %815 : vector<13x256xf32>
    %cst_417 = arith.constant 2.000000e-01 : f32
    %817 = vector.broadcast %cst_417 : f32 to vector<13x256xf32>
    %818 = arith.mulf %817, %814 : vector<13x256xf32>
    %819 = arith.select %816, %814, %818 : vector<13x256xi1>, vector<13x256xf32>
    %820 = arith.addf %810, %819 : vector<13x256xf32>
    %c8_418 = arith.constant 8 : index
    %c0_419 = arith.constant 0 : index
    %c0_420 = arith.constant 0 : index
    %821 = vector.load %arg6[%c8_418, %c0_419, %c0_420] : memref<16x7x256xf32, #tpu.memory_space<vmem>>, vector<1x7x256xf32>
    %822 = vector.shape_cast %821 : vector<1x7x256xf32> to vector<7x256xf32>
    %cst_421 = arith.constant dense<0.000000e+00> : vector<13x256xf32>
    %823 = tpu.matmul %728, %822, %cst_421 {dimension_numbers = #tpu.dot_dimension_numbers<[1], [0], [0], [1], [0, 0, 1, 1], [], []>} : vector<13x7xf32>, vector<7x256xf32>, vector<13x256xf32> -> vector<13x256xf32>
    %824 = arith.addf %823, %739 : vector<13x256xf32>
    %cst_422 = arith.constant 0.000000e+00 : f32
    %825 = vector.broadcast %cst_422 : f32 to vector<13x256xf32>
    %826 = arith.cmpf oge, %824, %825 : vector<13x256xf32>
    %cst_423 = arith.constant 2.000000e-01 : f32
    %827 = vector.broadcast %cst_423 : f32 to vector<13x256xf32>
    %828 = arith.mulf %827, %824 : vector<13x256xf32>
    %829 = arith.select %826, %824, %828 : vector<13x256xi1>, vector<13x256xf32>
    %830 = arith.addf %820, %829 : vector<13x256xf32>
    %c9_424 = arith.constant 9 : index
    %c0_425 = arith.constant 0 : index
    %c0_426 = arith.constant 0 : index
    %831 = vector.load %arg6[%c9_424, %c0_425, %c0_426] : memref<16x7x256xf32, #tpu.memory_space<vmem>>, vector<1x7x256xf32>
    %832 = vector.shape_cast %831 : vector<1x7x256xf32> to vector<7x256xf32>
    %cst_427 = arith.constant dense<0.000000e+00> : vector<13x256xf32>
    %833 = tpu.matmul %728, %832, %cst_427 {dimension_numbers = #tpu.dot_dimension_numbers<[1], [0], [0], [1], [0, 0, 1, 1], [], []>} : vector<13x7xf32>, vector<7x256xf32>, vector<13x256xf32> -> vector<13x256xf32>
    %834 = arith.addf %833, %739 : vector<13x256xf32>
    %cst_428 = arith.constant 0.000000e+00 : f32
    %835 = vector.broadcast %cst_428 : f32 to vector<13x256xf32>
    %836 = arith.cmpf oge, %834, %835 : vector<13x256xf32>
    %cst_429 = arith.constant 2.000000e-01 : f32
    %837 = vector.broadcast %cst_429 : f32 to vector<13x256xf32>
    %838 = arith.mulf %837, %834 : vector<13x256xf32>
    %839 = arith.select %836, %834, %838 : vector<13x256xi1>, vector<13x256xf32>
    %840 = arith.addf %830, %839 : vector<13x256xf32>
    %c10_430 = arith.constant 10 : index
    %c0_431 = arith.constant 0 : index
    %c0_432 = arith.constant 0 : index
    %841 = vector.load %arg6[%c10_430, %c0_431, %c0_432] : memref<16x7x256xf32, #tpu.memory_space<vmem>>, vector<1x7x256xf32>
    %842 = vector.shape_cast %841 : vector<1x7x256xf32> to vector<7x256xf32>
    %cst_433 = arith.constant dense<0.000000e+00> : vector<13x256xf32>
    %843 = tpu.matmul %728, %842, %cst_433 {dimension_numbers = #tpu.dot_dimension_numbers<[1], [0], [0], [1], [0, 0, 1, 1], [], []>} : vector<13x7xf32>, vector<7x256xf32>, vector<13x256xf32> -> vector<13x256xf32>
    %844 = arith.addf %843, %739 : vector<13x256xf32>
    %cst_434 = arith.constant 0.000000e+00 : f32
    %845 = vector.broadcast %cst_434 : f32 to vector<13x256xf32>
    %846 = arith.cmpf oge, %844, %845 : vector<13x256xf32>
    %cst_435 = arith.constant 2.000000e-01 : f32
    %847 = vector.broadcast %cst_435 : f32 to vector<13x256xf32>
    %848 = arith.mulf %847, %844 : vector<13x256xf32>
    %849 = arith.select %846, %844, %848 : vector<13x256xi1>, vector<13x256xf32>
    %850 = arith.addf %840, %849 : vector<13x256xf32>
    %c11_436 = arith.constant 11 : index
    %c0_437 = arith.constant 0 : index
    %c0_438 = arith.constant 0 : index
    %851 = vector.load %arg6[%c11_436, %c0_437, %c0_438] : memref<16x7x256xf32, #tpu.memory_space<vmem>>, vector<1x7x256xf32>
    %852 = vector.shape_cast %851 : vector<1x7x256xf32> to vector<7x256xf32>
    %cst_439 = arith.constant dense<0.000000e+00> : vector<13x256xf32>
    %853 = tpu.matmul %728, %852, %cst_439 {dimension_numbers = #tpu.dot_dimension_numbers<[1], [0], [0], [1], [0, 0, 1, 1], [], []>} : vector<13x7xf32>, vector<7x256xf32>, vector<13x256xf32> -> vector<13x256xf32>
    %854 = arith.addf %853, %739 : vector<13x256xf32>
    %cst_440 = arith.constant 0.000000e+00 : f32
    %855 = vector.broadcast %cst_440 : f32 to vector<13x256xf32>
    %856 = arith.cmpf oge, %854, %855 : vector<13x256xf32>
    %cst_441 = arith.constant 2.000000e-01 : f32
    %857 = vector.broadcast %cst_441 : f32 to vector<13x256xf32>
    %858 = arith.mulf %857, %854 : vector<13x256xf32>
    %859 = arith.select %856, %854, %858 : vector<13x256xi1>, vector<13x256xf32>
    %860 = arith.addf %850, %859 : vector<13x256xf32>
    %c12_442 = arith.constant 12 : index
    %c0_443 = arith.constant 0 : index
    %c0_444 = arith.constant 0 : index
    %861 = vector.load %arg6[%c12_442, %c0_443, %c0_444] : memref<16x7x256xf32, #tpu.memory_space<vmem>>, vector<1x7x256xf32>
    %862 = vector.shape_cast %861 : vector<1x7x256xf32> to vector<7x256xf32>
    %cst_445 = arith.constant dense<0.000000e+00> : vector<13x256xf32>
    %863 = tpu.matmul %728, %862, %cst_445 {dimension_numbers = #tpu.dot_dimension_numbers<[1], [0], [0], [1], [0, 0, 1, 1], [], []>} : vector<13x7xf32>, vector<7x256xf32>, vector<13x256xf32> -> vector<13x256xf32>
    %864 = arith.addf %863, %739 : vector<13x256xf32>
    %cst_446 = arith.constant 0.000000e+00 : f32
    %865 = vector.broadcast %cst_446 : f32 to vector<13x256xf32>
    %866 = arith.cmpf oge, %864, %865 : vector<13x256xf32>
    %cst_447 = arith.constant 2.000000e-01 : f32
    %867 = vector.broadcast %cst_447 : f32 to vector<13x256xf32>
    %868 = arith.mulf %867, %864 : vector<13x256xf32>
    %869 = arith.select %866, %864, %868 : vector<13x256xi1>, vector<13x256xf32>
    %870 = arith.addf %860, %869 : vector<13x256xf32>
    %c13_448 = arith.constant 13 : index
    %c0_449 = arith.constant 0 : index
    %c0_450 = arith.constant 0 : index
    %871 = vector.load %arg6[%c13_448, %c0_449, %c0_450] : memref<16x7x256xf32, #tpu.memory_space<vmem>>, vector<1x7x256xf32>
    %872 = vector.shape_cast %871 : vector<1x7x256xf32> to vector<7x256xf32>
    %cst_451 = arith.constant dense<0.000000e+00> : vector<13x256xf32>
    %873 = tpu.matmul %728, %872, %cst_451 {dimension_numbers = #tpu.dot_dimension_numbers<[1], [0], [0], [1], [0, 0, 1, 1], [], []>} : vector<13x7xf32>, vector<7x256xf32>, vector<13x256xf32> -> vector<13x256xf32>
    %874 = arith.addf %873, %739 : vector<13x256xf32>
    %cst_452 = arith.constant 0.000000e+00 : f32
    %875 = vector.broadcast %cst_452 : f32 to vector<13x256xf32>
    %876 = arith.cmpf oge, %874, %875 : vector<13x256xf32>
    %cst_453 = arith.constant 2.000000e-01 : f32
    %877 = vector.broadcast %cst_453 : f32 to vector<13x256xf32>
    %878 = arith.mulf %877, %874 : vector<13x256xf32>
    %879 = arith.select %876, %874, %878 : vector<13x256xi1>, vector<13x256xf32>
    %880 = arith.addf %870, %879 : vector<13x256xf32>
    %c14_454 = arith.constant 14 : index
    %c0_455 = arith.constant 0 : index
    %c0_456 = arith.constant 0 : index
    %881 = vector.load %arg6[%c14_454, %c0_455, %c0_456] : memref<16x7x256xf32, #tpu.memory_space<vmem>>, vector<1x7x256xf32>
    %882 = vector.shape_cast %881 : vector<1x7x256xf32> to vector<7x256xf32>
    %cst_457 = arith.constant dense<0.000000e+00> : vector<13x256xf32>
    %883 = tpu.matmul %728, %882, %cst_457 {dimension_numbers = #tpu.dot_dimension_numbers<[1], [0], [0], [1], [0, 0, 1, 1], [], []>} : vector<13x7xf32>, vector<7x256xf32>, vector<13x256xf32> -> vector<13x256xf32>
    %884 = arith.addf %883, %739 : vector<13x256xf32>
    %cst_458 = arith.constant 0.000000e+00 : f32
    %885 = vector.broadcast %cst_458 : f32 to vector<13x256xf32>
    %886 = arith.cmpf oge, %884, %885 : vector<13x256xf32>
    %cst_459 = arith.constant 2.000000e-01 : f32
    %887 = vector.broadcast %cst_459 : f32 to vector<13x256xf32>
    %888 = arith.mulf %887, %884 : vector<13x256xf32>
    %889 = arith.select %886, %884, %888 : vector<13x256xi1>, vector<13x256xf32>
    %890 = arith.addf %880, %889 : vector<13x256xf32>
    %c15_460 = arith.constant 15 : index
    %c0_461 = arith.constant 0 : index
    %c0_462 = arith.constant 0 : index
    %891 = vector.load %arg6[%c15_460, %c0_461, %c0_462] : memref<16x7x256xf32, #tpu.memory_space<vmem>>, vector<1x7x256xf32>
    %892 = vector.shape_cast %891 : vector<1x7x256xf32> to vector<7x256xf32>
    %cst_463 = arith.constant dense<0.000000e+00> : vector<13x256xf32>
    %893 = tpu.matmul %728, %892, %cst_463 {dimension_numbers = #tpu.dot_dimension_numbers<[1], [0], [0], [1], [0, 0, 1, 1], [], []>} : vector<13x7xf32>, vector<7x256xf32>, vector<13x256xf32> -> vector<13x256xf32>
    %894 = arith.addf %893, %739 : vector<13x256xf32>
    %cst_464 = arith.constant 0.000000e+00 : f32
    %895 = vector.broadcast %cst_464 : f32 to vector<13x256xf32>
    %896 = arith.cmpf oge, %894, %895 : vector<13x256xf32>
    %cst_465 = arith.constant 2.000000e-01 : f32
    %897 = vector.broadcast %cst_465 : f32 to vector<13x256xf32>
    %898 = arith.mulf %897, %894 : vector<13x256xf32>
    %899 = arith.select %896, %894, %898 : vector<13x256xi1>, vector<13x256xf32>
    %900 = arith.addf %890, %899 : vector<13x256xf32>
    %cst_466 = arith.constant dense<0.000000e+00> : vector<6x256xf32>
    %901 = tpu.matmul %733, %900, %cst_466 {dimension_numbers = #tpu.dot_dimension_numbers<[1], [0], [0], [1], [0, 0, 1, 1], [], []>} : vector<6x13xf32>, vector<13x256xf32>, vector<6x256xf32> -> vector<6x256xf32>
    %902 = vector.broadcast %734 : vector<6x1xf32> to vector<6x256xf32>
    %903 = arith.addf %901, %902 : vector<6x256xf32>
    %cst_467 = arith.constant dense<0.000000e+00> : vector<256xf32>
    %904 = vector.multi_reduction <add>, %903, %cst_467 [0] : vector<6x256xf32> to vector<256xf32>
    %905 = vector.shape_cast %904 : vector<256xf32> to vector<1x256xf32>
    %cst_468 = arith.constant 0.000000e+00 : f32
    %906 = vector.shape_cast %265 : vector<6x1xi1> to vector<6x1xi1>
    %907 = vector.broadcast %906 : vector<6x1xi1> to vector<6x256xi1>
    %908 = vector.broadcast %cst_468 : f32 to vector<6x256xf32>
    %909 = arith.select %907, %903, %908 : vector<6x256xi1>, vector<6x256xf32>
    %cst_469 = arith.constant dense<0.000000e+00> : vector<256xf32>
    %910 = vector.multi_reduction <add>, %909, %cst_469 [0] : vector<6x256xf32> to vector<256xf32>
    %911 = vector.shape_cast %910 : vector<256xf32> to vector<1x256xf32>
    %912 = arith.subf %905, %911 : vector<1x256xf32>
    %913 = vector.shape_cast %265 : vector<6x1xi1> to vector<6x1xi1>
    %914 = vector.broadcast %913 : vector<6x1xi1> to vector<6x256xi1>
    %915 = vector.shape_cast %911 : vector<1x256xf32> to vector<1x256xf32>
    %916 = vector.broadcast %915 : vector<1x256xf32> to vector<6x256xf32>
    %917 = vector.shape_cast %912 : vector<1x256xf32> to vector<1x256xf32>
    %918 = vector.broadcast %917 : vector<1x256xf32> to vector<6x256xf32>
    %919 = arith.select %914, %916, %918 : vector<6x256xi1>, vector<6x256xf32>
    %cst_470 = arith.constant 0.333333343 : f32
    %920 = vector.broadcast %cst_470 : f32 to vector<6x256xf32>
    %921 = arith.mulf %919, %920 : vector<6x256xf32>
    %922 = arith.subf %903, %921 : vector<6x256xf32>
    %923 = arith.mulf %922, %922 : vector<6x256xf32>
    %cst_471 = arith.constant dense<0.000000e+00> : vector<256xf32>
    %924 = vector.multi_reduction <add>, %923, %cst_471 [0] : vector<6x256xf32> to vector<256xf32>
    %925 = vector.shape_cast %924 : vector<256xf32> to vector<1x256xf32>
    %cst_472 = arith.constant 0.000000e+00 : f32
    %926 = vector.shape_cast %265 : vector<6x1xi1> to vector<6x1xi1>
    %927 = vector.broadcast %926 : vector<6x1xi1> to vector<6x256xi1>
    %928 = vector.broadcast %cst_472 : f32 to vector<6x256xf32>
    %929 = arith.select %927, %923, %928 : vector<6x256xi1>, vector<6x256xf32>
    %cst_473 = arith.constant dense<0.000000e+00> : vector<256xf32>
    %930 = vector.multi_reduction <add>, %929, %cst_473 [0] : vector<6x256xf32> to vector<256xf32>
    %931 = vector.shape_cast %930 : vector<256xf32> to vector<1x256xf32>
    %932 = arith.subf %925, %931 : vector<1x256xf32>
    %933 = vector.shape_cast %265 : vector<6x1xi1> to vector<6x1xi1>
    %934 = vector.broadcast %933 : vector<6x1xi1> to vector<6x256xi1>
    %935 = vector.shape_cast %931 : vector<1x256xf32> to vector<1x256xf32>
    %936 = vector.broadcast %935 : vector<1x256xf32> to vector<6x256xf32>
    %937 = vector.shape_cast %932 : vector<1x256xf32> to vector<1x256xf32>
    %938 = vector.broadcast %937 : vector<1x256xf32> to vector<6x256xf32>
    %939 = arith.select %934, %936, %938 : vector<6x256xi1>, vector<6x256xf32>
    %cst_474 = arith.constant 0.333333343 : f32
    %940 = vector.broadcast %cst_474 : f32 to vector<6x256xf32>
    %941 = arith.mulf %939, %940 : vector<6x256xf32>
    %cst_475 = arith.constant 9.99999974E-6 : f32
    %942 = vector.broadcast %cst_475 : f32 to vector<6x256xf32>
    %943 = arith.addf %941, %942 : vector<6x256xf32>
    %944 = math.rsqrt %943 : vector<6x256xf32>
    %945 = arith.mulf %922, %944 : vector<6x256xf32>
    %946 = vector.broadcast %735 : vector<6x1xf32> to vector<6x256xf32>
    %947 = arith.mulf %945, %946 : vector<6x256xf32>
    %948 = vector.broadcast %736 : vector<6x1xf32> to vector<6x256xf32>
    %949 = arith.addf %947, %948 : vector<6x256xf32>
    %cst_476 = arith.constant 0.000000e+00 : f32
    %950 = vector.broadcast %cst_476 : f32 to vector<6x256xf32>
    %951 = arith.cmpf oge, %949, %950 : vector<6x256xf32>
    %cst_477 = arith.constant 2.000000e-01 : f32
    %952 = vector.broadcast %cst_477 : f32 to vector<6x256xf32>
    %953 = arith.mulf %952, %949 : vector<6x256xf32>
    %954 = arith.select %951, %949, %953 : vector<6x256xi1>, vector<6x256xf32>
    %955 = arith.addf %725, %954 : vector<6x256xf32>
    %c0_478 = arith.constant 0 : index
    %c0_479 = arith.constant 0 : index
    %956 = vector.load %arg5[%c0_478, %c0_479] : memref<6x256xf32, #tpu.memory_space<vmem>>, vector<6x256xf32>
    tpu.vector_store %arg5[%c0_478, %c0_479], %955 {strides = array<i32>} : memref<6x256xf32, #tpu.memory_space<vmem>>, vector<6x256xf32>,
    return
  }
  func.func @transform_0(%arg0: i32) -> (i32, i32, i32) {
    %c0_i32 = arith.constant 0 : i32
    %c0_i32_0 = arith.constant 0 : i32
    %c0_i32_1 = arith.constant 0 : i32
    return %c0_i32, %c0_i32_0, %arg0 : i32, i32, i32
  }
  func.func @transform_1(%arg0: i32) -> (i32, i32) {
    %c0_i32 = arith.constant 0 : i32
    %c0_i32_0 = arith.constant 0 : i32
    %c0_i32_1 = arith.constant 0 : i32
    return %c0_i32, %c0_i32_0 : i32, i32
  }
  func.func @transform_2(%arg0: i32) -> (i32, i32, i32) {
    %c0_i32 = arith.constant 0 : i32
    %c0_i32_0 = arith.constant 0 : i32
    %c0_i32_1 = arith.constant 0 : i32
    %c0_i32_2 = arith.constant 0 : i32
    return %c0_i32, %c0_i32_0, %c0_i32_1 : i32, i32, i32
  }
  func.func @transform_3(%arg0: i32) -> (i32, i32, i32) {
    %c0_i32 = arith.constant 0 : i32
    %c0_i32_0 = arith.constant 0 : i32
    %c0_i32_1 = arith.constant 0 : i32
    %c0_i32_2 = arith.constant 0 : i32
    return %c0_i32, %c0_i32_0, %c0_i32_1 : i32, i32, i32
  }
  func.func @transform_4(%arg0: i32) -> (i32, i32) {
    %c0_i32 = arith.constant 0 : i32
    %c0_i32_0 = arith.constant 0 : i32
    return %c0_i32, %arg0 : i32, i32
  }
}

</mosaic_0001>

<bundles_post_ra>
// kernel: tpu_custom_call.1
= control target key start
LH: loop header
LB: loop body
LE: loop exit
PB: predicated region body
PF: predicated region fallthrough
CT: control target
= control target key end

     0   :  { %vm32_vm0 = vcmask 1046528   ;;  %v7413_v5 = vmov 0.0   ;;  %vm29_vm1 = vcmask 56320   ;;  %s8853_s0 = inlined_call_operand.vmem [shape: f32[16,7,256], index: 0, kind: input, shape index: {}]   ;;  %s8854_s1 = inlined_call_operand.vmem [shape: f32[7,8], index: 1, kind: input, shape index: {}]   ;;  %s8855_s2 = inlined_call_operand.vmem [shape: f32[3,13,14], index: 2, kind: input, shape index: {}]   ;;  %s8856_s3 = inlined_call_operand.vmem [shape: f32[3,6,16], index: 3, kind: input, shape index: {}]   ;;  %s8857_s4 = inlined_call_operand.hbm [shape: f32[6,256], index: 4, kind: output, shape index: {}]  }
   0x1   :  { %v23_v0 = vld [vmem:[%s8853_s0 + $0x8] sm:$0x7f]  ;;  %v6989_v1 = vld [vmem:[%s8853_s0 + $0x18] sm:$0x7f]  ;;  %v22_v2 = vld [vmem:[%s8853_s0] sm:$0x7f]  ;;  %103 = vmatprep.mubr.f32.mxu0 %v7413_v5  ;;  %195 = vmatprep.mubr.f32.mxu1 %v7413_v5 }
   0x2   :  { %6985 = vmatprep.subr.msk.mxu0 %vm32_vm0, %v23_v0  ;;  %6990 = vmatprep.subr.msk.mxu1 %vm32_vm0, %v6989_v1  ;;  %v6988_v3 = vld [vmem:[%s8853_s0 + $0x10] sm:$0x7f]  ;;  %v7464_v4 = vld [vmem:[%s8854_s1] sm:$0x7f]  ;;  %v6994_v6 = vld [vmem:[%s8853_s0 + $0x28] sm:$0x7f] }
   0x3   :  { %6986 = vmatpush1.msk.msra.mxu0 %vm32_vm0, %v22_v2  ;;  %v6999_v7 = vld [vmem:[%s8853_s0 + $0x38] sm:$0x7f]  ;;  %6991 = vmatpush1.msk.msra.mxu1 %vm32_vm0, %v6988_v3  ;;  %v6993_v8 = vld [vmem:[%s8853_s0 + $0x20] sm:$0x7f]  ;;  %v6998_v9 = vld [vmem:[%s8853_s0 + $0x30] sm:$0x7f] }
   0x4   :  { %6987 = vmatmul.mubr.msk.f32.vlgmr.msra.gmra.mrb[0].mxu0 %vm29_vm1, %v7464_v4  ;;  %6992 = vmatmul.mubr.msk.f32.vlgmr.msra.gmra.mrb[0].mxu1 %vm29_vm1, %v7464_v4  ;;  %v7004_v10 = vld [vmem:[%s8853_s0 + $0x48] sm:$0x7f]  ;;  %v7009_v11 = vld [vmem:[%s8853_s0 + $0x58] sm:$0x7f]  ;;  %v7003_v12 = vld [vmem:[%s8853_s0 + $0x40] sm:$0x7f] }
   0x5   :  { %6995 = vmatprep.subr.msk.mxu0 %vm32_vm0, %v6994_v6  ;;  %7000 = vmatprep.subr.msk.mxu1 %vm32_vm0, %v6999_v7  ;;  %v7008_v13 = vld [vmem:[%s8853_s0 + $0x50] sm:$0x7f]  ;;  %v7014_v14 = vld [vmem:[%s8853_s0 + $0x68] sm:$0x7f]  ;;  %v7019_v15 = vld [vmem:[%s8853_s0 + $0x78] sm:$0x7f] }
   0x6   :  { %6996 = vmatpush1.msk.msra.mxu0 %vm32_vm0, %v6993_v8  ;;  %286 = vmatprep.mubr.f32.mxu0 %v7413_v5  ;;  %v7013_v16 = vld [vmem:[%s8853_s0 + $0x60] sm:$0x7f]  ;;  %v7018_v17 = vld [vmem:[%s8853_s0 + $0x70] sm:$0x7f] }
   0x7   :  { %7001 = vmatpush1.msk.msra.mxu1 %vm32_vm0, %v6998_v9  ;;  %377 = vmatprep.mubr.f32.mxu1 %v7413_v5 }
   0x8   :  { %6997 = vmatmul.mubr.msk.f32.vlgmr.msra.gmra.mrb[2].mxu0 %vm29_vm1, %v7464_v4  ;;  %7002 = vmatmul.mubr.msk.f32.vlgmr.msra.gmra.mrb[2].mxu1 %vm29_vm1, %v7464_v4 }
   0x9   :  { %7005 = vmatprep.subr.msk.mxu0 %vm32_vm0, %v7004_v10  ;;  %7010 = vmatprep.subr.msk.mxu1 %vm32_vm0, %v7009_v11 }
   0xa   :  { %7006 = vmatpush1.msk.msra.mxu0 %vm32_vm0, %v7003_v12  ;;  %468 = vmatprep.mubr.f32.mxu0 %v7413_v5 }
   0xb   :  { %7011 = vmatpush1.msk.msra.mxu1 %vm32_vm0, %v7008_v13  ;;  %559 = vmatprep.mubr.f32.mxu1 %v7413_v5 }
   0xc   :  { %7007 = vmatmul.mubr.msk.f32.vlgmr.msra.gmra.mrb[4].mxu0 %vm29_vm1, %v7464_v4  ;;  %7012 = vmatmul.mubr.msk.f32.vlgmr.msra.gmra.mrb[4].mxu1 %vm29_vm1, %v7464_v4 }
   0xd   :  { %9 = vsyncpa [#allocation4], 0  ;;  %7015 = vmatprep.subr.msk.mxu0 %vm32_vm0, %v7014_v14  ;;  %7020 = vmatprep.subr.msk.mxu1 %vm32_vm0, %v7019_v15  ;;  %v7024_v18 = vld [vmem:[%s8853_s0 + $0x88] sm:$0x7f]  ;;  %v7029_v19 = vld [vmem:[%s8853_s0 + $0x98] sm:$0x7f]  ;;  %v19_v42 = vlaneseq }
   0xe   :  { %7016 = vmatpush1.msk.msra.mxu0 %vm32_vm0, %v7013_v16  ;;  %650 = vmatprep.mubr.f32.mxu0 %v7413_v5  ;;  %v7023_v20 = vld [vmem:[%s8853_s0 + $0x80] sm:$0x7f]  ;;  %v7028_v21 = vld [vmem:[%s8853_s0 + $0x90] sm:$0x7f]  ;;  %v7034_v22 = vld [vmem:[%s8853_s0 + $0xa8] sm:$0x7f] }
   0xf   :  { %7021 = vmatpush1.msk.msra.mxu1 %vm32_vm0, %v7018_v17  ;;  %741 = vmatprep.mubr.f32.mxu1 %v7413_v5  ;;  %v7039_v23 = vld [vmem:[%s8853_s0 + $0xb8] sm:$0x7f]  ;;  %v7033_v24 = vld [vmem:[%s8853_s0 + $0xa0] sm:$0x7f]  ;;  %v7038_v25 = vld [vmem:[%s8853_s0 + $0xb0] sm:$0x7f] }
  0x10   :  { %7017 = vmatmul.mubr.msk.f32.vlgmr.msra.gmra.mrb[6].mxu0 %vm29_vm1, %v7464_v4  ;;  %7022 = vmatmul.mubr.msk.f32.vlgmr.msra.gmra.mrb[6].mxu1 %vm29_vm1, %v7464_v4  ;;  %v7044_v26 = vld [vmem:[%s8853_s0 + $0xc8] sm:$0x7f]  ;;  %v7049_v27 = vld [vmem:[%s8853_s0 + $0xd8] sm:$0x7f]  ;;  %v7043_v28 = vld [vmem:[%s8853_s0 + $0xc0] sm:$0x7f] }
  0x11   :  { %7025 = vmatprep.subr.msk.mxu0 %vm32_vm0, %v7024_v18  ;;  %7030 = vmatprep.subr.msk.mxu1 %vm32_vm0, %v7029_v19  ;;  %v7048_v29 = vld [vmem:[%s8853_s0 + $0xd0] sm:$0x7f]  ;;  %v7054_v30 = vld [vmem:[%s8853_s0 + $0xe8] sm:$0x7f]  ;;  %v7059_v31 = vld [vmem:[%s8853_s0 + $0xf8] sm:$0x7f] }
  0x12   :  { %7026 = vmatpush1.msk.msra.mxu0 %vm32_vm0, %v7023_v20  ;;  %832 = vmatprep.mubr.f32.mxu0 %v7413_v5  ;;  %v7053_v32 = vld [vmem:[%s8853_s0 + $0xe0] sm:$0x7f]  ;;  %v7058_v33 = vld [vmem:[%s8853_s0 + $0xf0] sm:$0x7f]  ;;  %v7625_v34 = vld [vmem:[%s8855_s2 + $0x8] sm:$0x1f] }
  0x13   :  { %7031 = vmatpush1.msk.msra.mxu1 %vm32_vm0, %v7028_v21  ;;  %923 = vmatprep.mubr.f32.mxu1 %v7413_v5  ;;  %v7414_v35 = vmov 7   ;;  %s7415_s0 = smov 121   ;;  %v7640_v36 = vld [vmem:[%s8855_s2] sm:$0xff]  ;;  %vm1510_vm2 = vcmask 1045504   ;;  %v7416_v37 = vmov 1.0   ;;  %vm1505_vm3 = vcmask 48128  }
  0x14   :  { %7027 = vmatmul.mubr.msk.f32.vlgmr.msra.gmra.mrb[8].mxu0 %vm29_vm1, %v7464_v4  ;;  %7032 = vmatmul.mubr.msk.f32.vlgmr.msra.gmra.mrb[8].mxu1 %vm29_vm1, %v7464_v4  ;;  %v7417_v41 = vmov 13   ;;  %v7657_v43 = vshrl.u32 %v19_v42, 7  ;;  %v7679_v11 = vld [vmem:[%s8856_s3] sm:$0x3f] }
  0x15   :  { %7035 = vmatprep.subr.msk.mxu0 %vm32_vm0, %v7034_v22  ;;  %7040 = vmatprep.subr.msk.mxu1 %vm32_vm0, %v7039_v23 }
  0x16   :  { %7036 = vmatpush1.msk.msra.mxu0 %vm32_vm0, %v7033_v24  ;;  %1014 = vmatprep.mubr.f32.mxu0 %v7413_v5  ;;  %vm21_vm4 = vcmp.lt.s32.totalorder %v7657_v43, 6 }
  0x17   :  { %7041 = vmatpush1.msk.msra.mxu1 %vm32_vm0, %v7038_v25  ;;  %1105 = vmatprep.mubr.f32.mxu1 %v7413_v5 }
  0x18   :  { %7037 = vmatmul.mubr.msk.f32.vlgmr.msra.gmra.mrb[10].mxu0 %vm29_vm1, %v7464_v4  ;;  %7042 = vmatmul.mubr.msk.f32.vlgmr.msra.gmra.mrb[10].mxu1 %vm29_vm1, %v7464_v4 }
  0x19   :  { %7045 = vmatprep.subr.msk.mxu0 %vm32_vm0, %v7044_v26  ;;  %7050 = vmatprep.subr.msk.mxu1 %vm32_vm0, %v7049_v27 }
  0x1a   :  { %7046 = vmatpush1.msk.msra.mxu0 %vm32_vm0, %v7043_v28  ;;  %1196 = vmatprep.mubr.f32.mxu0 %v7413_v5 }
  0x1b   :  { %7051 = vmatpush1.msk.msra.mxu1 %vm32_vm0, %v7048_v29  ;;  %1287 = vmatprep.mubr.f32.mxu1 %v7413_v5 }
  0x1c   :  { %7047 = vmatmul.mubr.msk.f32.vlgmr.msra.gmra.mrb[12].mxu0 %vm29_vm1, %v7464_v4  ;;  %7052 = vmatmul.mubr.msk.f32.vlgmr.msra.gmra.mrb[12].mxu1 %vm29_vm1, %v7464_v4 }
  0x1d   :  { %7055 = vmatprep.subr.msk.mxu0 %vm32_vm0, %v7054_v30  ;;  %7060 = vmatprep.subr.msk.mxu1 %vm32_vm0, %v7059_v31 }
  0x1e   :  { %7056 = vmatpush1.msk.msra.mxu0 %vm32_vm0, %v7053_v32  ;;  %1378 = vmatprep.mubr.f32.mxu0 %v7413_v5 }
  0x1f   :  { %7061 = vmatpush1.msk.msra.mxu1 %vm32_vm0, %v7058_v33  ;;  %1469 = vmatprep.mubr.f32.mxu1 %v7413_v5 }
  0x20   :  { %7057 = vmatmul.mubr.msk.f32.vlgmr.msra.gmra.mrb[14].mxu0 %vm29_vm1, %v7464_v4  ;;  %7062 = vmatmul.mubr.msk.f32.vlgmr.msra.gmra.mrb[14].mxu1 %vm29_vm1, %v7464_v4 }
  0x21   :  { %7309 = vset.pattern.permute.xlu0 %v7414_v35  ;;  %1503 = vrot.lane.b32.xlu1 %v7625_v34, %s7415_s0 }
  0x22   :  { %26 = vperm.xlu0 %7309, %v7464_v4   ;;  %1578 = vmatprep.mubr.f32.mxu0 %v7413_v5 }
  0x23   :  { %1667 = vmatprep.mubr.f32.mxu1 %v7413_v5  ;;  %7063 = vmatprep.subr.msk.mxu0 %vm1510_vm2, %v7416_v37 }
  0x24   :  { %7064 = vmatpush1.msk.msra.mxu0 %vm1510_vm2, %v7416_v37  ;;  %7310 = vset.pattern.permute.xlu1 %v7417_v41 }
  0x25   :  { %1493 = vperm.xlu1 %7310, %v7640_v36  }
  0x26   :  { %1501 = vrot.lane.b32.xlu0 %v7640_v36, %s7415_s0 }
  0x27   :  { %7311 = vset.pattern.permute.xlu0 %v7417_v41 }
  0x29   :  { %3213 = vperm.xlu1 %7310, %v7679_v11  }
  0x2a   :  { %1498 = vperm.xlu0 %7311, %v7625_v34  }
  0x93   :  { %v1504_v40 = vpop.permute.xlu1 %1503 }
  0xa1   :  { %v7647_v38 = vpop.permute.xlu0 %26 }
  0xa5   :  { %v1502_v39 = vpop.permute.xlu0 %1501 }
  0xa6   :  { %7065 = vmatmul.mubr.msk.f32.vlgmr.msra.gmra.mrb[16].mxu0 %vm1505_vm3, %v1502_v39 }
  0xa7   :  { %1584 = vmatprep.mubr.f32.mxu0 %v7413_v5 }
  0xaa   :  { %7066 = vmatmul.mubr.msk.f32.gmra.mrb[18].mxu0 %vm1505_vm3, %v1504_v40 }
  0xab   :  { %1768 = vmatprep.mubr.f32.mxu0 %v7413_v5 }
  0xd7   :  { %v105_v44 = vpop.f32.mrb[0].mxu0  ;;  %v197_v45 = vpop.f32.mrb[0].mxu1 }
  0xd8   :  { %v106_v46 = vadd.f32 %v105_v44, %v7647_v38  ;;  %v198_v47 = vadd.f32 %v197_v45, %v7647_v38  ;;  %v107_v48 = vpop.f32.mrb[1].mxu0  ;;  %v199_v49 = vpop.f32.mrb[1].mxu1 }
  0xd9   :  { %v108_v50 = vadd.f32 %v107_v48, %v7647_v38  ;;  %v200_v51 = vadd.f32 %v199_v49, %v7647_v38 }
  0xda   :  { %vm110_vm5 = vcmp.ge.f32.partialorder %v106_v46, 0.0  ;;  %v112_v52 = vmul.f32 0.2, %v106_v46  ;;  %vm202_vm6 = vcmp.ge.f32.partialorder %v198_v47, 0.0  ;;  %v204_v53 = vmul.f32 0.2, %v198_v47 }
  0xdb   :  { %vm111_vm7 = vcmp.ge.f32.partialorder %v108_v50, 0.0  ;;  %v113_v54 = vmul.f32 0.2, %v108_v50  ;;  %vm203_vm8 = vcmp.ge.f32.partialorder %v200_v51, 0.0  ;;  %v205_v55 = vmul.f32 0.2, %v200_v51 }
  0xdc   :  { %v114_v56 = vsel %vm110_vm5, %v106_v46, %v112_v52  ;;  %v206_v57 = vsel %vm202_vm6, %v198_v47, %v204_v53  ;;  %v288_v58 = vpop.f32.mrb[2].mxu0  ;;  %v379_v59 = vpop.f32.mrb[2].mxu1 }
  0xdd   :  { %v118_v60 = vsel %vm21_vm4, %v114_v56, %v106_v46  ;;  %v208_v61 = vsel %vm21_vm4, %v206_v57, %v198_v47  ;;  %v115_v62 = vsel %vm111_vm7, %v108_v50, %v113_v54  ;;  %v207_v63 = vsel %vm203_vm8, %v200_v51, %v205_v55  ;;  %v290_v0 = vpop.f32.mrb[3].mxu0  ;;  %v381_v1 = vpop.f32.mrb[3].mxu1 }
  0xde   :  { %120 = vst [vmem:[#allocation2] sm:$0x7f] %v118_v60  ;;  %211 = vst [vmem:[#allocation2 + $0x10] sm:$0x7f] %v208_v61  ;;  %v119_v2 = vsel %vm21_vm4, %v115_v62, %v108_v50  ;;  %v209_v3 = vsel %vm21_vm4, %v207_v63, %v200_v51  ;;  %v289_v4 = vadd.f32 %v288_v58, %v7647_v38 }
  0xdf   :  { %v380_v6 = vadd.f32 %v379_v59, %v7647_v38  ;;  %121 = vst [vmem:[#allocation2 + $0x8] sm:$0x7f] %v119_v2  ;;  %212 = vst [vmem:[#allocation2 + $0x18] sm:$0x7f] %v209_v3  ;;  %v291_v7 = vadd.f32 %v290_v0, %v7647_v38  ;;  %v382_v8 = vadd.f32 %v381_v1, %v7647_v38  ;;  %v470_v9 = vpop.f32.mrb[4].mxu0  ;;  %v561_v10 = vpop.f32.mrb[4].mxu1 }
  0xe0   :  { %vm293_vm9 = vcmp.ge.f32.partialorder %v289_v4, 0.0  ;;  %v295_v12 = vmul.f32 0.2, %v289_v4  ;;  %v471_v18 = vadd.f32 %v470_v9, %v7647_v38  ;;  %v562_v19 = vadd.f32 %v561_v10, %v7647_v38  ;;  %v472_v20 = vpop.f32.mrb[5].mxu0  ;;  %v563_v21 = vpop.f32.mrb[5].mxu1 }
  0xe1   :  { %vm384_vm10 = vcmp.ge.f32.partialorder %v380_v6, 0.0  ;;  %v386_v13 = vmul.f32 0.2, %v380_v6  ;;  %vm294_vm11 = vcmp.ge.f32.partialorder %v291_v7, 0.0  ;;  %v296_v14 = vmul.f32 0.2, %v291_v7 }
  0xe2   :  { %vm385_vm12 = vcmp.ge.f32.partialorder %v382_v8, 0.0  ;;  %v387_v15 = vmul.f32 0.2, %v382_v8  ;;  %v297_v16 = vsel %vm293_vm9, %v289_v4, %v295_v12  ;;  %vm475_vm13 = vcmp.ge.f32.partialorder %v471_v18, 0.0 }
  0xe3   :  { %v388_v17 = vsel %vm384_vm10, %v380_v6, %v386_v13  ;;  %v299_v22 = vsel %vm21_vm4, %v297_v16, %v289_v4  ;;  %v298_v24 = vsel %vm294_vm11, %v291_v7, %v296_v14  ;;  %v652_v26 = vpop.f32.mrb[6].mxu0  ;;  %v743_v27 = vpop.f32.mrb[6].mxu1  ;;  %v477_v30 = vmul.f32 0.2, %v471_v18 }
  0xe4   :  { %v390_v23 = vsel %vm21_vm4, %v388_v17, %v380_v6  ;;  %v389_v25 = vsel %vm385_vm12, %v382_v8, %v387_v15  ;;  %302 = vst [vmem:[#allocation2 + $0x20] sm:$0x7f] %v299_v22  ;;  %v300_v28 = vsel %vm21_vm4, %v298_v24, %v291_v7  ;;  %v654_v31 = vpop.f32.mrb[7].mxu0  ;;  %v745_v32 = vpop.f32.mrb[7].mxu1  ;;  %vm566_vm14 = vcmp.ge.f32.partialorder %v562_v19, 0.0 }
  0xe5   :  { %393 = vst [vmem:[#allocation2 + $0x30] sm:$0x7f] %v390_v23  ;;  %v391_v29 = vsel %vm21_vm4, %v389_v25, %v382_v8  ;;  %303 = vst [vmem:[#allocation2 + $0x28] sm:$0x7f] %v300_v28  ;;  %v568_v33 = vmul.f32 0.2, %v562_v19  ;;  %v473_v35 = vadd.f32 %v472_v20, %v7647_v38  ;;  %v564_v37 = vadd.f32 %v563_v21, %v7647_v38 }
  0xe6   :  { %394 = vst [vmem:[#allocation2 + $0x38] sm:$0x7f] %v391_v29  ;;  %v7694_v39 = vld [vmem:[#allocation2] sm:$0x7f]  ;;  %v479_v40 = vsel %vm475_vm13, %v471_v18, %v477_v30  ;;  %v653_v42 = vadd.f32 %v652_v26, %v7647_v38  ;;  %v744_v44 = vadd.f32 %v743_v27, %v7647_v38  ;;  %v655_v45 = vadd.f32 %v654_v31, %v7647_v38  ;;  %v7699_v46 = vld [vmem:[#allocation2 + $0x8] sm:$0x7f] }
  0xe7   :  { %v1697_v47 = vld [vmem:[#allocation2 + $0x18] sm:$0x7f]  ;;  %v1696_v48 = vld [vmem:[#allocation2 + $0x10] sm:$0x7f]  ;;  %v481_v49 = vsel %vm21_vm4, %v479_v40, %v471_v18  ;;  %v570_v50 = vsel %vm566_vm14, %v562_v19, %v568_v33  ;;  %vm476_vm15 = vcmp.ge.f32.partialorder %v473_v35, 0.0  ;;  %v834_v52 = vpop.f32.mrb[8].mxu0  ;;  %7067 = vmatprep.subr.msk.mxu1 %vm32_vm0, %v7699_v46  ;;  %v746_v3 = vadd.f32 %v745_v32, %v7647_v38 }
  0xe8   :  { %v478_v51 = vmul.f32 0.2, %v473_v35  ;;  %v925_v53 = vpop.f32.mrb[8].mxu1  ;;  %7071 = vmatprep.subr.msk.mxu0 %vm32_vm0, %v1697_v47  ;;  %484 = vst [vmem:[#allocation2 + $0x40] sm:$0x7f] %v481_v49  ;;  %v572_v54 = vsel %vm21_vm4, %v570_v50, %v562_v19  ;;  %vm567_vm5 = vcmp.ge.f32.partialorder %v564_v37, 0.0  ;;  %7068 = vmatpush1.msk.msra.mxu1 %vm32_vm0, %v7694_v39  ;;  %v835_v12 = vadd.f32 %v834_v52, %v7647_v38 }
  0xe9   :  { %v569_v55 = vmul.f32 0.2, %v564_v37  ;;  %vm657_vm6 = vcmp.ge.f32.partialorder %v653_v42, 0.0  ;;  %v836_v56 = vpop.f32.mrb[9].mxu0  ;;  %v927_v57 = vpop.f32.mrb[9].mxu1  ;;  %7072 = vmatpush1.msk.msra.mxu0 %vm32_vm0, %v1696_v48  ;;  %vm748_vm7 = vcmp.ge.f32.partialorder %v744_v44, 0.0  ;;  %7069 = vmatmul.mubr.msk.f32.vlgmr.msra.gmra.mrb[16].mxu1 %vm29_vm1, %v7640_v36  ;;  %v926_v19 = vadd.f32 %v925_v53, %v7647_v38 }
  0xea   :  { %575 = vst [vmem:[#allocation2 + $0x50] sm:$0x7f] %v572_v54  ;;  %v480_v58 = vsel %vm476_vm15, %v473_v35, %v478_v51  ;;  %v659_v59 = vmul.f32 0.2, %v653_v42  ;;  %v750_v60 = vmul.f32 0.2, %v744_v44  ;;  %7073 = vmatmul.mubr.msk.f32.vlgmr.msra.gmra.mrb[20].mxu0 %vm29_vm1, %v7640_v36  ;;  %1673 = vmatprep.mubr.f32.mxu1 %v7413_v5  ;;  %v837_v22 = vadd.f32 %v836_v56, %v7647_v38 }
  0xeb   :  { %v482_v61 = vsel %vm21_vm4, %v480_v58, %v473_v35  ;;  %v571_v62 = vsel %vm567_vm5, %v564_v37, %v569_v55  ;;  %vm658_vm8 = vcmp.ge.f32.partialorder %v655_v45, 0.0  ;;  %v660_v63 = vmul.f32 0.2, %v655_v45  ;;  %1774 = vmatprep.mubr.f32.mxu0 %v7413_v5  ;;  %v1016_v4 = vpop.f32.mrb[10].mxu0  ;;  %v1107_v6 = vpop.f32.mrb[10].mxu1 }
  0xec   :  { %485 = vst [vmem:[#allocation2 + $0x48] sm:$0x7f] %v482_v61  ;;  %v573_v0 = vsel %vm21_vm4, %v571_v62, %v564_v37  ;;  %v661_v1 = vsel %vm657_vm6, %v653_v42, %v659_v59  ;;  %v752_v2 = vsel %vm748_vm7, %v744_v44, %v750_v60  ;;  %v7724_v7 = vld [vmem:[#allocation2 + $0x20] sm:$0x7f]  ;;  %v7731_v13 = vld [vmem:[#allocation2 + $0x28] sm:$0x7f]  ;;  %v928_v23 = vadd.f32 %v927_v57, %v7647_v38 }
  0xed   :  { %576 = vst [vmem:[#allocation2 + $0x58] sm:$0x7f] %v573_v0  ;;  %v663_v8 = vsel %vm21_vm4, %v661_v1, %v653_v42  ;;  %v754_v9 = vsel %vm21_vm4, %v752_v2, %v744_v44  ;;  %v662_v10 = vsel %vm658_vm8, %v655_v45, %v660_v63  ;;  %v1899_v14 = vld [vmem:[#allocation2 + $0x38] sm:$0x7f]  ;;  %v1018_v15 = vpop.f32.mrb[11].mxu0  ;;  %v1109_v16 = vpop.f32.mrb[11].mxu1  ;;  %7075 = vmatprep.subr.msk.mxu1 %vm32_vm0, %v7731_v13 }
  0xee   :  { %666 = vst [vmem:[#allocation2 + $0x60] sm:$0x7f] %v663_v8  ;;  %757 = vst [vmem:[#allocation2 + $0x70] sm:$0x7f] %v754_v9  ;;  %v664_v17 = vsel %vm21_vm4, %v662_v10, %v655_v45  ;;  %vm749_vm9 = vcmp.ge.f32.partialorder %v746_v3, 0.0  ;;  %7079 = vmatprep.subr.msk.mxu0 %vm32_vm0, %v1899_v14  ;;  %vm839_vm10 = vcmp.ge.f32.partialorder %v835_v12, 0.0  ;;  %7076 = vmatpush1.msk.msra.mxu1 %vm32_vm0, %v7724_v7 }
  0xef   :  { %v751_v18 = vmul.f32 0.2, %v746_v3  ;;  %v1898_v20 = vld [vmem:[#allocation2 + $0x30] sm:$0x7f]  ;;  %667 = vst [vmem:[#allocation2 + $0x68] sm:$0x7f] %v664_v17  ;;  %v1017_v26 = vadd.f32 %v1016_v4, %v7647_v38  ;;  %7070 = vmatmul.mubr.msk.f32.gmra.mrb[18].mxu1 %vm29_vm1, %v7625_v34  ;;  %7074 = vmatmul.mubr.msk.f32.gmra.mrb[22].mxu0 %vm29_vm1, %v7625_v34  ;;  %v1108_v50 = vadd.f32 %v1107_v6, %v7647_v38 }
  0xf0   :  { %v841_v21 = vmul.f32 0.2, %v835_v12  ;;  %7080 = vmatpush1.msk.msra.mxu0 %vm32_vm0, %v1898_v20  ;;  %vm930_vm11 = vcmp.ge.f32.partialorder %v926_v19, 0.0  ;;  %v932_v25 = vmul.f32 0.2, %v926_v19  ;;  %v1198_v27 = vpop.f32.mrb[12].mxu0  ;;  %1869 = vmatprep.mubr.f32.mxu1 %v7413_v5  ;;  %v1019_v51 = vadd.f32 %v1018_v15, %v7647_v38 }
  0xf1   :  { %v753_v24 = vsel %vm749_vm9, %v746_v3, %v751_v18  ;;  %v1289_v28 = vpop.f32.mrb[12].mxu1  ;;  %vm840_vm12 = vcmp.ge.f32.partialorder %v837_v22, 0.0  ;;  %v842_v31 = vmul.f32 0.2, %v837_v22  ;;  %v1200_v32 = vpop.f32.mrb[13].mxu0  ;;  %1970 = vmatprep.mubr.f32.mxu0 %v7413_v5  ;;  %vm931_vm13 = vcmp.ge.f32.partialorder %v928_v23, 0.0 }
  0xf2   :  { %v755_v29 = vsel %vm21_vm4, %v753_v24, %v746_v3  ;;  %v843_v30 = vsel %vm839_vm10, %v835_v12, %v841_v21  ;;  %v1291_v33 = vpop.f32.mrb[13].mxu1  ;;  %v934_v37 = vsel %vm930_vm11, %v926_v19, %v932_v25  ;;  %v933_v40 = vmul.f32 0.2, %v928_v23  ;;  %v7771_v59 = vld [vmem:[#allocation2 + $0x40] sm:$0x7f] }
  0xf3   :  { %758 = vst [vmem:[#allocation2 + $0x78] sm:$0x7f] %v755_v29  ;;  %v845_v35 = vsel %vm21_vm4, %v843_v30, %v835_v12  ;;  %v936_v42 = vsel %vm21_vm4, %v934_v37, %v926_v19  ;;  %v844_v44 = vsel %vm840_vm12, %v837_v22, %v842_v31  ;;  %vm1021_vm14 = vcmp.ge.f32.partialorder %v1017_v26, 0.0  ;;  %v7758_v47 = vld [vmem:[#allocation2 + $0x48] sm:$0x7f]  ;;  %v1380_v53 = vpop.f32.mrb[14].mxu0  ;;  %7077 = vmatmul.mubr.msk.f32.vlgmr.msra.gmra.mrb[20].mxu1 %vm29_vm1, %v7640_v36 }
  0xf4   :  { %848 = vst [vmem:[#allocation2 + $0x80] sm:$0x7f] %v845_v35  ;;  %v1023_v45 = vmul.f32 0.2, %v1017_v26  ;;  %939 = vst [vmem:[#allocation2 + $0x90] sm:$0x7f] %v936_v42  ;;  %v846_v48 = vsel %vm21_vm4, %v844_v44, %v837_v22  ;;  %v935_v49 = vsel %vm931_vm13, %v928_v23, %v933_v40  ;;  %7083 = vmatprep.subr.msk.mxu1 %vm32_vm0, %v7758_v47  ;;  %7081 = vmatmul.mubr.msk.f32.vlgmr.msra.gmra.mrb[24].mxu0 %vm29_vm1, %v7640_v36 }
  0xf5   :  { %v2101_v52 = vld [vmem:[#allocation2 + $0x58] sm:$0x7f]  ;;  %v1471_v54 = vpop.f32.mrb[14].mxu1  ;;  %849 = vst [vmem:[#allocation2 + $0x88] sm:$0x7f] %v846_v48  ;;  %v937_v55 = vsel %vm21_vm4, %v935_v49, %v928_v23  ;;  %v1110_v57 = vadd.f32 %v1109_v16, %v7647_v38  ;;  %v1199_v58 = vadd.f32 %v1198_v27, %v7647_v38  ;;  %v1382_v61 = vpop.f32.mrb[15].mxu0  ;;  %7084 = vmatpush1.msk.msra.mxu1 %vm32_vm0, %v7771_v59 }
  0xf6   :  { %v1025_v56 = vsel %vm1021_vm14, %v1017_v26, %v1023_v45  ;;  %7087 = vmatprep.subr.msk.mxu0 %vm32_vm0, %v2101_v52  ;;  %v2100_v60 = vld [vmem:[#allocation2 + $0x50] sm:$0x7f]  ;;  %v1473_v62 = vpop.f32.mrb[15].mxu1  ;;  %940 = vst [vmem:[#allocation2 + $0x98] sm:$0x7f] %v937_v55  ;;  %vm1112_vm15 = vcmp.ge.f32.partialorder %v1108_v50, 0.0  ;;  %v1290_v8 = vadd.f32 %v1289_v28, %v7647_v38  ;;  %v1201_v9 = vadd.f32 %v1200_v32, %v7647_v38 }
  0xf7   :  { %v1027_v63 = vsel %vm21_vm4, %v1025_v56, %v1017_v26  ;;  %v1114_v0 = vmul.f32 0.2, %v1108_v50  ;;  %vm1022_vm5 = vcmp.ge.f32.partialorder %v1019_v51, 0.0  ;;  %v7779_v1 = vld [vmem:[#allocation2 + $0x68] sm:$0x7f]  ;;  %vm1113_vm6 = vcmp.ge.f32.partialorder %v1110_v57, 0.0  ;;  %7088 = vmatpush1.msk.msra.mxu0 %vm32_vm0, %v2100_v60  ;;  %1875 = vmatprep.mubr.f32.mxu1 %v7413_v5 }
  0xf8   :  { %1030 = vst [vmem:[#allocation2 + $0xa0] sm:$0x7f] %v1027_v63  ;;  %v1024_v2 = vmul.f32 0.2, %v1019_v51  ;;  %v1115_v3 = vmul.f32 0.2, %v1110_v57  ;;  %7091 = vmatprep.subr.msk.mxu1 %vm32_vm0, %v7779_v1  ;;  %v1292_v15 = vadd.f32 %v1291_v33, %v7647_v38  ;;  %1976 = vmatprep.mubr.f32.mxu0 %v7413_v5  ;;  %v1381_v24 = vadd.f32 %v1380_v53, %v7647_v38 }
  0xf9   :  { %vm1203_vm7 = vcmp.ge.f32.partialorder %v1199_v58, 0.0  ;;  %v1116_v4 = vsel %vm1112_vm15, %v1108_v50, %v1114_v0  ;;  %v1205_v6 = vmul.f32 0.2, %v1199_v58  ;;  %vm1294_vm8 = vcmp.ge.f32.partialorder %v1290_v8, 0.0  ;;  %7078 = vmatmul.mubr.msk.f32.gmra.mrb[22].mxu1 %vm29_vm1, %v7625_v34  ;;  %7082 = vmatmul.mubr.msk.f32.gmra.mrb[26].mxu0 %vm29_vm1, %v7625_v34  ;;  %v7813_v30 = vld [vmem:[#allocation2 + $0x60] sm:$0x7f] }
  0xfa   :  { %v1118_v10 = vsel %vm21_vm4, %v1116_v4, %v1108_v50  ;;  %v1026_v12 = vsel %vm1022_vm5, %v1019_v51, %v1024_v2  ;;  %v1117_v14 = vsel %vm1113_vm6, %v1110_v57, %v1115_v3  ;;  %v2303_v16 = vld [vmem:[#allocation2 + $0x78] sm:$0x7f]  ;;  %v1296_v21 = vmul.f32 0.2, %v1290_v8  ;;  %2071 = vmatprep.mubr.f32.mxu1 %v7413_v5  ;;  %2172 = vmatprep.mubr.f32.mxu0 %v7413_v5  ;;  %v2302_v31 = vld [vmem:[#allocation2 + $0x70] sm:$0x7f] }
  0xfb   :  { %1121 = vst [vmem:[#allocation2 + $0xb0] sm:$0x7f] %v1118_v10  ;;  %v1028_v17 = vsel %vm21_vm4, %v1026_v12, %v1019_v51  ;;  %v1119_v18 = vsel %vm21_vm4, %v1117_v14, %v1110_v57  ;;  %v1207_v19 = vsel %vm1203_vm7, %v1199_v58, %v1205_v6  ;;  %7095 = vmatprep.subr.msk.mxu0 %vm32_vm0, %v2303_v16  ;;  %vm1204_vm9 = vcmp.ge.f32.partialorder %v1201_v9, 0.0  ;;  %v7854_v57 = vld [vmem:[#allocation2 + $0x80] sm:$0x7f] }
  0xfc   :  { %1031 = vst [vmem:[#allocation2 + $0xa8] sm:$0x7f] %v1028_v17  ;;  %1122 = vst [vmem:[#allocation2 + $0xb8] sm:$0x7f] %v1119_v18  ;;  %v1209_v20 = vsel %vm21_vm4, %v1207_v19, %v1199_v58  ;;  %v1206_v22 = vmul.f32 0.2, %v1201_v9  ;;  %v1472_v25 = vadd.f32 %v1471_v54, %v7647_v38  ;;  %v1298_v26 = vsel %vm1294_vm8, %v1290_v8, %v1296_v21 }
  0xfd   :  { %1212 = vst [vmem:[#allocation2 + $0xc0] sm:$0x7f] %v1209_v20  ;;  %vm1295_vm10 = vcmp.ge.f32.partialorder %v1292_v15, 0.0  ;;  %v1297_v23 = vmul.f32 0.2, %v1292_v15  ;;  %v1383_v28 = vadd.f32 %v1382_v61, %v7647_v38  ;;  %v1474_v29 = vadd.f32 %v1473_v62, %v7647_v38  ;;  %7085 = vmatmul.mubr.msk.f32.vlgmr.msra.gmra.mrb[24].mxu1 %vm29_vm1, %v7640_v36  ;;  %7089 = vmatmul.mubr.msk.f32.vlgmr.msra.gmra.mrb[28].mxu0 %vm29_vm1, %v7640_v36  ;;  %v1499_v20 = vpop.permute.xlu0 %1498 }
  0xfe   :  { %v1208_v27 = vsel %vm1204_vm9, %v1201_v9, %v1206_v22  ;;  %v1300_v32 = vsel %vm21_vm4, %v1298_v26, %v1290_v8  ;;  %vm1385_vm11 = vcmp.ge.f32.partialorder %v1381_v24, 0.0  ;;  %v7821_v37 = vld [vmem:[#allocation2 + $0x88] sm:$0x7f]  ;;  %v2505_v40 = vld [vmem:[#allocation2 + $0x98] sm:$0x7f]  ;;  %vm1476_vm12 = vcmp.ge.f32.partialorder %v1472_v25, 0.0  ;;  %7092 = vmatpush1.msk.msra.mxu1 %vm32_vm0, %v7813_v30  ;;  %7096 = vmatpush1.msk.msra.mxu0 %vm32_vm0, %v2302_v31 }
  0xff   :  { %v1210_v33 = vsel %vm21_vm4, %v1208_v27, %v1201_v9  ;;  %v1299_v35 = vsel %vm1295_vm10, %v1292_v15, %v1297_v23  ;;  %1303 = vst [vmem:[#allocation2 + $0xd0] sm:$0x7f] %v1300_v32  ;;  %v1387_v42 = vmul.f32 0.2, %v1381_v24  ;;  %v1478_v44 = vmul.f32 0.2, %v1472_v25  ;;  %7099 = vmatprep.subr.msk.mxu1 %vm32_vm0, %v7821_v37  ;;  %7103 = vmatprep.subr.msk.mxu0 %vm32_vm0, %v2505_v40 }
 0x100   :  { %1213 = vst [vmem:[#allocation2 + $0xc8] sm:$0x7f] %v1210_v33  ;;  %v1301_v38 = vsel %vm21_vm4, %v1299_v35, %v1292_v15  ;;  %vm1386_vm13 = vcmp.ge.f32.partialorder %v1383_v28, 0.0  ;;  %v1388_v45 = vmul.f32 0.2, %v1383_v28  ;;  %vm1477_vm14 = vcmp.ge.f32.partialorder %v1474_v29, 0.0  ;;  %2077 = vmatprep.mubr.f32.mxu1 %v7413_v5  ;;  %2178 = vmatprep.mubr.f32.mxu0 %v7413_v5 }
 0x101   :  { %1304 = vst [vmem:[#allocation2 + $0xd8] sm:$0x7f] %v1301_v38  ;;  %v1479_v48 = vmul.f32 0.2, %v1474_v29  ;;  %v1389_v49 = vsel %vm1385_vm11, %v1381_v24, %v1387_v42  ;;  %v1480_v50 = vsel %vm1476_vm12, %v1472_v25, %v1478_v44  ;;  %7086 = vmatmul.mubr.msk.f32.gmra.mrb[26].mxu1 %vm29_vm1, %v7625_v34  ;;  %7090 = vmatmul.mubr.msk.f32.gmra.mrb[30].mxu0 %vm29_vm1, %v7625_v34  ;;  %v2504_v58 = vld [vmem:[#allocation2 + $0x90] sm:$0x7f] }
 0x102   :  { %v1391_v51 = vsel %vm21_vm4, %v1389_v49, %v1381_v24  ;;  %v1482_v52 = vsel %vm21_vm4, %v1480_v50, %v1472_v25  ;;  %v1390_v53 = vsel %vm1386_vm13, %v1383_v28, %v1388_v45  ;;  %2273 = vmatprep.mubr.f32.mxu1 %v7413_v5  ;;  %2374 = vmatprep.mubr.f32.mxu0 %v7413_v5  ;;  %v7876_v62 = vld [vmem:[#allocation2 + $0xa0] sm:$0x7f]  ;;  %v2706_v63 = vld [vmem:[#allocation2 + $0xb0] sm:$0x7f] }
 0x103   :  { %v1481_v54 = vsel %vm1477_vm14, %v1474_v29, %v1479_v48  ;;  %1394 = vst [vmem:[#allocation2 + $0xe0] sm:$0x7f] %v1391_v51  ;;  %1485 = vst [vmem:[#allocation2 + $0xf0] sm:$0x7f] %v1482_v52  ;;  %v1392_v55 = vsel %vm21_vm4, %v1390_v53, %v1383_v28  ;;  %v7859_v60 = vld [vmem:[#allocation2 + $0xa8] sm:$0x7f] }
 0x104   :  { %v1483_v56 = vsel %vm21_vm4, %v1481_v54, %v1474_v29  ;;  %1395 = vst [vmem:[#allocation2 + $0xe8] sm:$0x7f] %v1392_v55  ;;  %v2707_v61 = vld [vmem:[#allocation2 + $0xb8] sm:$0x7f]  ;;  %v7898_v3 = vld [vmem:[#allocation2 + $0xc0] sm:$0x7f] }
 0x105   :  { %1486 = vst [vmem:[#allocation2 + $0xf8] sm:$0x7f] %v1483_v56  ;;  %7093 = vmatmul.mubr.msk.f32.vlgmr.msra.gmra.mrb[28].mxu1 %vm29_vm1, %v7640_v36  ;;  %7097 = vmatmul.mubr.msk.f32.vlgmr.msra.gmra.mrb[32].mxu0 %vm29_vm1, %v7640_v36 }
 0x106   :  { %7100 = vmatpush1.msk.msra.mxu1 %vm32_vm0, %v7854_v57  ;;  %7104 = vmatpush1.msk.msra.mxu0 %vm32_vm0, %v2504_v58  ;;  %v2908_v4 = vld [vmem:[#allocation2 + $0xd0] sm:$0x7f] }
 0x107   :  { %7107 = vmatprep.subr.msk.mxu1 %vm32_vm0, %v7859_v60  ;;  %7111 = vmatprep.subr.msk.mxu0 %vm32_vm0, %v2707_v61  ;;  %v7881_v0 = vld [vmem:[#allocation2 + $0xc8] sm:$0x7f] }
 0x108   :  { %2279 = vmatprep.mubr.f32.mxu1 %v7413_v5  ;;  %2380 = vmatprep.mubr.f32.mxu0 %v7413_v5  ;;  %v2909_v2 = vld [vmem:[#allocation2 + $0xd8] sm:$0x7f] }
 0x109   :  { %7094 = vmatmul.mubr.msk.f32.gmra.mrb[30].mxu1 %vm29_vm1, %v7625_v34  ;;  %7098 = vmatmul.mubr.msk.f32.gmra.mrb[34].mxu0 %vm29_vm1, %v7625_v34 }
 0x10a   :  { %2475 = vmatprep.mubr.f32.mxu1 %v7413_v5  ;;  %2576 = vmatprep.mubr.f32.mxu0 %v7413_v5  ;;  %v3009_v9 = vld [vmem:[#allocation2 + $0xe0] sm:$0x7f]  ;;  %v3110_v10 = vld [vmem:[#allocation2 + $0xf0] sm:$0x7f] }
 0x10b   :  { %v7903_v6 = vld [vmem:[#allocation2 + $0xe8] sm:$0x7f] }
 0x10c   :  { %v3111_v8 = vld [vmem:[#allocation2 + $0xf8] sm:$0x7f] }
 0x10d   :  { %7101 = vmatmul.mubr.msk.f32.vlgmr.msra.gmra.mrb[32].mxu1 %vm29_vm1, %v7640_v36  ;;  %7105 = vmatmul.mubr.msk.f32.vlgmr.msra.gmra.mrb[36].mxu0 %vm29_vm1, %v7640_v36 }
 0x10e   :  { %7108 = vmatpush1.msk.msra.mxu1 %vm32_vm0, %v7876_v62  ;;  %7112 = vmatpush1.msk.msra.mxu0 %vm32_vm0, %v2706_v63 }
 0x10f   :  { %7115 = vmatprep.subr.msk.mxu1 %vm32_vm0, %v7881_v0  ;;  %7119 = vmatprep.subr.msk.mxu0 %vm32_vm0, %v2909_v2 }
 0x110   :  { %2481 = vmatprep.mubr.f32.mxu1 %v7413_v5  ;;  %2582 = vmatprep.mubr.f32.mxu0 %v7413_v5 }
 0x111   :  { %7102 = vmatmul.mubr.msk.f32.gmra.mrb[34].mxu1 %vm29_vm1, %v7625_v34  ;;  %7106 = vmatmul.mubr.msk.f32.gmra.mrb[38].mxu0 %vm29_vm1, %v7625_v34 }
 0x112   :  { %2677 = vmatprep.mubr.f32.mxu1 %v7413_v5  ;;  %2778 = vmatprep.mubr.f32.mxu0 %v7413_v5 }
 0x115   :  { %7109 = vmatmul.mubr.msk.f32.vlgmr.msra.gmra.mrb[36].mxu1 %vm29_vm1, %v7640_v36  ;;  %7113 = vmatmul.mubr.msk.f32.vlgmr.msra.gmra.mrb[40].mxu0 %vm29_vm1, %v7640_v36 }
 0x116   :  { %7116 = vmatpush1.msk.msra.mxu1 %vm32_vm0, %v7898_v3  ;;  %7120 = vmatpush1.msk.msra.mxu0 %vm32_vm0, %v2908_v4 }
 0x117   :  { %7123 = vmatprep.subr.msk.mxu1 %vm32_vm0, %v7903_v6  ;;  %7127 = vmatprep.subr.msk.mxu0 %vm32_vm0, %v3111_v8 }
 0x118   :  { %2683 = vmatprep.mubr.f32.mxu1 %v7413_v5  ;;  %2784 = vmatprep.mubr.f32.mxu0 %v7413_v5 }
 0x119   :  { %7110 = vmatmul.mubr.msk.f32.gmra.mrb[38].mxu1 %vm29_vm1, %v7625_v34  ;;  %7114 = vmatmul.mubr.msk.f32.gmra.mrb[42].mxu0 %vm29_vm1, %v7625_v34 }
 0x11a   :  { %2879 = vmatprep.mubr.f32.mxu1 %v7413_v5  ;;  %2980 = vmatprep.mubr.f32.mxu0 %v7413_v5 }
 0x11d   :  { %7117 = vmatmul.mubr.msk.f32.vlgmr.msra.gmra.mrb[40].mxu1 %vm29_vm1, %v7640_v36  ;;  %7121 = vmatmul.mubr.msk.f32.vlgmr.msra.gmra.mrb[44].mxu0 %vm29_vm1, %v7640_v36 }
 0x11e   :  { %7124 = vmatpush1.msk.msra.mxu1 %vm32_vm0, %v3009_v9  ;;  %7128 = vmatpush1.msk.msra.mxu0 %vm32_vm0, %v3110_v10 }
 0x11f   :  { %7141 = vmatprep.subr.msk.mxu0 %vm32_vm0, %v7699_v46  ;;  %2885 = vmatprep.mubr.f32.mxu1 %v7413_v5 }
 0x120   :  { %2986 = vmatprep.mubr.f32.mxu0 %v7413_v5 }
 0x121   :  { %7118 = vmatmul.mubr.msk.f32.gmra.mrb[42].mxu1 %vm29_vm1, %v7625_v34  ;;  %7122 = vmatmul.mubr.msk.f32.gmra.mrb[46].mxu0 %vm29_vm1, %v7625_v34 }
 0x122   :  { %3081 = vmatprep.mubr.f32.mxu1 %v7413_v5  ;;  %3182 = vmatprep.mubr.f32.mxu0 %v7413_v5 }
 0x125   :  { %7125 = vmatmul.mubr.msk.f32.vlgmr.msra.gmra.mrb[44].mxu1 %vm29_vm1, %v7640_v36  ;;  %7129 = vmatmul.mubr.msk.f32.vlgmr.msra.gmra.mrb[48].mxu0 %vm29_vm1, %v7640_v36  ;;  %v7134_v36 = vld [vmem:[%s8855_s2 + $0x10] sm:$0xff] }
 0x126   :  { %7142 = vmatpush1.msk.msra.mxu0 %vm32_vm0, %v7694_v39  ;;  %3087 = vmatprep.mubr.f32.mxu1 %v7413_v5  ;;  %v7135_v39 = vld [vmem:[%s8855_s2 + $0x18] sm:$0x1f] }
 0x127   :  { %7149 = vmatprep.subr.msk.mxu0 %vm32_vm0, %v7731_v13  ;;  %3188 = vmatprep.mubr.f32.mxu0 %v7413_v5 }
 0x129   :  { %7126 = vmatmul.mubr.msk.f32.gmra.mrb[46].mxu1 %vm29_vm1, %v7625_v34  ;;  %7130 = vmatmul.mubr.msk.f32.gmra.mrb[50].mxu0 %vm29_vm1, %v7625_v34 }
 0x12a   :  { %3575 = vmatprep.mubr.f32.mxu0 %v7413_v5  ;;  %3290 = vmatprep.mubr.f32.mxu1 %v7413_v5 }
 0x12d   :  { %7143 = vmatmul.mubr.msk.f32.vlgmr.msra.gmra.mrb[52].mxu0 %vm29_vm1, %v7134_v36 }
 0x12e   :  { %7150 = vmatpush1.msk.msra.mxu0 %vm32_vm0, %v7724_v7  ;;  %3581 = vmatprep.mubr.f32.mxu0 %v7413_v5 }
 0x12f   :  { %7157 = vmatprep.subr.msk.mxu0 %vm32_vm0, %v7758_v47  ;;  %v7418_v47 = vmov 14  }
 0x130   :  { %7312 = vset.pattern.permute.xlu1 %v7418_v47 }
 0x131   :  { %7144 = vmatmul.mubr.msk.f32.gmra.mrb[54].mxu0 %vm29_vm1, %v7135_v39  ;;  %3382 = vperm.xlu1 %7312, %v7679_v11  }
 0x132   :  { %3761 = vmatprep.mubr.f32.mxu0 %v7413_v5 }
 0x135   :  { %7151 = vmatmul.mubr.msk.f32.vlgmr.msra.gmra.mrb[56].mxu0 %vm29_vm1, %v7134_v36  ;;  %3416 = vrot.lane.b32.xlu1 %v7134_v36, %s7415_s0 }
 0x136   :  { %7158 = vmatpush1.msk.msra.mxu0 %vm32_vm0, %v7771_v59  ;;  %3767 = vmatprep.mubr.f32.mxu0 %v7413_v5  ;;  %v7419_v59 = vmov 15  }
 0x137   :  { %7165 = vmatprep.subr.msk.mxu0 %vm32_vm0, %v7779_v1  ;;  %7313 = vset.pattern.permute.xlu0 %v7419_v59  ;;  %v1494_v1 = vpop.permute.xlu1 %1493 }
 0x138   :  { %3388 = vperm.xlu0 %7313, %v7679_v11   ;;  %7315 = vset.pattern.permute.xlu1 %v7417_v41 }
 0x139   :  { %7152 = vmatmul.mubr.msk.f32.gmra.mrb[58].mxu0 %vm29_vm1, %v7135_v39  ;;  %3418 = vrot.lane.b32.xlu1 %v7135_v39, %s7415_s0 }
 0x13a   :  { %3947 = vmatprep.mubr.f32.mxu0 %v7413_v5 }
 0x13c   :  { %7314 = vset.pattern.permute.xlu0 %v7417_v41 }
 0x13d   :  { %7159 = vmatmul.mubr.msk.f32.vlgmr.msra.gmra.mrb[60].mxu0 %vm29_vm1, %v7134_v36  ;;  %3408 = vperm.xlu0 %7314, %v7134_v36  }
 0x13e   :  { %7166 = vmatpush1.msk.msra.mxu0 %vm32_vm0, %v7813_v30  ;;  %3953 = vmatprep.mubr.f32.mxu0 %v7413_v5 }
 0x13f   :  { %7173 = vmatprep.subr.msk.mxu0 %vm32_vm0, %v7821_v37  ;;  %3413 = vperm.xlu1 %7315, %v7135_v39  }
 0x141   :  { %7160 = vmatmul.mubr.msk.f32.gmra.mrb[62].mxu0 %vm29_vm1, %v7135_v39  ;;  %7316 = vset.pattern.permute.xlu0 %v7418_v47 }
 0x142   :  { %4133 = vmatprep.mubr.f32.mxu0 %v7413_v5 }
 0x145   :  { %7167 = vmatmul.mubr.msk.f32.vlgmr.msra.gmra.mrb[64].mxu0 %vm29_vm1, %v7134_v36 }
 0x146   :  { %7174 = vmatpush1.msk.msra.mxu0 %vm32_vm0, %v7854_v57  ;;  %4139 = vmatprep.mubr.f32.mxu0 %v7413_v5 }
 0x147   :  { %7181 = vmatprep.subr.msk.mxu0 %vm32_vm0, %v7859_v60 }
 0x149   :  { %7168 = vmatmul.mubr.msk.f32.gmra.mrb[66].mxu0 %vm29_vm1, %v7135_v39 }
 0x14a   :  { %4319 = vmatprep.mubr.f32.mxu0 %v7413_v5 }
 0x14d   :  { %7175 = vmatmul.mubr.msk.f32.vlgmr.msra.gmra.mrb[68].mxu0 %vm29_vm1, %v7134_v36 }
 0x14e   :  { %7182 = vmatpush1.msk.msra.mxu0 %vm32_vm0, %v7876_v62  ;;  %4325 = vmatprep.mubr.f32.mxu0 %v7413_v5 }
 0x14f   :  { %7189 = vmatprep.subr.msk.mxu0 %vm32_vm0, %v7881_v0 }
 0x151   :  { %7176 = vmatmul.mubr.msk.f32.gmra.mrb[70].mxu0 %vm29_vm1, %v7135_v39 }
 0x152   :  { %4505 = vmatprep.mubr.f32.mxu0 %v7413_v5 }
 0x155   :  { %7183 = vmatmul.mubr.msk.f32.vlgmr.msra.gmra.mrb[72].mxu0 %vm29_vm1, %v7134_v36 }
 0x156   :  { %7190 = vmatpush1.msk.msra.mxu0 %vm32_vm0, %v7898_v3  ;;  %4511 = vmatprep.mubr.f32.mxu0 %v7413_v5 }
 0x157   :  { %7197 = vmatprep.subr.msk.mxu0 %vm32_vm0, %v7903_v6 }
 0x159   :  { %7184 = vmatmul.mubr.msk.f32.gmra.mrb[74].mxu0 %vm29_vm1, %v7135_v39 }
 0x15a   :  { %4691 = vmatprep.mubr.f32.mxu0 %v7413_v5 }
 0x15d   :  { %7191 = vmatmul.mubr.msk.f32.vlgmr.msra.gmra.mrb[76].mxu0 %vm29_vm1, %v7134_v36 }
 0x15e   :  { %7198 = vmatpush1.msk.msra.mxu0 %vm32_vm0, %v3009_v9  ;;  %4697 = vmatprep.mubr.f32.mxu0 %v7413_v5 }
 0x161   :  { %7192 = vmatmul.mubr.msk.f32.gmra.mrb[78].mxu0 %vm29_vm1, %v7135_v39 }
 0x162   :  { %4877 = vmatprep.mubr.f32.mxu0 %v7413_v5 }
 0x165   :  { %7199 = vmatmul.mubr.msk.f32.vlgmr.msra.gmra.mrb[80].mxu0 %vm29_vm1, %v7134_v36 }
 0x166   :  { %4883 = vmatprep.mubr.f32.mxu0 %v7413_v5 }
 0x169   :  { %7200 = vmatmul.mubr.msk.f32.gmra.mrb[82].mxu0 %vm29_vm1, %v7135_v39 }
 0x16a   :  { %5076 = vmatprep.mubr.f32.mxu0 %v7413_v5 }
 0x179   :  { %v1580_v34 = vpop.f32.mrb[16].mxu0 }
 0x17a   :  { %v1582_v46 = vpop.f32.mrb[17].mxu0  ;;  %v8020_v12 = vadd.f32 %v1580_v34, %v1494_v1 }
 0x17b   :  { %v8022_v14 = vadd.f32 %v1582_v46, %v1494_v1 }
 0x17d   :  { %v1586_v7 = vpop.f32.mrb[18].mxu0 }
 0x17e   :  { %v1588_v13 = vpop.f32.mrb[19].mxu0  ;;  %v8028_v27 = vadd.f32 %v1586_v7, %v1499_v20 }
 0x17f   :  { %v8030_v30 = vadd.f32 %v1588_v13, %v1499_v20 }
 0x1bc   :  { %v1669_v15 = vpop.f32.mrb[16].mxu1 }
 0x1bd   :  { %v1770_v16 = vpop.f32.mrb[20].mxu0  ;;  %v1670_v11 = vadd.f32 %v1669_v15, %v8020_v12  ;;  %v1671_v18 = vpop.f32.mrb[17].mxu1 }
 0x1be   :  { %v1771_v17 = vadd.f32 %v1770_v16, %v8020_v12  ;;  %v1772_v19 = vpop.f32.mrb[21].mxu0  ;;  %v1672_v21 = vadd.f32 %v1671_v18, %v8022_v14 }
 0x1bf   :  { %v1773_v22 = vadd.f32 %v1772_v19, %v8022_v14  ;;  %vm1680_vm4 = vcmp.ge.f32.partialorder %v1670_v11, 0.0  ;;  %v1684_v23 = vmul.f32 0.2, %v1670_v11 }
 0x1c0   :  { %vm1781_vm15 = vcmp.ge.f32.partialorder %v1771_v17, 0.0  ;;  %v1785_v24 = vmul.f32 0.2, %v1771_v17  ;;  %vm1681_vm5 = vcmp.ge.f32.partialorder %v1672_v21, 0.0  ;;  %v1685_v25 = vmul.f32 0.2, %v1672_v21 }
 0x1c1   :  { %vm1782_vm6 = vcmp.ge.f32.partialorder %v1773_v22, 0.0  ;;  %v1786_v26 = vmul.f32 0.2, %v1773_v22  ;;  %v1688_v28 = vsel %vm1680_vm4, %v1670_v11, %v1684_v23 }
 0x1c2   :  { %v1789_v29 = vsel %vm1781_vm15, %v1771_v17, %v1785_v24  ;;  %v1689_v32 = vsel %vm1681_vm5, %v1672_v21, %v1685_v25  ;;  %v1675_v35 = vpop.f32.mrb[18].mxu1  ;;  %v1776_v37 = vpop.f32.mrb[22].mxu0 }
 0x1c3   :  { %v1793_v31 = vadd.f32 %v1789_v29, %v1688_v28  ;;  %v1790_v33 = vsel %vm1782_vm6, %v1773_v22, %v1786_v26  ;;  %v1676_v38 = vadd.f32 %v1675_v35, %v8028_v27  ;;  %v1777_v42 = vadd.f32 %v1776_v37, %v8028_v27  ;;  %v1677_v44 = vpop.f32.mrb[19].mxu1  ;;  %v1778_v45 = vpop.f32.mrb[23].mxu0 }
 0x1c4   :  { %v1794_v40 = vadd.f32 %v1790_v33, %v1689_v32  ;;  %v1678_v48 = vadd.f32 %v1677_v44, %v8030_v30  ;;  %v1779_v49 = vadd.f32 %v1778_v45, %v8030_v30 }
 0x1c5   :  { %vm1682_vm7 = vcmp.ge.f32.partialorder %v1676_v38, 0.0  ;;  %v1686_v50 = vmul.f32 0.2, %v1676_v38  ;;  %vm1783_vm8 = vcmp.ge.f32.partialorder %v1777_v42, 0.0  ;;  %v1787_v51 = vmul.f32 0.2, %v1777_v42 }
 0x1c6   :  { %vm1683_vm9 = vcmp.ge.f32.partialorder %v1678_v48, 0.0  ;;  %v1687_v52 = vmul.f32 0.2, %v1678_v48  ;;  %vm1784_vm10 = vcmp.ge.f32.partialorder %v1779_v49, 0.0  ;;  %v1788_v53 = vmul.f32 0.2, %v1779_v49 }
 0x1c7   :  { %v1690_v54 = vsel %vm1682_vm7, %v1676_v38, %v1686_v50  ;;  %v1791_v55 = vsel %vm1783_vm8, %v1777_v42, %v1787_v51  ;;  %v1871_v60 = vpop.f32.mrb[20].mxu1  ;;  %v1972_v61 = vpop.f32.mrb[24].mxu0 }
 0x1c8   :  { %v1795_v56 = vadd.f32 %v1791_v55, %v1690_v54  ;;  %v1691_v57 = vsel %vm1683_vm9, %v1678_v48, %v1687_v52  ;;  %v1792_v58 = vsel %vm1784_vm10, %v1779_v49, %v1788_v53  ;;  %v1872_v63 = vadd.f32 %v1871_v60, %v8020_v12  ;;  %v1873_v2 = vpop.f32.mrb[21].mxu1  ;;  %v1974_v3 = vpop.f32.mrb[25].mxu0 }
 0x1c9   :  { %v1796_v62 = vadd.f32 %v1792_v58, %v1691_v57  ;;  %v1973_v0 = vadd.f32 %v1972_v61, %v8020_v12  ;;  %v1874_v4 = vadd.f32 %v1873_v2, %v8022_v14  ;;  %v1975_v6 = vadd.f32 %v1974_v3, %v8022_v14 }
 0x1ca   :  { %vm1882_vm11 = vcmp.ge.f32.partialorder %v1872_v63, 0.0  ;;  %v1886_v8 = vmul.f32 0.2, %v1872_v63 }
 0x1cb   :  { %vm1983_vm12 = vcmp.ge.f32.partialorder %v1973_v0, 0.0  ;;  %v1987_v9 = vmul.f32 0.2, %v1973_v0  ;;  %vm1883_vm13 = vcmp.ge.f32.partialorder %v1874_v4, 0.0  ;;  %v1887_v10 = vmul.f32 0.2, %v1874_v4 }
 0x1cc   :  { %v1988_v36 = vmul.f32 0.2, %v1975_v6  ;;  %v1890_v39 = vsel %vm1882_vm11, %v1872_v63, %v1886_v8  ;;  %vm1984_vm14 = vcmp.ge.f32.partialorder %v1975_v6, 0.0  ;;  %v1877_v34 = vpop.f32.mrb[22].mxu1  ;;  %v1978_v46 = vpop.f32.mrb[26].mxu0 }
 0x1cd   :  { %v1894_v7 = vadd.f32 %v1890_v39, %v1793_v31  ;;  %v1991_v13 = vsel %vm1983_vm12, %v1973_v0, %v1987_v9  ;;  %v1891_v1 = vsel %vm1883_vm13, %v1874_v4, %v1887_v10  ;;  %v1878_v15 = vadd.f32 %v1877_v34, %v8028_v27  ;;  %v1879_v16 = vpop.f32.mrb[23].mxu1  ;;  %v1980_v11 = vpop.f32.mrb[27].mxu0 }
 0x1ce   :  { %v1895_v17 = vadd.f32 %v1891_v1, %v1794_v40  ;;  %v1979_v18 = vadd.f32 %v1978_v46, %v8028_v27  ;;  %v1880_v19 = vadd.f32 %v1879_v16, %v8030_v30  ;;  %v1981_v20 = vadd.f32 %v1980_v11, %v8030_v30 }
 0x1cf   :  { %v1995_v21 = vadd.f32 %v1991_v13, %v1894_v7  ;;  %v1992_v22 = vsel %vm1984_vm14, %v1975_v6, %v1988_v36  ;;  %vm1884_vm4 = vcmp.ge.f32.partialorder %v1878_v15, 0.0  ;;  %v1888_v23 = vmul.f32 0.2, %v1878_v15 }
 0x1d0   :  { %v2073_v24 = vpop.f32.mrb[24].mxu1  ;;  %v1996_v25 = vadd.f32 %v1992_v22, %v1895_v17  ;;  %vm1985_vm15 = vcmp.ge.f32.partialorder %v1979_v18, 0.0  ;;  %v1989_v26 = vmul.f32 0.2, %v1979_v18  ;;  %vm1885_vm5 = vcmp.ge.f32.partialorder %v1880_v19, 0.0  ;;  %v2174_v28 = vpop.f32.mrb[28].mxu0 }
 0x1d1   :  { %v2075_v29 = vpop.f32.mrb[25].mxu1  ;;  %v1892_v31 = vsel %vm1884_vm4, %v1878_v15, %v1888_v23  ;;  %v1889_v32 = vmul.f32 0.2, %v1880_v19  ;;  %vm1986_vm6 = vcmp.ge.f32.partialorder %v1981_v20, 0.0  ;;  %v1990_v33 = vmul.f32 0.2, %v1981_v20 }
 0x1d2   :  { %v2176_v35 = vpop.f32.mrb[29].mxu0  ;;  %v1896_v37 = vadd.f32 %v1892_v31, %v1795_v56  ;;  %v1993_v40 = vsel %vm1985_vm15, %v1979_v18, %v1989_v26  ;;  %v2074_v38 = vadd.f32 %v2073_v24, %v8020_v12  ;;  %v2175_v42 = vadd.f32 %v2174_v28, %v8020_v12 }
 0x1d3   :  { %v1893_v44 = vsel %vm1885_vm5, %v1880_v19, %v1889_v32  ;;  %v1994_v45 = vsel %vm1986_vm6, %v1981_v20, %v1990_v33  ;;  %v2076_v48 = vadd.f32 %v2075_v29, %v8022_v14  ;;  %v2177_v49 = vadd.f32 %v2176_v35, %v8022_v14 }
 0x1d4   :  { %v1997_v50 = vadd.f32 %v1993_v40, %v1896_v37  ;;  %v1897_v51 = vadd.f32 %v1893_v44, %v1796_v62  ;;  %vm2084_vm7 = vcmp.ge.f32.partialorder %v2074_v38, 0.0  ;;  %v2088_v52 = vmul.f32 0.2, %v2074_v38  ;;  %v2079_v53 = vpop.f32.mrb[26].mxu1  ;;  %v2180_v54 = vpop.f32.mrb[30].mxu0 }
 0x1d5   :  { %vm2185_vm8 = vcmp.ge.f32.partialorder %v2175_v42, 0.0  ;;  %v2189_v55 = vmul.f32 0.2, %v2175_v42  ;;  %vm2085_vm9 = vcmp.ge.f32.partialorder %v2076_v48, 0.0  ;;  %v2089_v56 = vmul.f32 0.2, %v2076_v48 }
 0x1d6   :  { %v1998_v57 = vadd.f32 %v1994_v45, %v1897_v51  ;;  %v2092_v58 = vsel %vm2084_vm7, %v2074_v38, %v2088_v52  ;;  %vm2186_vm10 = vcmp.ge.f32.partialorder %v2177_v49, 0.0  ;;  %v2190_v60 = vmul.f32 0.2, %v2177_v49  ;;  %v2081_v61 = vpop.f32.mrb[27].mxu1  ;;  %v2182_v63 = vpop.f32.mrb[31].mxu0 }
 0x1d7   :  { %v2096_v0 = vadd.f32 %v2092_v58, %v1995_v21  ;;  %v2193_v2 = vsel %vm2185_vm8, %v2175_v42, %v2189_v55  ;;  %v2093_v3 = vsel %vm2085_vm9, %v2076_v48, %v2089_v56  ;;  %v2080_v4 = vadd.f32 %v2079_v53, %v8028_v27 }
 0x1d8   :  { %v2097_v62 = vadd.f32 %v2093_v3, %v1996_v25  ;;  %v2194_v6 = vsel %vm2186_vm10, %v2177_v49, %v2190_v60  ;;  %v2181_v8 = vadd.f32 %v2180_v54, %v8028_v27  ;;  %v2082_v9 = vadd.f32 %v2081_v61, %v8030_v30  ;;  %v2275_v10 = vpop.f32.mrb[28].mxu1  ;;  %v2376_v36 = vpop.f32.mrb[32].mxu0 }
 0x1d9   :  { %v2197_v39 = vadd.f32 %v2193_v2, %v2096_v0  ;;  %vm2086_vm11 = vcmp.ge.f32.partialorder %v2080_v4, 0.0  ;;  %v2090_v34 = vmul.f32 0.2, %v2080_v4  ;;  %v2183_v46 = vadd.f32 %v2182_v63, %v8030_v30  ;;  %v2277_v7 = vpop.f32.mrb[29].mxu1  ;;  %v2378_v13 = vpop.f32.mrb[33].mxu0 }
 0x1da   :  { %v2198_v1 = vadd.f32 %v2194_v6, %v2097_v62  ;;  %vm2187_vm12 = vcmp.ge.f32.partialorder %v2181_v8, 0.0  ;;  %v2191_v15 = vmul.f32 0.2, %v2181_v8  ;;  %vm2087_vm13 = vcmp.ge.f32.partialorder %v2082_v9, 0.0 }
 0x1db   :  { %v2094_v16 = vsel %vm2086_vm11, %v2080_v4, %v2090_v34  ;;  %v2091_v11 = vmul.f32 0.2, %v2082_v9  ;;  %vm2188_vm14 = vcmp.ge.f32.partialorder %v2183_v46, 0.0  ;;  %v2192_v17 = vmul.f32 0.2, %v2183_v46 }
 0x1dc   :  { %v2098_v18 = vadd.f32 %v2094_v16, %v1997_v50  ;;  %v2195_v19 = vsel %vm2187_vm12, %v2181_v8, %v2191_v15  ;;  %v2276_v20 = vadd.f32 %v2275_v10, %v8020_v12  ;;  %v2377_v21 = vadd.f32 %v2376_v36, %v8020_v12  ;;  %v2281_v22 = vpop.f32.mrb[30].mxu1  ;;  %v2382_v23 = vpop.f32.mrb[34].mxu0 }
 0x1dd   :  { %v2095_v24 = vsel %vm2087_vm13, %v2082_v9, %v2091_v11  ;;  %v2196_v25 = vsel %vm2188_vm14, %v2183_v46, %v2192_v17  ;;  %v2278_v26 = vadd.f32 %v2277_v7, %v8022_v14  ;;  %v2379_v28 = vadd.f32 %v2378_v13, %v8022_v14  ;;  %v2283_v29 = vpop.f32.mrb[31].mxu1  ;;  %v2384_v31 = vpop.f32.mrb[35].mxu0 }
 0x1de   :  { %v2199_v32 = vadd.f32 %v2195_v19, %v2098_v18  ;;  %v2099_v33 = vadd.f32 %v2095_v24, %v1998_v57  ;;  %vm2286_vm4 = vcmp.ge.f32.partialorder %v2276_v20, 0.0  ;;  %v2290_v35 = vmul.f32 0.2, %v2276_v20 }
 0x1df   :  { %vm2387_vm15 = vcmp.ge.f32.partialorder %v2377_v21, 0.0  ;;  %v2391_v37 = vmul.f32 0.2, %v2377_v21  ;;  %vm2287_vm5 = vcmp.ge.f32.partialorder %v2278_v26, 0.0  ;;  %v2291_v40 = vmul.f32 0.2, %v2278_v26 }
 0x1e0   :  { %v2200_v38 = vadd.f32 %v2196_v25, %v2099_v33  ;;  %v2294_v42 = vsel %vm2286_vm4, %v2276_v20, %v2290_v35  ;;  %vm2388_vm6 = vcmp.ge.f32.partialorder %v2379_v28, 0.0  ;;  %v2392_v44 = vmul.f32 0.2, %v2379_v28  ;;  %v2477_v45 = vpop.f32.mrb[32].mxu1  ;;  %v2578_v48 = vpop.f32.mrb[36].mxu0 }
 0x1e1   :  { %v2298_v49 = vadd.f32 %v2294_v42, %v2197_v39  ;;  %v2395_v50 = vsel %vm2387_vm15, %v2377_v21, %v2391_v37  ;;  %v2295_v51 = vsel %vm2287_vm5, %v2278_v26, %v2291_v40  ;;  %v2282_v52 = vadd.f32 %v2281_v22, %v8028_v27  ;;  %v2479_v53 = vpop.f32.mrb[33].mxu1  ;;  %v2580_v54 = vpop.f32.mrb[37].mxu0 }
 0x1e2   :  { %v2299_v55 = vadd.f32 %v2295_v51, %v2198_v1  ;;  %v2396_v56 = vsel %vm2388_vm6, %v2379_v28, %v2392_v44  ;;  %v2383_v57 = vadd.f32 %v2382_v23, %v8028_v27  ;;  %v2284_v58 = vadd.f32 %v2283_v29, %v8030_v30 }
 0x1e3   :  { %v2399_v60 = vadd.f32 %v2395_v50, %v2298_v49  ;;  %vm2288_vm7 = vcmp.ge.f32.partialorder %v2282_v52, 0.0  ;;  %v2292_v61 = vmul.f32 0.2, %v2282_v52  ;;  %v2385_v63 = vadd.f32 %v2384_v31, %v8030_v30 }
 0x1e4   :  { %v2400_v0 = vadd.f32 %v2396_v56, %v2299_v55  ;;  %vm2389_vm8 = vcmp.ge.f32.partialorder %v2383_v57, 0.0  ;;  %v2393_v2 = vmul.f32 0.2, %v2383_v57  ;;  %vm2289_vm9 = vcmp.ge.f32.partialorder %v2284_v58, 0.0  ;;  %v2483_v3 = vpop.f32.mrb[34].mxu1  ;;  %v2584_v4 = vpop.f32.mrb[38].mxu0 }
 0x1e5   :  { %v2296_v62 = vsel %vm2288_vm7, %v2282_v52, %v2292_v61  ;;  %v2293_v6 = vmul.f32 0.2, %v2284_v58  ;;  %vm2390_vm10 = vcmp.ge.f32.partialorder %v2385_v63, 0.0  ;;  %v2394_v8 = vmul.f32 0.2, %v2385_v63  ;;  %v2485_v9 = vpop.f32.mrb[35].mxu1 }
 0x1e6   :  { %v2300_v10 = vadd.f32 %v2296_v62, %v2199_v32  ;;  %v2397_v36 = vsel %vm2389_vm8, %v2383_v57, %v2393_v2  ;;  %v2478_v39 = vadd.f32 %v2477_v45, %v8020_v12  ;;  %v2579_v34 = vadd.f32 %v2578_v48, %v8020_v12  ;;  %v2586_v46 = vpop.f32.mrb[39].mxu0 }
 0x1e7   :  { %v2297_v7 = vsel %vm2289_vm9, %v2284_v58, %v2293_v6  ;;  %v2398_v13 = vsel %vm2390_vm10, %v2385_v63, %v2394_v8  ;;  %v2480_v1 = vadd.f32 %v2479_v53, %v8022_v14  ;;  %v2581_v15 = vadd.f32 %v2580_v54, %v8022_v14 }
 0x1e8   :  { %v2401_v16 = vadd.f32 %v2397_v36, %v2300_v10  ;;  %v2301_v11 = vadd.f32 %v2297_v7, %v2200_v38  ;;  %vm2488_vm11 = vcmp.ge.f32.partialorder %v2478_v39, 0.0  ;;  %v2492_v17 = vmul.f32 0.2, %v2478_v39  ;;  %v2679_v18 = vpop.f32.mrb[36].mxu1  ;;  %v2780_v19 = vpop.f32.mrb[40].mxu0 }
 0x1e9   :  { %vm2589_vm12 = vcmp.ge.f32.partialorder %v2579_v34, 0.0  ;;  %v2593_v20 = vmul.f32 0.2, %v2579_v34  ;;  %vm2489_vm13 = vcmp.ge.f32.partialorder %v2480_v1, 0.0  ;;  %v2493_v21 = vmul.f32 0.2, %v2480_v1 }
 0x1ea   :  { %v2402_v22 = vadd.f32 %v2398_v13, %v2301_v11  ;;  %v2496_v23 = vsel %vm2488_vm11, %v2478_v39, %v2492_v17  ;;  %vm2590_vm14 = vcmp.ge.f32.partialorder %v2581_v15, 0.0  ;;  %v2594_v24 = vmul.f32 0.2, %v2581_v15  ;;  %v2681_v25 = vpop.f32.mrb[37].mxu1  ;;  %v2782_v26 = vpop.f32.mrb[41].mxu0 }
 0x1eb   :  { %v2500_v28 = vadd.f32 %v2496_v23, %v2399_v60  ;;  %v2597_v29 = vsel %vm2589_vm12, %v2579_v34, %v2593_v20  ;;  %v2497_v31 = vsel %vm2489_vm13, %v2480_v1, %v2493_v21  ;;  %v2484_v32 = vadd.f32 %v2483_v3, %v8028_v27 }
 0x1ec   :  { %v2501_v33 = vadd.f32 %v2497_v31, %v2400_v0  ;;  %v2598_v35 = vsel %vm2590_vm14, %v2581_v15, %v2594_v24  ;;  %v2585_v37 = vadd.f32 %v2584_v4, %v8028_v27  ;;  %v2486_v40 = vadd.f32 %v2485_v9, %v8030_v30  ;;  %v2685_v38 = vpop.f32.mrb[38].mxu1  ;;  %v2786_v42 = vpop.f32.mrb[42].mxu0 }
 0x1ed   :  { %v2601_v44 = vadd.f32 %v2597_v29, %v2500_v28  ;;  %vm2490_vm4 = vcmp.ge.f32.partialorder %v2484_v32, 0.0  ;;  %v2494_v45 = vmul.f32 0.2, %v2484_v32  ;;  %v2587_v48 = vadd.f32 %v2586_v46, %v8030_v30  ;;  %v2687_v49 = vpop.f32.mrb[39].mxu1  ;;  %v2788_v50 = vpop.f32.mrb[43].mxu0 }
 0x1ee   :  { %v2602_v51 = vadd.f32 %v2598_v35, %v2501_v33  ;;  %vm2591_vm15 = vcmp.ge.f32.partialorder %v2585_v37, 0.0  ;;  %v2595_v52 = vmul.f32 0.2, %v2585_v37  ;;  %vm2491_vm5 = vcmp.ge.f32.partialorder %v2486_v40, 0.0 }
 0x1ef   :  { %v2498_v53 = vsel %vm2490_vm4, %v2484_v32, %v2494_v45  ;;  %v2495_v54 = vmul.f32 0.2, %v2486_v40  ;;  %vm2592_vm6 = vcmp.ge.f32.partialorder %v2587_v48, 0.0  ;;  %v2596_v55 = vmul.f32 0.2, %v2587_v48 }
 0x1f0   :  { %v2502_v56 = vadd.f32 %v2498_v53, %v2401_v16  ;;  %v2599_v57 = vsel %vm2591_vm15, %v2585_v37, %v2595_v52  ;;  %v2680_v58 = vadd.f32 %v2679_v18, %v8020_v12  ;;  %v2781_v60 = vadd.f32 %v2780_v19, %v8020_v12  ;;  %v2881_v61 = vpop.f32.mrb[40].mxu1  ;;  %v2982_v63 = vpop.f32.mrb[44].mxu0 }
 0x1f1   :  { %v2499_v0 = vsel %vm2491_vm5, %v2486_v40, %v2495_v54  ;;  %v2600_v2 = vsel %vm2592_vm6, %v2587_v48, %v2596_v55  ;;  %v2682_v3 = vadd.f32 %v2681_v25, %v8022_v14  ;;  %v2783_v4 = vadd.f32 %v2782_v26, %v8022_v14  ;;  %v2883_v62 = vpop.f32.mrb[41].mxu1  ;;  %v2984_v6 = vpop.f32.mrb[45].mxu0 }
 0x1f2   :  { %v2603_v8 = vadd.f32 %v2599_v57, %v2502_v56  ;;  %v2503_v9 = vadd.f32 %v2499_v0, %v2402_v22  ;;  %vm2690_vm7 = vcmp.ge.f32.partialorder %v2680_v58, 0.0  ;;  %v2694_v10 = vmul.f32 0.2, %v2680_v58 }
 0x1f3   :  { %vm2791_vm8 = vcmp.ge.f32.partialorder %v2781_v60, 0.0  ;;  %v2795_v36 = vmul.f32 0.2, %v2781_v60  ;;  %vm2691_vm9 = vcmp.ge.f32.partialorder %v2682_v3, 0.0  ;;  %v2695_v39 = vmul.f32 0.2, %v2682_v3 }
 0x1f4   :  { %v2604_v34 = vadd.f32 %v2600_v2, %v2503_v9  ;;  %v2698_v46 = vsel %vm2690_vm7, %v2680_v58, %v2694_v10  ;;  %vm2792_vm10 = vcmp.ge.f32.partialorder %v2783_v4, 0.0  ;;  %v2796_v7 = vmul.f32 0.2, %v2783_v4  ;;  %v2887_v13 = vpop.f32.mrb[42].mxu1  ;;  %v2988_v1 = vpop.f32.mrb[46].mxu0 }
 0x1f5   :  { %v2702_v15 = vadd.f32 %v2698_v46, %v2601_v44  ;;  %v2799_v16 = vsel %vm2791_vm8, %v2781_v60, %v2795_v36  ;;  %v2699_v11 = vsel %vm2691_vm9, %v2682_v3, %v2695_v39  ;;  %v2686_v17 = vadd.f32 %v2685_v38, %v8028_v27  ;;  %v2889_v18 = vpop.f32.mrb[43].mxu1  ;;  %v2990_v19 = vpop.f32.mrb[47].mxu0 }
 0x1f6   :  { %v2703_v20 = vadd.f32 %v2699_v11, %v2602_v51  ;;  %v2800_v21 = vsel %vm2792_vm10, %v2783_v4, %v2796_v7  ;;  %v2787_v22 = vadd.f32 %v2786_v42, %v8028_v27  ;;  %v2688_v23 = vadd.f32 %v2687_v49, %v8030_v30 }
 0x1f7   :  { %v2803_v24 = vadd.f32 %v2799_v16, %v2702_v15  ;;  %vm2692_vm11 = vcmp.ge.f32.partialorder %v2686_v17, 0.0  ;;  %v2696_v25 = vmul.f32 0.2, %v2686_v17  ;;  %v2789_v26 = vadd.f32 %v2788_v50, %v8030_v30 }
 0x1f8   :  { %v2804_v28 = vadd.f32 %v2800_v21, %v2703_v20  ;;  %vm2793_vm12 = vcmp.ge.f32.partialorder %v2787_v22, 0.0  ;;  %v2797_v29 = vmul.f32 0.2, %v2787_v22  ;;  %vm2693_vm13 = vcmp.ge.f32.partialorder %v2688_v23, 0.0  ;;  %v3083_v31 = vpop.f32.mrb[44].mxu1  ;;  %v3184_v32 = vpop.f32.mrb[48].mxu0 }
 0x1f9   :  { %v2700_v33 = vsel %vm2692_vm11, %v2686_v17, %v2696_v25  ;;  %v2697_v35 = vmul.f32 0.2, %v2688_v23  ;;  %vm2794_vm14 = vcmp.ge.f32.partialorder %v2789_v26, 0.0  ;;  %v2798_v37 = vmul.f32 0.2, %v2789_v26  ;;  %v3085_v40 = vpop.f32.mrb[45].mxu1 }
 0x1fa   :  { %v2704_v38 = vadd.f32 %v2700_v33, %v2603_v8  ;;  %v2801_v42 = vsel %vm2793_vm12, %v2787_v22, %v2797_v29  ;;  %v2882_v44 = vadd.f32 %v2881_v61, %v8020_v12  ;;  %v2983_v45 = vadd.f32 %v2982_v63, %v8020_v12  ;;  %v3186_v48 = vpop.f32.mrb[49].mxu0 }
 0x1fb   :  { %v2701_v49 = vsel %vm2693_vm13, %v2688_v23, %v2697_v35  ;;  %v2802_v50 = vsel %vm2794_vm14, %v2789_v26, %v2798_v37  ;;  %v2884_v51 = vadd.f32 %v2883_v62, %v8022_v14  ;;  %v2985_v52 = vadd.f32 %v2984_v6, %v8022_v14 }
 0x1fc   :  { %v2805_v53 = vadd.f32 %v2801_v42, %v2704_v38  ;;  %v2705_v54 = vadd.f32 %v2701_v49, %v2604_v34  ;;  %vm2892_vm4 = vcmp.ge.f32.partialorder %v2882_v44, 0.0  ;;  %v2896_v55 = vmul.f32 0.2, %v2882_v44  ;;  %v3089_v56 = vpop.f32.mrb[46].mxu1  ;;  %v3190_v57 = vpop.f32.mrb[50].mxu0 }
 0x1fd   :  { %vm2993_vm15 = vcmp.ge.f32.partialorder %v2983_v45, 0.0  ;;  %v2997_v58 = vmul.f32 0.2, %v2983_v45  ;;  %vm2893_vm5 = vcmp.ge.f32.partialorder %v2884_v51, 0.0  ;;  %v2897_v60 = vmul.f32 0.2, %v2884_v51 }
 0x1fe   :  { %v2806_v61 = vadd.f32 %v2802_v50, %v2705_v54  ;;  %v2900_v0 = vsel %vm2892_vm4, %v2882_v44, %v2896_v55  ;;  %vm2994_vm6 = vcmp.ge.f32.partialorder %v2985_v52, 0.0  ;;  %v2998_v63 = vmul.f32 0.2, %v2985_v52  ;;  %v3091_v2 = vpop.f32.mrb[47].mxu1  ;;  %v3192_v3 = vpop.f32.mrb[51].mxu0 }
 0x1ff   :  { %v2904_v4 = vadd.f32 %v2900_v0, %v2803_v24  ;;  %v3001_v62 = vsel %vm2993_vm15, %v2983_v45, %v2997_v58  ;;  %v2901_v8 = vsel %vm2893_vm5, %v2884_v51, %v2897_v60  ;;  %v2888_v6 = vadd.f32 %v2887_v13, %v8028_v27 }
 0x200   :  { %v2905_v9 = vadd.f32 %v2901_v8, %v2804_v28  ;;  %v3002_v10 = vsel %vm2994_vm6, %v2985_v52, %v2998_v63  ;;  %v2989_v36 = vadd.f32 %v2988_v1, %v8028_v27  ;;  %v2890_v39 = vadd.f32 %v2889_v18, %v8030_v30 }
 0x201   :  { %v3005_v34 = vadd.f32 %v3001_v62, %v2904_v4  ;;  %vm2894_vm7 = vcmp.ge.f32.partialorder %v2888_v6, 0.0  ;;  %v2898_v46 = vmul.f32 0.2, %v2888_v6  ;;  %v2991_v7 = vadd.f32 %v2990_v19, %v8030_v30  ;;  %v3214_v4 = vpop.permute.xlu1 %3213 }
 0x202   :  { %v3006_v15 = vadd.f32 %v3002_v10, %v2905_v9  ;;  %vm2995_vm8 = vcmp.ge.f32.partialorder %v2989_v36, 0.0  ;;  %v2999_v16 = vmul.f32 0.2, %v2989_v36  ;;  %vm2895_vm9 = vcmp.ge.f32.partialorder %v2890_v39, 0.0 }
 0x203   :  { %v2902_v11 = vsel %vm2894_vm7, %v2888_v6, %v2898_v46  ;;  %v2899_v17 = vmul.f32 0.2, %v2890_v39  ;;  %vm2996_vm10 = vcmp.ge.f32.partialorder %v2991_v7, 0.0  ;;  %v3000_v20 = vmul.f32 0.2, %v2991_v7 }
 0x204   :  { %v2906_v13 = vadd.f32 %v2902_v11, %v2805_v53  ;;  %v3003_v21 = vsel %vm2995_vm8, %v2989_v36, %v2999_v16  ;;  %v3084_v22 = vadd.f32 %v3083_v31, %v8020_v12  ;;  %v3185_v1 = vadd.f32 %v3184_v32, %v8020_v12 }
 0x205   :  { %v2903_v18 = vsel %vm2895_vm9, %v2890_v39, %v2899_v17  ;;  %v3004_v23 = vsel %vm2996_vm10, %v2991_v7, %v3000_v20  ;;  %v3086_v24 = vadd.f32 %v3085_v40, %v8022_v14  ;;  %v3187_v19 = vadd.f32 %v3186_v48, %v8022_v14 }
 0x206   :  { %v3007_v25 = vadd.f32 %v3003_v21, %v2906_v13  ;;  %v2907_v26 = vadd.f32 %v2903_v18, %v2806_v61  ;;  %vm3094_vm11 = vcmp.ge.f32.partialorder %v3084_v22, 0.0  ;;  %v3098_v28 = vmul.f32 0.2, %v3084_v22 }
 0x207   :  { %vm3195_vm12 = vcmp.ge.f32.partialorder %v3185_v1, 0.0  ;;  %v3199_v29 = vmul.f32 0.2, %v3185_v1  ;;  %vm3095_vm13 = vcmp.ge.f32.partialorder %v3086_v24, 0.0  ;;  %v3099_v33 = vmul.f32 0.2, %v3086_v24 }
 0x208   :  { %v3008_v35 = vadd.f32 %v3004_v23, %v2907_v26  ;;  %v3102_v37 = vsel %vm3094_vm11, %v3084_v22, %v3098_v28  ;;  %vm3196_vm14 = vcmp.ge.f32.partialorder %v3187_v19, 0.0  ;;  %v3200_v31 = vmul.f32 0.2, %v3187_v19 }
 0x209   :  { %v3106_v38 = vadd.f32 %v3102_v37, %v3005_v34  ;;  %v3203_v12 = vsel %vm3195_vm12, %v3185_v1, %v3199_v29  ;;  %v3103_v32 = vsel %vm3095_vm13, %v3086_v24, %v3099_v33  ;;  %v3090_v42 = vadd.f32 %v3089_v56, %v8028_v27 }
 0x20a   :  { %v3107_v40 = vadd.f32 %v3103_v32, %v3006_v15  ;;  %v3204_v44 = vsel %vm3196_vm14, %v3187_v19, %v3200_v31  ;;  %v3191_v14 = vadd.f32 %v3190_v57, %v8028_v27  ;;  %v3092_v45 = vadd.f32 %v3091_v2, %v8030_v30 }
 0x20b   :  { %v3207_v48 = vadd.f32 %v3203_v12, %v3106_v38  ;;  %vm3096_vm4 = vcmp.ge.f32.partialorder %v3090_v42, 0.0  ;;  %v3100_v49 = vmul.f32 0.2, %v3090_v42  ;;  %v3193_v50 = vadd.f32 %v3192_v3, %v8030_v30  ;;  %v7334_v3 = vld [vmem:[%s8856_s3] sm:$0x3f] }
 0x20c   :  { %v3208_v51 = vadd.f32 %v3204_v44, %v3107_v40  ;;  %vm3197_vm15 = vcmp.ge.f32.partialorder %v3191_v14, 0.0  ;;  %v3201_v52 = vmul.f32 0.2, %v3191_v14  ;;  %vm3097_vm5 = vcmp.ge.f32.partialorder %v3092_v45, 0.0 }
 0x20d   :  { %v3104_v53 = vsel %vm3096_vm4, %v3090_v42, %v3100_v49  ;;  %v3101_v54 = vmul.f32 0.2, %v3092_v45  ;;  %v3202_v55 = vmul.f32 0.2, %v3193_v50  ;;  %vm3198_vm6 = vcmp.ge.f32.partialorder %v3193_v50, 0.0 }
 0x20e   :  { %v3108_v58 = vadd.f32 %v3104_v53, %v3007_v25  ;;  %v3205_v56 = vsel %vm3197_vm15, %v3191_v14, %v3201_v52  ;;  %vm3219_vm7 = vcmask 1044480   ;;  %vm7420_vm8 = vmmov 1  }
 0x20f   :  { %v3105_v60 = vsel %vm3097_vm5, %v3092_v45, %v3101_v54  ;;  %v3206_v57 = vsel %vm3198_vm6, %v3193_v50, %v3202_v55  ;;  %vm8092_vm9 = vmpackc.low %vm3219_vm7, %vm7420_vm8  ;;  %vm3216_vm10 = vcmask 105472   ;;  %vm1487_vm11 = vcmp.lt.s32.totalorder %v7657_v43, 3 }
 0x210   :  { %v3209_v61 = vadd.f32 %v3205_v56, %v3108_v58  ;;  %v3109_v27 = vadd.f32 %v3105_v60, %v3008_v35 }
 0x212   :  { %v7285_v0 = vpack.c.bf16 %v3209_v61, %v3207_v48  ;;  %v3210_v63 = vadd.f32 %v3206_v57, %v3109_v27 }
 0x214   :  { %v7282_v2 = vpack.c.bf16 %v3210_v63, %v3208_v51 }
 0x216   :  { %7284 = vmatprep.subr.msk.bf16.mxu1 %vm8092_vm9, %v7282_v2 }
 0x217   :  { %7287 = vmatpush1.bf16.msk.msra.mxu1 %vm8092_vm9, %v7285_v0 }
 0x21a   :  { %7133 = vmatmul.mubr.msk.f32.vlgmr.msra.gmra.mrb[48].mxu1 %vm3216_vm10, %v7334_v3 }
 0x21b   :  { %3494 = vmatprep.mubr.f32.mxu1 %v7413_v5 }
 0x2ed   :  { %v3292_v62 = vpop.f32.mrb[48].mxu1 }
 0x2ee   :  { %v3293_v8 = vadd.f32 %v3292_v62, %v3214_v4  ;;  %v3294_v6 = vpop.f32.mrb[49].mxu1 }
 0x2ef   :  { %v3295_v9 = vadd.f32 %v3294_v6, %v3214_v4 }
 0x2f0   :  { %v3297_v10 = vsel %vm1510_vm2, %v3293_v8, 0.0  ;;  %v3313_v36 = vsel %vm1487_vm11, %v3293_v8, 0.0 }
 0x2f1   :  { %v3298_v39 = vrot.slane %v3297_v10, 4  ;;  %v3315_v34 = vsel %vm1510_vm2, %v3313_v36, 0.0  ;;  %v3304_v46 = vsel %vm1510_vm2, %v3295_v9, 0.0  ;;  %v3314_v7 = vsel %vm1487_vm11, %v3295_v9, 0.0 }
 0x2f2   :  { %v3316_v15 = vrot.slane %v3315_v34, 4  ;;  %v3305_v16 = vrot.slane %v3304_v46, 4  ;;  %v3322_v11 = vsel %vm1510_vm2, %v3314_v7, 0.0 }
 0x2f3   :  { %v3299_v17 = vadd.f32 %v3298_v39, %v3297_v10  ;;  %v3323_v20 = vrot.slane %v3322_v11, 4 }
 0x2f4   :  { %v3317_v13 = vadd.f32 %v3316_v15, %v3315_v34  ;;  %v3306_v21 = vadd.f32 %v3305_v16, %v3304_v46 }
 0x2f5   :  { %v3300_v22 = vrot.slane %v3299_v17, 2  ;;  %v3324_v1 = vadd.f32 %v3323_v20, %v3322_v11 }
 0x2f6   :  { %v3318_v18 = vrot.slane %v3317_v13, 2  ;;  %v3307_v23 = vrot.slane %v3306_v21, 2 }
 0x2f7   :  { %v3301_v24 = vadd.f32 %v3300_v22, %v3299_v17  ;;  %v3325_v19 = vrot.slane %v3324_v1, 2 }
 0x2f8   :  { %v3319_v25 = vadd.f32 %v3318_v18, %v3317_v13  ;;  %v3308_v26 = vadd.f32 %v3307_v23, %v3306_v21 }
 0x2f9   :  { %v3302_v28 = vrot.slane %v3301_v24, 1  ;;  %v3326_v29 = vadd.f32 %v3325_v19, %v3324_v1 }
 0x2fa   :  { %v3320_v33 = vrot.slane %v3319_v25, 1  ;;  %v3309_v35 = vrot.slane %v3308_v26, 1 }
 0x2fb   :  { %v3303_v37 = vadd.f32 %v3302_v28, %v3301_v24  ;;  %v3327_v31 = vrot.slane %v3326_v29, 1  ;;  %v3383_v28 = vpop.permute.xlu1 %3382 }
 0x2fc   :  { %v3321_v38 = vadd.f32 %v3320_v33, %v3319_v25  ;;  %v3310_v12 = vadd.f32 %v3309_v35, %v3308_v26 }
 0x2fd   :  { %v3328_v32 = vadd.f32 %v3327_v31, %v3326_v29 }
 0x2fe   :  { %v3329_v42 = vsub.f32 %v3303_v37, %v3321_v38  ;;  %v3389_v37 = vpop.permute.xlu0 %3388 }
 0x2ff   :  { %v3330_v40 = vsub.f32 %v3310_v12, %v3328_v32 }
 0x300   :  { %v3331_v44 = vsel %vm1487_vm11, %v3321_v38, %v3329_v42 }
 0x301   :  { %v3333_v14 = vmul.f32 0.33333334, %v3331_v44  ;;  %v3332_v45 = vsel %vm1487_vm11, %v3328_v32, %v3330_v40  ;;  %v7136_v44 = vld [vmem:[%s8856_s3 + $0x8] sm:$0x3f] }
 0x302   :  { %v3334_v48 = vmul.f32 0.33333334, %v3332_v45  ;;  %5001 = vperm.xlu1 %7315, %v7136_v44   ;;  %5166 = vperm.xlu0 %7316, %v7136_v44  }
 0x303   :  { %v3335_v49 = vsub.f32 %v3293_v8, %v3333_v14  ;;  %v8133_v14 = vpop.f32.mrb[52].mxu0 }
 0x304   :  { %v3336_v50 = vsub.f32 %v3295_v9, %v3334_v48  ;;  %v8135_v48 = vpop.f32.mrb[53].mxu0 }
 0x305   :  { %v3337_v51 = vmul.f32 %v3335_v49, %v3335_v49 }
 0x306   :  { %v3338_v52 = vmul.f32 %v3336_v50, %v3336_v50  ;;  %7317 = vset.pattern.permute.xlu1 %v7419_v59  ;;  %7319 = vset.pattern.permute.xlu0 %v7417_v41 }
 0x307   :  { %v3339_v53 = vsel %vm1510_vm2, %v3337_v51, 0.0  ;;  %v3353_v54 = vsel %vm1487_vm11, %v3337_v51, 0.0  ;;  %v8137_v51 = vpop.f32.mrb[54].mxu0  ;;  %5172 = vperm.xlu1 %7317, %v7136_v44  }
 0x308   :  { %v3340_v55 = vrot.slane %v3339_v53, 4  ;;  %v3355_v58 = vsel %vm1510_vm2, %v3353_v54, 0.0  ;;  %v3346_v56 = vsel %vm1510_vm2, %v3338_v52, 0.0  ;;  %v3354_v60 = vsel %vm1487_vm11, %v3338_v52, 0.0 }
 0x309   :  { %v3356_v61 = vrot.slane %v3355_v58, 4  ;;  %v3347_v27 = vrot.slane %v3346_v56, 4  ;;  %v3362_v57 = vsel %vm1510_vm2, %v3354_v60, 0.0  ;;  %v7335_v60 = vld [vmem:[#allocation2 + $0x18] sm:$0x7f] }
 0x30a   :  { %v3341_v0 = vadd.f32 %v3340_v55, %v3339_v53  ;;  %v3363_v63 = vrot.slane %v3362_v57, 4  ;;  %v8141_v53 = vpop.f32.mrb[55].mxu0 }
 0x30b   :  { %v3357_v2 = vadd.f32 %v3356_v61, %v3355_v58  ;;  %v3348_v3 = vadd.f32 %v3347_v27, %v3346_v56  ;;  %v8145_v55 = vpop.f32.mrb[56].mxu0  ;;  %v7336_v27 = vld [vmem:[#allocation2 + $0x10] sm:$0x7f]  ;;  %7318 = vset.pattern.permute.xlu1 %v7417_v41 }
 0x30c   :  { %v3342_v4 = vrot.slane %v3341_v0, 2  ;;  %v3364_v62 = vadd.f32 %v3363_v63, %v3362_v57  ;;  %v8149_v58 = vpop.f32.mrb[57].mxu0 }
 0x30d   :  { %v3358_v8 = vrot.slane %v3357_v2, 2  ;;  %v3349_v6 = vrot.slane %v3348_v3, 2  ;;  %v8154_v56 = vpop.f32.mrb[58].mxu0 }
 0x30e   :  { %v3343_v9 = vadd.f32 %v3342_v4, %v3341_v0  ;;  %v3365_v10 = vrot.slane %v3364_v62, 2  ;;  %v8158_v61 = vpop.f32.mrb[59].mxu0  ;;  %v8165_v0 = vld [vmem:[%s8855_s2 + $0x28] sm:$0x1f] }
 0x30f   :  { %v3359_v36 = vadd.f32 %v3358_v8, %v3357_v2  ;;  %v3350_v39 = vadd.f32 %v3349_v6, %v3348_v3  ;;  %v8167_v63 = vpop.f32.mrb[60].mxu0  ;;  %v7337_v2 = vld [vmem:[#allocation2 + $0x38] sm:$0x7f]  ;;  %v8173_v3 = vld [vmem:[%s8855_s2 + $0x20] sm:$0xff]  ;;  %5202 = vrot.lane.b32.xlu0 %v8165_v0, %s7415_s0 }
 0x310   :  { %v3344_v34 = vrot.slane %v3343_v9, 1  ;;  %v3366_v46 = vadd.f32 %v3365_v10, %v3364_v62  ;;  %v8175_v4 = vpop.f32.mrb[61].mxu0  ;;  %5200 = vrot.lane.b32.xlu1 %v8173_v3, %s7415_s0 }
 0x311   :  { %v3360_v7 = vrot.slane %v3359_v36, 1  ;;  %v3351_v15 = vrot.slane %v3350_v39, 1  ;;  %v8179_v62 = vpop.f32.mrb[62].mxu0 }
 0x312   :  { %v3345_v16 = vadd.f32 %v3344_v34, %v3343_v9  ;;  %v3367_v11 = vrot.slane %v3366_v46, 1  ;;  %v8185_v8 = vpop.f32.mrb[63].mxu0 }
 0x313   :  { %v3361_v17 = vadd.f32 %v3360_v7, %v3359_v36  ;;  %v3352_v20 = vadd.f32 %v3351_v15, %v3350_v39  ;;  %v8189_v6 = vpop.f32.mrb[64].mxu0  ;;  %5197 = vperm.xlu0 %7319, %v8165_v0   ;;  %v8200_v36 = vld [vmem:[%s8855_s2 + $0x10] sm:$0xff] }
 0x314   :  { %v3368_v13 = vadd.f32 %v3367_v11, %v3366_v46  ;;  %v8191_v9 = vpop.f32.mrb[65].mxu0  ;;  %5192 = vperm.xlu1 %7318, %v8173_v3   ;;  %v7339_v39 = vld [vmem:[#allocation2 + $0x30] sm:$0x7f]  ;;  %v7340_v46 = vld [vmem:[#allocation2 + $0x58] sm:$0x7f] }
 0x315   :  { %v3369_v21 = vsub.f32 %v3345_v16, %v3361_v17  ;;  %v8194_v10 = vpop.f32.mrb[66].mxu0  ;;  %v8219_v16 = vld [vmem:[%s8855_s2 + $0x18] sm:$0x1f] }
 0x316   :  { %v3370_v22 = vsub.f32 %v3352_v20, %v3368_v13  ;;  %v8204_v41 = vpop.f32.mrb[67].mxu0 }
 0x317   :  { %v3371_v1 = vsel %vm1487_vm11, %v3361_v17, %v3369_v21  ;;  %v8208_v34 = vpop.f32.mrb[68].mxu0  ;;  %7321 = vset.pattern.permute.xlu0 %v7419_v59  ;;  %v7342_v21 = vld [vmem:[#allocation2 + $0x50] sm:$0x7f] }
 0x318   :  { %v3372_v18 = vsel %vm1487_vm11, %v3368_v13, %v3370_v22  ;;  %v3373_v23 = vmul.f32 0.33333334, %v3371_v1  ;;  %v8211_v7 = vpop.f32.mrb[69].mxu0  ;;  %v7343_v1 = vld [vmem:[#allocation2 + $0x78] sm:$0x7f] }
 0x319   :  { %v3374_v24 = vmul.f32 0.33333334, %v3372_v18  ;;  %v8214_v15 = vpop.f32.mrb[70].mxu0 }
 0x31a   :  { %v3375_v19 = vadd.f32 1e-05, %v3373_v23  ;;  %v8223_v11 = vpop.f32.mrb[71].mxu0  ;;  %v7344_v23 = vld [vmem:[#allocation2 + $0x70] sm:$0x7f] }
 0x31b   :  { %v3376_v25 = vadd.f32 1e-05, %v3374_v24  ;;  %v8226_v17 = vpop.f32.mrb[72].mxu0  ;;  %v7345_v24 = vld [vmem:[#allocation2 + $0x98] sm:$0x7f] }
 0x31c   :  { %7322 = vrsqrt.f32 %v3375_v19  ;;  %v8228_v20 = vpop.f32.mrb[73].mxu0  ;;  %v7346_v19 = vld [vmem:[#allocation2 + $0x90] sm:$0x7f] }
 0x31d   :  { %7324 = vrsqrt.f32 %v3376_v25  ;;  %v8230_v13 = vpop.f32.mrb[74].mxu0  ;;  %v7347_v25 = vld [vmem:[#allocation2 + $0xb8] sm:$0x7f] }
 0x31e   :  { %v8234_v59 = vpop.f32.mrb[75].mxu0 }
 0x31f   :  { %v8238_v22 = vpop.f32.mrb[76].mxu0 }
 0x320   :  { %v8241_v18 = vpop.f32.mrb[77].mxu0 }
 0x321   :  { %v8309_v44 = vpop.f32.mrb[78].mxu0 }
 0x326   :  { %v7323_v26 = vpop.eup %7322 }
 0x327   :  { %v7325_v29 = vpop.eup %7324  ;;  %v3379_v33 = vmul.f32 %v7323_v26, %v3335_v49  ;;  %v7348_v26 = vld [vmem:[#allocation2 + $0xb0] sm:$0x7f] }
 0x328   :  { %v3380_v35 = vmul.f32 %v7325_v29, %v3336_v50  ;;  %v3417_v50 = vpop.permute.xlu1 %3416  ;;  %v7350_v29 = vld [vmem:[#allocation2 + $0xd0] sm:$0x7f] }
 0x329   :  { %v3385_v31 = vmul.f32 %v3383_v28, %v3379_v33  ;;  %v7351_v33 = vld [vmem:[#allocation2 + $0xf8] sm:$0x7f] }
 0x32a   :  { %v3386_v38 = vmul.f32 %v3383_v28, %v3380_v35  ;;  %v7349_v28 = vld [vmem:[#allocation2 + $0xd8] sm:$0x7f]  ;;  %v7352_v35 = vld [vmem:[#allocation2 + $0xf0] sm:$0x7f] }
 0x32b   :  { %v3391_v12 = vadd.f32 %v3389_v37, %v3385_v31  ;;  %v7354_v31 = vld [vmem:[#allocation2] sm:$0x7f] }
 0x32c   :  { %v3392_v32 = vadd.f32 %v3389_v37, %v3386_v38  ;;  %v3419_v57 = vpop.permute.xlu1 %3418  ;;  %v7353_v37 = vld [vmem:[#allocation2 + $0x8] sm:$0x7f] }
 0x32d   :  { %vm3393_vm12 = vcmp.ge.f32.partialorder %v3391_v12, 0.0  ;;  %v3395_v42 = vmul.f32 0.2, %v3391_v12  ;;  %v7355_v38 = vld [vmem:[#allocation2 + $0x28] sm:$0x7f] }
 0x32e   :  { %vm3394_vm13 = vcmp.ge.f32.partialorder %v3392_v32, 0.0  ;;  %v3396_v40 = vmul.f32 0.2, %v3392_v32 }
 0x32f   :  { %v3397_v45 = vsel %vm3393_vm12, %v3391_v12, %v3395_v42  ;;  %v7356_v12 = vld [vmem:[#allocation2 + $0x20] sm:$0x7f] }
 0x330   :  { %v3398_v49 = vsel %vm3394_vm13, %v3392_v32, %v3396_v40  ;;  %v8143_v54 = vadd.f32 1.0, %v3397_v45  ;;  %v7357_v32 = vld [vmem:[#allocation2 + $0x48] sm:$0x7f]  ;;  %v7358_v42 = vld [vmem:[#allocation2 + $0x40] sm:$0x7f]  ;;  %v8312_v45 = vpop.f32.mrb[79].mxu0 }
 0x331   :  { %v8139_v52 = vadd.f32 1.0, %v3398_v49  ;;  %v7359_v40 = vld [vmem:[#allocation2 + $0x68] sm:$0x7f]  ;;  %v4879_v49 = vpop.f32.mrb[80].mxu0 }
 0x333   :  { %7137 = vmatprep.subr.msk.mxu1 %vm1510_vm2, %v8139_v52 }
 0x334   :  { %7138 = vmatpush1.msk.msra.mxu1 %vm1510_vm2, %v8143_v54 }
 0x335   :  { %7139 = vmatmul.mubr.msk.f32.vlgmr.msra.gmra.mrb[50].mxu1 %vm1505_vm3, %v3417_v50  ;;  %7145 = vmatprep.subr.msk.mxu1 %vm32_vm0, %v7335_v60  ;;  %v4881_v50 = vpop.f32.mrb[81].mxu0  ;;  %v7360_v60 = vld [vmem:[#allocation2 + $0x60] sm:$0x7f] }
 0x336   :  { %7146 = vmatpush1.msk.msra.mxu1 %vm32_vm0, %v7336_v27  ;;  %3500 = vmatprep.mubr.f32.mxu1 %v7413_v5  ;;  %v7361_v27 = vld [vmem:[#allocation2 + $0x88] sm:$0x7f] }
 0x337   :  { %7153 = vmatprep.subr.msk.mxu1 %vm32_vm0, %v7337_v2 }
 0x339   :  { %7140 = vmatmul.mubr.msk.f32.gmra.mrb[52].mxu1 %vm1505_vm3, %v3419_v57  ;;  %v4885_v57 = vpop.f32.mrb[82].mxu0 }
 0x33a   :  { %3668 = vmatprep.mubr.f32.mxu1 %v7413_v5  ;;  %v8319_v2 = vpop.f32.mrb[83].mxu0 }
 0x33d   :  { %7147 = vmatmul.mubr.msk.f32.vlgmr.msra.gmra.mrb[54].mxu1 %vm29_vm1, %v8200_v36 }
 0x33e   :  { %7154 = vmatpush1.msk.msra.mxu1 %vm32_vm0, %v7339_v39  ;;  %3674 = vmatprep.mubr.f32.mxu1 %v7413_v5  ;;  %v7363_v39 = vld [vmem:[#allocation2 + $0xa8] sm:$0x7f] }
 0x33f   :  { %7161 = vmatprep.subr.msk.mxu1 %vm32_vm0, %v7340_v46  ;;  %v7364_v46 = vld [vmem:[#allocation2 + $0xa0] sm:$0x7f] }
 0x341   :  { %7148 = vmatmul.mubr.msk.f32.gmra.mrb[56].mxu1 %vm29_vm1, %v8219_v16 }
 0x342   :  { %3854 = vmatprep.mubr.f32.mxu1 %v7413_v5 }
 0x345   :  { %7155 = vmatmul.mubr.msk.f32.vlgmr.msra.gmra.mrb[58].mxu1 %vm29_vm1, %v8200_v36 }
 0x346   :  { %7162 = vmatpush1.msk.msra.mxu1 %vm32_vm0, %v7342_v21  ;;  %3860 = vmatprep.mubr.f32.mxu1 %v7413_v5  ;;  %v7366_v21 = vld [vmem:[#allocation2 + $0xc0] sm:$0x7f] }
 0x347   :  { %7169 = vmatprep.subr.msk.mxu1 %vm32_vm0, %v7343_v1  ;;  %v7367_v1 = vld [vmem:[#allocation2 + $0xe8] sm:$0x7f] }
 0x349   :  { %7156 = vmatmul.mubr.msk.f32.gmra.mrb[60].mxu1 %vm29_vm1, %v8219_v16 }
 0x34a   :  { %4040 = vmatprep.mubr.f32.mxu1 %v7413_v5 }
 0x34d   :  { %7163 = vmatmul.mubr.msk.f32.vlgmr.msra.gmra.mrb[62].mxu1 %vm29_vm1, %v8200_v36 }
 0x34e   :  { %7170 = vmatpush1.msk.msra.mxu1 %vm32_vm0, %v7344_v23  ;;  %4046 = vmatprep.mubr.f32.mxu1 %v7413_v5  ;;  %v7368_v23 = vld [vmem:[#allocation2 + $0xe0] sm:$0x7f] }
 0x34f   :  { %7177 = vmatprep.subr.msk.mxu1 %vm32_vm0, %v7345_v24  ;;  %v3409_v24 = vpop.permute.xlu0 %3408 }
 0x351   :  { %7164 = vmatmul.mubr.msk.f32.gmra.mrb[64].mxu1 %vm29_vm1, %v8219_v16 }
 0x352   :  { %4226 = vmatprep.mubr.f32.mxu1 %v7413_v5 }
 0x355   :  { %7171 = vmatmul.mubr.msk.f32.vlgmr.msra.gmra.mrb[66].mxu1 %vm29_vm1, %v8200_v36 }
 0x356   :  { %7178 = vmatpush1.msk.msra.mxu1 %vm32_vm0, %v7346_v19  ;;  %4232 = vmatprep.mubr.f32.mxu1 %v7413_v5 }
 0x357   :  { %7185 = vmatprep.subr.msk.mxu1 %vm32_vm0, %v7347_v25 }
 0x359   :  { %7172 = vmatmul.mubr.msk.f32.gmra.mrb[68].mxu1 %vm29_vm1, %v8219_v16 }
 0x35a   :  { %4412 = vmatprep.mubr.f32.mxu1 %v7413_v5 }
 0x35d   :  { %7179 = vmatmul.mubr.msk.f32.vlgmr.msra.gmra.mrb[70].mxu1 %vm29_vm1, %v8200_v36 }
 0x35e   :  { %7186 = vmatpush1.msk.msra.mxu1 %vm32_vm0, %v7348_v26  ;;  %4418 = vmatprep.mubr.f32.mxu1 %v7413_v5 }
 0x35f   :  { %7193 = vmatprep.subr.msk.mxu1 %vm32_vm0, %v7349_v28 }
 0x361   :  { %7180 = vmatmul.mubr.msk.f32.gmra.mrb[72].mxu1 %vm29_vm1, %v8219_v16 }
 0x362   :  { %4598 = vmatprep.mubr.f32.mxu1 %v7413_v5 }
 0x365   :  { %7187 = vmatmul.mubr.msk.f32.vlgmr.msra.gmra.mrb[74].mxu1 %vm29_vm1, %v8200_v36 }
 0x366   :  { %7194 = vmatpush1.msk.msra.mxu1 %vm32_vm0, %v7350_v29  ;;  %4604 = vmatprep.mubr.f32.mxu1 %v7413_v5  ;;  %v3414_v29 = vpop.permute.xlu1 %3413 }
 0x367   :  { %7201 = vmatprep.subr.msk.mxu1 %vm32_vm0, %v7351_v33 }
 0x369   :  { %7188 = vmatmul.mubr.msk.f32.gmra.mrb[76].mxu1 %vm29_vm1, %v8219_v16 }
 0x36a   :  { %4784 = vmatprep.mubr.f32.mxu1 %v7413_v5 }
 0x36d   :  { %7195 = vmatmul.mubr.msk.f32.vlgmr.msra.gmra.mrb[78].mxu1 %vm29_vm1, %v8200_v36 }
 0x36e   :  { %7202 = vmatpush1.msk.msra.mxu1 %vm32_vm0, %v7352_v35  ;;  %4790 = vmatprep.mubr.f32.mxu1 %v7413_v5 }
 0x36f   :  { %7215 = vmatprep.subr.msk.mxu1 %vm32_vm0, %v7353_v37 }
 0x371   :  { %7196 = vmatmul.mubr.msk.f32.gmra.mrb[80].mxu1 %vm29_vm1, %v8219_v16 }
 0x372   :  { %4970 = vmatprep.mubr.f32.mxu1 %v7413_v5 }
 0x375   :  { %7203 = vmatmul.mubr.msk.f32.vlgmr.msra.gmra.mrb[82].mxu1 %vm29_vm1, %v8200_v36  ;;  %v7362_v36 = vld [vmem:[#allocation2 + $0x80] sm:$0x7f] }
 0x376   :  { %7216 = vmatpush1.msk.msra.mxu1 %vm32_vm0, %v7354_v31  ;;  %4976 = vmatprep.mubr.f32.mxu1 %v7413_v5 }
 0x377   :  { %7223 = vmatprep.subr.msk.mxu1 %vm32_vm0, %v7355_v38 }
 0x379   :  { %7204 = vmatmul.mubr.msk.f32.gmra.mrb[84].mxu1 %vm29_vm1, %v8219_v16  ;;  %v7365_v16 = vld [vmem:[#allocation2 + $0xc8] sm:$0x7f] }
 0x37a   :  { %5359 = vmatprep.mubr.f32.mxu1 %v7413_v5 }
 0x37d   :  { %7217 = vmatmul.mubr.msk.f32.vlgmr.msra.gmra.mrb[86].mxu1 %vm29_vm1, %v8173_v3 }
 0x37e   :  { %7224 = vmatpush1.msk.msra.mxu1 %vm32_vm0, %v7356_v12  ;;  %5365 = vmatprep.mubr.f32.mxu1 %v7413_v5 }
 0x37f   :  { %7231 = vmatprep.subr.msk.mxu1 %vm32_vm0, %v7357_v32 }
 0x381   :  { %7218 = vmatmul.mubr.msk.f32.gmra.mrb[88].mxu1 %vm29_vm1, %v8165_v0 }
 0x382   :  { %5545 = vmatprep.mubr.f32.mxu1 %v7413_v5 }
 0x385   :  { %7225 = vmatmul.mubr.msk.f32.vlgmr.msra.gmra.mrb[90].mxu1 %vm29_vm1, %v8173_v3 }
 0x386   :  { %7232 = vmatpush1.msk.msra.mxu1 %vm32_vm0, %v7358_v42  ;;  %5551 = vmatprep.mubr.f32.mxu1 %v7413_v5 }
 0x387   :  { %7239 = vmatprep.subr.msk.mxu1 %vm32_vm0, %v7359_v40 }
 0x389   :  { %7226 = vmatmul.mubr.msk.f32.gmra.mrb[92].mxu1 %vm29_vm1, %v8165_v0 }
 0x38a   :  { %5731 = vmatprep.mubr.f32.mxu1 %v7413_v5 }
 0x38d   :  { %7233 = vmatmul.mubr.msk.f32.vlgmr.msra.gmra.mrb[94].mxu1 %vm29_vm1, %v8173_v3 }
 0x38e   :  { %7240 = vmatpush1.msk.msra.mxu1 %vm32_vm0, %v7360_v60  ;;  %5737 = vmatprep.mubr.f32.mxu1 %v7413_v5 }
 0x38f   :  { %7247 = vmatprep.subr.msk.mxu1 %vm32_vm0, %v7361_v27 }
 0x391   :  { %7234 = vmatmul.mubr.msk.f32.gmra.mrb[96].mxu1 %vm29_vm1, %v8165_v0 }
 0x392   :  { %5917 = vmatprep.mubr.f32.mxu1 %v7413_v5 }
 0x395   :  { %7241 = vmatmul.mubr.msk.f32.vlgmr.msra.gmra.mrb[98].mxu1 %vm29_vm1, %v8173_v3 }
 0x396   :  { %7248 = vmatpush1.msk.msra.mxu1 %vm32_vm0, %v7362_v36  ;;  %5923 = vmatprep.mubr.f32.mxu1 %v7413_v5 }
 0x397   :  { %7255 = vmatprep.subr.msk.mxu1 %vm32_vm0, %v7363_v39 }
 0x399   :  { %7242 = vmatmul.mubr.msk.f32.gmra.mrb[100].mxu1 %vm29_vm1, %v8165_v0 }
 0x39a   :  { %6103 = vmatprep.mubr.f32.mxu1 %v7413_v5 }
 0x39d   :  { %7249 = vmatmul.mubr.msk.f32.vlgmr.msra.gmra.mrb[102].mxu1 %vm29_vm1, %v8173_v3 }
 0x39e   :  { %7256 = vmatpush1.msk.msra.mxu1 %vm32_vm0, %v7364_v46  ;;  %6109 = vmatprep.mubr.f32.mxu1 %v7413_v5 }
 0x39f   :  { %7263 = vmatprep.subr.msk.mxu1 %vm32_vm0, %v7365_v16 }
 0x3a1   :  { %7250 = vmatmul.mubr.msk.f32.gmra.mrb[104].mxu1 %vm29_vm1, %v8165_v0 }
 0x3a2   :  { %6289 = vmatprep.mubr.f32.mxu1 %v7413_v5 }
 0x3a5   :  { %7257 = vmatmul.mubr.msk.f32.vlgmr.msra.gmra.mrb[106].mxu1 %vm29_vm1, %v8173_v3 }
 0x3a6   :  { %7264 = vmatpush1.msk.msra.mxu1 %vm32_vm0, %v7366_v21  ;;  %6295 = vmatprep.mubr.f32.mxu1 %v7413_v5 }
 0x3a7   :  { %7271 = vmatprep.subr.msk.mxu1 %vm32_vm0, %v7367_v1 }
 0x3a9   :  { %7258 = vmatmul.mubr.msk.f32.gmra.mrb[108].mxu1 %vm29_vm1, %v8165_v0 }
 0x3aa   :  { %6475 = vmatprep.mubr.f32.mxu1 %v7413_v5 }
 0x3ad   :  { %7265 = vmatmul.mubr.msk.f32.vlgmr.msra.gmra.mrb[110].mxu1 %vm29_vm1, %v8173_v3 }
 0x3ae   :  { %7272 = vmatpush1.msk.msra.mxu1 %vm32_vm0, %v7368_v23  ;;  %6481 = vmatprep.mubr.f32.mxu1 %v7413_v5 }
 0x3b1   :  { %7266 = vmatmul.mubr.msk.f32.gmra.mrb[112].mxu1 %vm29_vm1, %v8165_v0 }
 0x3b2   :  { %6661 = vmatprep.mubr.f32.mxu1 %v7413_v5 }
 0x3b5   :  { %7273 = vmatmul.mubr.msk.f32.vlgmr.msra.gmra.mrb[114].mxu1 %vm29_vm1, %v8173_v3 }
 0x3b6   :  { %6667 = vmatprep.mubr.f32.mxu1 %v7413_v5 }
 0x3b9   :  { %7274 = vmatmul.mubr.msk.f32.gmra.mrb[116].mxu1 %vm29_vm1, %v8165_v0 }
 0x3ba   :  { %6860 = vmatprep.mubr.f32.mxu1 %v7413_v5 }
 0x408   :  { %v3496_v19 = vpop.f32.mrb[50].mxu1 }
 0x409   :  { %v8361_v25 = vadd.f32 %v3496_v19, %v3409_v24  ;;  %v3498_v26 = vpop.f32.mrb[51].mxu1 }
 0x40a   :  { %v8363_v28 = vadd.f32 %v3498_v26, %v3409_v24 }
 0x40b   :  { %v4880_v33 = vadd.f32 %v4879_v49, %v8361_v25  ;;  %v3578_v3 = vadd.f32 %v8133_v14, %v8361_v25  ;;  %v8370_v35 = vadd.f32 %v8145_v55, %v8361_v25  ;;  %v8374_v0 = vadd.f32 %v8167_v63, %v8361_v25 }
 0x40c   :  { %v4882_v37 = vadd.f32 %v4881_v50, %v8363_v28  ;;  %v3502_v31 = vpop.f32.mrb[52].mxu1  ;;  %v3580_v38 = vadd.f32 %v8135_v48, %v8363_v28  ;;  %v3766_v12 = vadd.f32 %v8149_v58, %v8363_v28  ;;  %v8383_v14 = vadd.f32 %v8175_v4, %v8363_v28 }
 0x40d   :  { %vm4890_vm14 = vcmp.ge.f32.partialorder %v4880_v33, 0.0  ;;  %v4894_v55 = vmul.f32 0.2, %v4880_v33  ;;  %v8385_v32 = vadd.f32 %v3502_v31, %v3414_v29  ;;  %v3504_v42 = vpop.f32.mrb[53].mxu1  ;;  %v3592_v49 = vmul.f32 0.2, %v3578_v3 }
 0x40e   :  { %vm4891_vm4 = vcmp.ge.f32.partialorder %v4882_v37, 0.0  ;;  %v4895_v63 = vmul.f32 0.2, %v4882_v37  ;;  %v8387_v40 = vadd.f32 %v3504_v42, %v3414_v29  ;;  %vm3588_vm15 = vcmp.ge.f32.partialorder %v3578_v3, 0.0 }
 0x40f   :  { %v4886_v50 = vadd.f32 %v4885_v57, %v8385_v32  ;;  %v3593_v48 = vmul.f32 0.2, %v3580_v38  ;;  %v8390_v60 = vsel %vm4890_vm14, %v4880_v33, %v4894_v55  ;;  %vm3589_vm5 = vcmp.ge.f32.partialorder %v3580_v38, 0.0 }
 0x410   :  { %v8394_v58 = vadd.f32 %v8319_v2, %v8387_v40  ;;  %v3670_v4 = vpop.f32.mrb[54].mxu1  ;;  %v3584_v27 = vadd.f32 %v8137_v51, %v8385_v32  ;;  %v8398_v36 = vsel %vm4891_vm4, %v4882_v37, %v4895_v63  ;;  %v3596_v21 = vsel %vm3588_vm15, %v3578_v3, %v3592_v49 }
 0x411   :  { %vm4892_vm6 = vcmp.ge.f32.partialorder %v4886_v50, 0.0  ;;  %v4896_v39 = vmul.f32 0.2, %v4886_v50  ;;  %v3671_v46 = vadd.f32 %v3670_v4, %v8361_v25  ;;  %v3672_v57 = vpop.f32.mrb[55].mxu1  ;;  %v3597_v23 = vsel %vm3589_vm5, %v3580_v38, %v3593_v48 }
 0x412   :  { %v8402_v16 = vmul.f32 0.2, %v8394_v58  ;;  %v3673_v1 = vadd.f32 %v3672_v57, %v8363_v28  ;;  %vm3590_vm7 = vcmp.ge.f32.partialorder %v3584_v27, 0.0  ;;  %v3594_v24 = vmul.f32 0.2, %v3584_v27 }
 0x413   :  { %vm3681_vm8 = vcmp.ge.f32.partialorder %v3671_v46, 0.0  ;;  %v3685_v2 = vmul.f32 0.2, %v3671_v46  ;;  %v8405_v19 = vsel %vm4892_vm6, %v4886_v50, %v4896_v39  ;;  %v3586_v29 = vadd.f32 %v8141_v53, %v8387_v40 }
 0x414   :  { %vm3682_vm12 = vcmp.ge.f32.partialorder %v3673_v1, 0.0  ;;  %v3686_v51 = vmul.f32 0.2, %v3673_v1  ;;  %v3676_v26 = vpop.f32.mrb[56].mxu1  ;;  %v3598_v37 = vsel %vm3590_vm7, %v3584_v27, %v3594_v24  ;;  %vm3774_vm13 = vcmp.ge.f32.partialorder %v8370_v35, 0.0 }
 0x415   :  { %v3689_v33 = vsel %vm3681_vm8, %v3671_v46, %v3685_v2  ;;  %v3677_v31 = vadd.f32 %v3676_v26, %v8385_v32  ;;  %v3678_v3 = vpop.f32.mrb[57].mxu1  ;;  %vm3591_vm14 = vcmp.ge.f32.partialorder %v3586_v29, 0.0  ;;  %v3595_v38 = vmul.f32 0.2, %v3586_v29 }
 0x416   :  { %v3693_v55 = vadd.f32 %v3689_v33, %v3596_v21  ;;  %v3690_v42 = vsel %vm3682_vm12, %v3673_v1, %v3686_v51  ;;  %v3679_v50 = vadd.f32 %v3678_v3, %v8387_v40  ;;  %v3778_v4 = vmul.f32 0.2, %v8370_v35 }
 0x417   :  { %v3694_v63 = vadd.f32 %v3690_v42, %v3597_v23  ;;  %vm3683_vm4 = vcmp.ge.f32.partialorder %v3677_v31, 0.0  ;;  %v3687_v49 = vmul.f32 0.2, %v3677_v31  ;;  %v3599_v48 = vsel %vm3591_vm14, %v3586_v29, %v3595_v38 }
 0x418   :  { %v3856_v53 = vpop.f32.mrb[58].mxu1  ;;  %vm3775_vm15 = vcmp.ge.f32.partialorder %v3766_v12, 0.0  ;;  %v3779_v27 = vmul.f32 0.2, %v3766_v12  ;;  %vm3684_vm5 = vcmp.ge.f32.partialorder %v3679_v50, 0.0  ;;  %v3782_v2 = vsel %vm3774_vm13, %v8370_v35, %v3778_v4 }
 0x419   :  { %v3691_v39 = vsel %vm3683_vm4, %v3677_v31, %v3687_v49  ;;  %v3688_v46 = vmul.f32 0.2, %v3679_v50  ;;  %v3857_v57 = vadd.f32 %v3856_v53, %v8361_v25  ;;  %v3858_v21 = vpop.f32.mrb[59].mxu1  ;;  %v3786_v26 = vadd.f32 %v3782_v2, %v3693_v55 }
 0x41a   :  { %v3695_v1 = vadd.f32 %v3691_v39, %v3598_v37  ;;  %v3783_v23 = vsel %vm3775_vm15, %v3766_v12, %v3779_v27  ;;  %v3859_v24 = vadd.f32 %v3858_v21, %v8363_v28  ;;  %v3770_v37 = vadd.f32 %v8154_v56, %v8385_v32 }
 0x41b   :  { %v3692_v51 = vsel %vm3684_vm5, %v3679_v50, %v3688_v46  ;;  %vm3867_vm6 = vcmp.ge.f32.partialorder %v3857_v57, 0.0  ;;  %v3871_v29 = vmul.f32 0.2, %v3857_v57  ;;  %v3787_v3 = vadd.f32 %v3783_v23, %v3694_v63 }
 0x41c   :  { %v3696_v33 = vadd.f32 %v3692_v51, %v3599_v48  ;;  %vm3868_vm7 = vcmp.ge.f32.partialorder %v3859_v24, 0.0  ;;  %v3872_v31 = vmul.f32 0.2, %v3859_v24  ;;  %v3862_v42 = vpop.f32.mrb[60].mxu1  ;;  %v3772_v35 = vadd.f32 %v8158_v61, %v8387_v40 }
 0x41d   :  { %v3875_v38 = vsel %vm3867_vm6, %v3857_v57, %v3871_v29  ;;  %v3863_v49 = vadd.f32 %v3862_v42, %v8385_v32  ;;  %v3864_v12 = vpop.f32.mrb[61].mxu1  ;;  %vm3960_vm8 = vcmp.ge.f32.partialorder %v8374_v0, 0.0  ;;  %vm3776_vm12 = vcmp.ge.f32.partialorder %v3770_v37, 0.0 }
 0x41e   :  { %v3879_v4 = vadd.f32 %v3875_v38, %v3786_v26  ;;  %v3876_v50 = vsel %vm3868_vm7, %v3859_v24, %v3872_v31  ;;  %v3865_v55 = vadd.f32 %v3864_v12, %v8387_v40  ;;  %v3780_v48 = vmul.f32 0.2, %v3770_v37 }
 0x41f   :  { %v3880_v63 = vadd.f32 %v3876_v50, %v3787_v3  ;;  %vm3869_vm13 = vcmp.ge.f32.partialorder %v3863_v49, 0.0  ;;  %v3873_v53 = vmul.f32 0.2, %v3863_v49  ;;  %vm3777_vm14 = vcmp.ge.f32.partialorder %v3772_v35, 0.0 }
 0x420   :  { %v3781_v27 = vmul.f32 0.2, %v3772_v35  ;;  %vm3870_vm4 = vcmp.ge.f32.partialorder %v3865_v55, 0.0  ;;  %v3784_v56 = vsel %vm3776_vm12, %v3770_v37, %v3780_v48  ;;  %v3874_v39 = vmul.f32 0.2, %v3865_v55  ;;  %v4042_v61 = vpop.f32.mrb[62].mxu1 }
 0x421   :  { %v3964_v46 = vmul.f32 0.2, %v8374_v0  ;;  %vm3961_vm15 = vcmp.ge.f32.partialorder %v8383_v14, 0.0  ;;  %v3788_v57 = vadd.f32 %v3784_v56, %v3695_v1  ;;  %v3877_v21 = vsel %vm3869_vm13, %v3863_v49, %v3873_v53  ;;  %v4044_v24 = vpop.f32.mrb[63].mxu1 }
 0x422   :  { %v3785_v2 = vsel %vm3777_vm14, %v3772_v35, %v3781_v27  ;;  %v4043_v23 = vadd.f32 %v4042_v61, %v8361_v25  ;;  %v3878_v26 = vsel %vm3870_vm4, %v3865_v55, %v3874_v39  ;;  %v3965_v3 = vmul.f32 0.2, %v8383_v14 }
 0x423   :  { %v3789_v51 = vadd.f32 %v3785_v2, %v3696_v33  ;;  %v3968_v29 = vsel %vm3960_vm8, %v8374_v0, %v3964_v46  ;;  %v3881_v31 = vadd.f32 %v3877_v21, %v3788_v57  ;;  %v4045_v49 = vadd.f32 %v4044_v24, %v8363_v28 }
 0x424   :  { %v3972_v42 = vadd.f32 %v3968_v29, %v3879_v4  ;;  %vm4053_vm5 = vcmp.ge.f32.partialorder %v4043_v23, 0.0  ;;  %v4057_v38 = vmul.f32 0.2, %v4043_v23  ;;  %v4048_v37 = vpop.f32.mrb[64].mxu1  ;;  %v3969_v1 = vsel %vm3961_vm15, %v8383_v14, %v3965_v3 }
 0x425   :  { %v3882_v12 = vadd.f32 %v3878_v26, %v3789_v51  ;;  %v3956_v33 = vadd.f32 %v8179_v62, %v8385_v32  ;;  %v4050_v35 = vpop.f32.mrb[65].mxu1  ;;  %v3973_v0 = vadd.f32 %v3969_v1, %v3880_v63  ;;  %v4049_v55 = vadd.f32 %v4048_v37, %v8385_v32 }
 0x426   :  { %v4061_v50 = vsel %vm4053_vm5, %v4043_v23, %v4057_v38  ;;  %v3958_v4 = vadd.f32 %v8185_v8, %v8387_v40  ;;  %vm4054_vm6 = vcmp.ge.f32.partialorder %v4045_v49, 0.0  ;;  %v4058_v53 = vmul.f32 0.2, %v4045_v49 }
 0x427   :  { %v4065_v48 = vadd.f32 %v4061_v50, %v3972_v42  ;;  %vm3962_vm7 = vcmp.ge.f32.partialorder %v3956_v33, 0.0  ;;  %v3966_v27 = vmul.f32 0.2, %v3956_v33  ;;  %vm4055_vm8 = vcmp.ge.f32.partialorder %v4049_v55, 0.0 }
 0x428   :  { %v4059_v14 = vmul.f32 0.2, %v4049_v55  ;;  %vm3963_vm12 = vcmp.ge.f32.partialorder %v3958_v4, 0.0  ;;  %v4062_v56 = vsel %vm4054_vm6, %v4045_v49, %v4058_v53  ;;  %v3967_v39 = vmul.f32 0.2, %v3958_v4  ;;  %v4228_v46 = vpop.f32.mrb[66].mxu1 }
 0x429   :  { %v4051_v62 = vadd.f32 %v4050_v35, %v8387_v40  ;;  %v4136_v63 = vadd.f32 %v8189_v6, %v8361_v25  ;;  %v4066_v61 = vadd.f32 %v4062_v56, %v3973_v0  ;;  %v3970_v57 = vsel %vm3962_vm7, %v3956_v33, %v3966_v27  ;;  %v4230_v2 = vpop.f32.mrb[67].mxu1 }
 0x42a   :  { %v4063_v21 = vsel %vm4055_vm8, %v4049_v55, %v4059_v14  ;;  %v4229_v8 = vadd.f32 %v4228_v46, %v8361_v25  ;;  %v3974_v23 = vadd.f32 %v3970_v57, %v3881_v31  ;;  %v3971_v24 = vsel %vm3963_vm12, %v3958_v4, %v3967_v39 }
 0x42b   :  { %vm4056_vm13 = vcmp.ge.f32.partialorder %v4051_v62, 0.0  ;;  %v4060_v51 = vmul.f32 0.2, %v4051_v62  ;;  %v3975_v26 = vadd.f32 %v3971_v24, %v3882_v12  ;;  %vm4146_vm14 = vcmp.ge.f32.partialorder %v4136_v63, 0.0 }
 0x42c   :  { %v4150_v29 = vmul.f32 0.2, %v4136_v63  ;;  %vm4239_vm4 = vcmp.ge.f32.partialorder %v4229_v8, 0.0  ;;  %v4234_v3 = vpop.f32.mrb[68].mxu1  ;;  %v4067_v42 = vadd.f32 %v4063_v21, %v3974_v23  ;;  %v4243_v37 = vmul.f32 0.2, %v4229_v8 }
 0x42d   :  { %v4064_v38 = vsel %vm4056_vm13, %v4051_v62, %v4060_v51  ;;  %v4138_v6 = vadd.f32 %v8191_v9, %v8363_v28  ;;  %v4236_v1 = vpop.f32.mrb[69].mxu1  ;;  %v4231_v35 = vadd.f32 %v4230_v2, %v8363_v28  ;;  %v4142_v31 = vadd.f32 %v8194_v10, %v8385_v32 }
 0x42e   :  { %v4068_v49 = vadd.f32 %v4064_v38, %v3975_v26  ;;  %v4154_v33 = vsel %vm4146_vm14, %v4136_v63, %v4150_v29  ;;  %v4247_v12 = vsel %vm4239_vm4, %v4229_v8, %v4243_v37  ;;  %v4235_v9 = vadd.f32 %v4234_v3, %v8385_v32 }
 0x42f   :  { %v4158_v50 = vadd.f32 %v4154_v33, %v4065_v48  ;;  %vm4147_vm15 = vcmp.ge.f32.partialorder %v4138_v6, 0.0  ;;  %v4151_v0 = vmul.f32 0.2, %v4138_v6  ;;  %vm4240_vm5 = vcmp.ge.f32.partialorder %v4231_v35, 0.0 }
 0x430   :  { %v4244_v55 = vmul.f32 0.2, %v4231_v35  ;;  %vm4148_vm6 = vcmp.ge.f32.partialorder %v4142_v31, 0.0  ;;  %v4152_v4 = vmul.f32 0.2, %v4142_v31  ;;  %v4144_v14 = vadd.f32 %v8204_v41, %v8387_v40  ;;  %v4414_v56 = vpop.f32.mrb[70].mxu1 }
 0x431   :  { %v4251_v53 = vadd.f32 %v4247_v12, %v4158_v50  ;;  %v4155_v27 = vsel %vm4147_vm15, %v4138_v6, %v4151_v0  ;;  %v4237_v10 = vadd.f32 %v4236_v1, %v8387_v40  ;;  %v4416_v48 = vpop.f32.mrb[71].mxu1  ;;  %vm4241_vm7 = vcmp.ge.f32.partialorder %v4235_v9, 0.0 }
 0x432   :  { %v4159_v39 = vadd.f32 %v4155_v27, %v4066_v61  ;;  %v4248_v62 = vsel %vm4240_vm5, %v4231_v35, %v4244_v55  ;;  %v4156_v63 = vsel %vm4148_vm6, %v4142_v31, %v4152_v4  ;;  %v4245_v57 = vmul.f32 0.2, %v4235_v9 }
 0x433   :  { %v4160_v46 = vadd.f32 %v4156_v63, %v4067_v42  ;;  %vm4149_vm8 = vcmp.ge.f32.partialorder %v4144_v14, 0.0  ;;  %v4153_v8 = vmul.f32 0.2, %v4144_v14  ;;  %vm4242_vm12 = vcmp.ge.f32.partialorder %v4237_v10, 0.0 }
 0x434   :  { %v4252_v21 = vadd.f32 %v4248_v62, %v4159_v39  ;;  %v4246_v2 = vmul.f32 0.2, %v4237_v10  ;;  %v4420_v23 = vpop.f32.mrb[72].mxu1  ;;  %v4249_v24 = vsel %vm4241_vm7, %v4235_v9, %v4245_v57  ;;  %v4322_v41 = vadd.f32 %v8208_v34, %v8361_v25 }
 0x435   :  { %v4415_v61 = vadd.f32 %v4414_v56, %v8361_v25  ;;  %v4324_v51 = vadd.f32 %v8211_v7, %v8363_v28  ;;  %v4422_v26 = vpop.f32.mrb[73].mxu1  ;;  %v4253_v29 = vadd.f32 %v4249_v24, %v4160_v46  ;;  %v4157_v3 = vsel %vm4149_vm8, %v4144_v14, %v4153_v8 }
 0x436   :  { %v4250_v42 = vsel %vm4242_vm12, %v4237_v10, %v4246_v2  ;;  %v4417_v38 = vadd.f32 %v4416_v48, %v8363_v28  ;;  %v4161_v37 = vadd.f32 %v4157_v3, %v4068_v49  ;;  %vm4332_vm13 = vcmp.ge.f32.partialorder %v4322_v41, 0.0 }
 0x437   :  { %v4336_v6 = vmul.f32 0.2, %v4322_v41  ;;  %vm4425_vm14 = vcmp.ge.f32.partialorder %v4415_v61, 0.0  ;;  %v4429_v1 = vmul.f32 0.2, %v4415_v61  ;;  %vm4333_vm4 = vcmp.ge.f32.partialorder %v4324_v51, 0.0 }
 0x438   :  { %v4337_v33 = vmul.f32 0.2, %v4324_v51  ;;  %vm4426_vm15 = vcmp.ge.f32.partialorder %v4417_v38, 0.0  ;;  %v4254_v34 = vadd.f32 %v4250_v42, %v4161_v37  ;;  %v4430_v31 = vmul.f32 0.2, %v4417_v38  ;;  %v4600_v50 = vpop.f32.mrb[74].mxu1 }
 0x439   :  { %v4340_v35 = vsel %vm4332_vm13, %v4322_v41, %v4336_v6  ;;  %v4328_v7 = vadd.f32 %v8214_v15, %v8385_v32  ;;  %v4433_v0 = vsel %vm4425_vm14, %v4415_v61, %v4429_v1  ;;  %v4421_v4 = vadd.f32 %v4420_v23, %v8385_v32  ;;  %v4602_v49 = vpop.f32.mrb[75].mxu1 }
 0x43a   :  { %v4344_v12 = vadd.f32 %v4340_v35, %v4251_v53  ;;  %v4341_v55 = vsel %vm4333_vm4, %v4324_v51, %v4337_v33  ;;  %v4434_v9 = vsel %vm4426_vm15, %v4417_v38, %v4430_v31  ;;  %v4330_v62 = vadd.f32 %v8223_v11, %v8387_v40 }
 0x43b   :  { %v4345_v27 = vadd.f32 %v4341_v55, %v4252_v21  ;;  %vm4334_vm5 = vcmp.ge.f32.partialorder %v4328_v7, 0.0  ;;  %v4338_v14 = vmul.f32 0.2, %v4328_v7  ;;  %vm4427_vm6 = vcmp.ge.f32.partialorder %v4421_v4, 0.0 }
 0x43c   :  { %v4437_v56 = vadd.f32 %v4433_v0, %v4344_v12  ;;  %v4431_v39 = vmul.f32 0.2, %v4421_v4  ;;  %v4606_v63 = vpop.f32.mrb[76].mxu1  ;;  %v4423_v53 = vadd.f32 %v4422_v26, %v8387_v40  ;;  %v4508_v48 = vadd.f32 %v8226_v17, %v8361_v25 }
 0x43d   :  { %v4438_v10 = vadd.f32 %v4434_v9, %v4345_v27  ;;  %v4342_v15 = vsel %vm4334_vm5, %v4328_v7, %v4338_v14  ;;  %v4608_v46 = vpop.f32.mrb[77].mxu1  ;;  %vm4335_vm7 = vcmp.ge.f32.partialorder %v4330_v62, 0.0  ;;  %v4339_v8 = vmul.f32 0.2, %v4330_v62 }
 0x43e   :  { %v4346_v57 = vadd.f32 %v4342_v15, %v4253_v29  ;;  %v4435_v21 = vsel %vm4427_vm6, %v4421_v4, %v4431_v39  ;;  %vm4428_vm8 = vcmp.ge.f32.partialorder %v4423_v53, 0.0  ;;  %v4432_v2 = vmul.f32 0.2, %v4423_v53 }
 0x43f   :  { %vm4518_vm12 = vcmp.ge.f32.partialorder %v4508_v48, 0.0  ;;  %v4522_v23 = vmul.f32 0.2, %v4508_v48  ;;  %v4343_v41 = vsel %vm4335_vm7, %v4330_v62, %v4339_v8  ;;  %v4601_v11 = vadd.f32 %v4600_v50, %v8361_v25 }
 0x440   :  { %v4439_v24 = vadd.f32 %v4435_v21, %v4346_v57  ;;  %v4510_v61 = vadd.f32 %v8228_v20, %v8363_v28  ;;  %v4786_v51 = vpop.f32.mrb[78].mxu1  ;;  %v4347_v26 = vadd.f32 %v4343_v41, %v4254_v34  ;;  %v4436_v3 = vsel %vm4428_vm8, %v4423_v53, %v4432_v2 }
 0x441   :  { %v4526_v17 = vsel %vm4518_vm12, %v4508_v48, %v4522_v23  ;;  %v4603_v29 = vadd.f32 %v4602_v49, %v8363_v28  ;;  %v4788_v42 = vpop.f32.mrb[79].mxu1  ;;  %vm4611_vm13 = vcmp.ge.f32.partialorder %v4601_v11, 0.0  ;;  %v4615_v37 = vmul.f32 0.2, %v4601_v11 }
 0x442   :  { %v4530_v38 = vadd.f32 %v4526_v17, %v4437_v56  ;;  %vm4519_vm14 = vcmp.ge.f32.partialorder %v4510_v61, 0.0  ;;  %v4440_v6 = vadd.f32 %v4436_v3, %v4347_v26  ;;  %v4523_v1 = vmul.f32 0.2, %v4510_v61 }
 0x443   :  { %vm4612_vm4 = vcmp.ge.f32.partialorder %v4603_v29, 0.0  ;;  %v4616_v33 = vmul.f32 0.2, %v4603_v29  ;;  %v4619_v35 = vsel %vm4611_vm13, %v4601_v11, %v4615_v37  ;;  %v4514_v31 = vadd.f32 %v8230_v13, %v8385_v32 }
 0x444   :  { %v4607_v20 = vadd.f32 %v4606_v63, %v8385_v32  ;;  %v4516_v34 = vadd.f32 %v8234_v59, %v8387_v40  ;;  %v4792_v7 = vpop.f32.mrb[80].mxu1  ;;  %v4623_v50 = vadd.f32 %v4619_v35, %v4530_v38  ;;  %v4527_v12 = vsel %vm4519_vm14, %v4510_v61, %v4523_v1 }
 0x445   :  { %v4620_v0 = vsel %vm4612_vm4, %v4603_v29, %v4616_v33  ;;  %v4609_v55 = vadd.f32 %v4608_v46, %v8387_v40  ;;  %v4794_v4 = vpop.f32.mrb[81].mxu1  ;;  %v4531_v49 = vadd.f32 %v4527_v12, %v4438_v10  ;;  %vm4520_vm15 = vcmp.ge.f32.partialorder %v4514_v31, 0.0 }
 0x446   :  { %v4524_v27 = vmul.f32 0.2, %v4514_v31  ;;  %vm4613_vm5 = vcmp.ge.f32.partialorder %v4607_v20, 0.0  ;;  %v4617_v9 = vmul.f32 0.2, %v4607_v20  ;;  %vm4521_vm6 = vcmp.ge.f32.partialorder %v4516_v34, 0.0 }
 0x447   :  { %v4525_v14 = vmul.f32 0.2, %v4516_v34  ;;  %vm4614_vm7 = vcmp.ge.f32.partialorder %v4609_v55, 0.0  ;;  %v4624_v13 = vadd.f32 %v4620_v0, %v4531_v49  ;;  %v4618_v39 = vmul.f32 0.2, %v4609_v55 }
 0x448   :  { %v4528_v56 = vsel %vm4520_vm15, %v4514_v31, %v4524_v27  ;;  %v4694_v59 = vadd.f32 %v8238_v22, %v8361_v25  ;;  %v4972_v62 = vpop.f32.mrb[82].mxu1  ;;  %v4621_v15 = vsel %vm4613_vm5, %v4607_v20, %v4617_v9  ;;  %v4787_v48 = vadd.f32 %v4786_v51, %v8361_v25 }
 0x449   :  { %v4532_v63 = vadd.f32 %v4528_v56, %v4439_v24  ;;  %v4529_v53 = vsel %vm4521_vm6, %v4516_v34, %v4525_v14  ;;  %v4974_v10 = vpop.f32.mrb[83].mxu1  ;;  %v4622_v57 = vsel %vm4614_vm7, %v4609_v55, %v4618_v39  ;;  %v4696_v23 = vadd.f32 %v8241_v18, %v8363_v28 }
 0x44a   :  { %v4533_v46 = vadd.f32 %v4529_v53, %v4440_v6  ;;  %vm4704_vm8 = vcmp.ge.f32.partialorder %v4694_v59, 0.0  ;;  %v4708_v21 = vmul.f32 0.2, %v4694_v59  ;;  %vm4797_vm12 = vcmp.ge.f32.partialorder %v4787_v48, 0.0 }
 0x44b   :  { %v4625_v8 = vadd.f32 %v4621_v15, %v4532_v63  ;;  %v4801_v2 = vmul.f32 0.2, %v4787_v48  ;;  %vm4893_vm13 = vcmp.ge.f32.partialorder %v8394_v58, 0.0  ;;  %v4789_v24 = vadd.f32 %v4788_v42, %v8363_v28 }
 0x44c   :  { %v4626_v22 = vadd.f32 %v4622_v57, %v4533_v46  ;;  %v4712_v41 = vsel %vm4704_vm8, %v4694_v59, %v4708_v21  ;;  %v4700_v11 = vadd.f32 %v8309_v44, %v8385_v32  ;;  %v4978_v61 = vpop.f32.mrb[84].mxu1  ;;  %vm4705_vm14 = vcmp.ge.f32.partialorder %v4696_v23, 0.0 }
 0x44d   :  { %v4716_v51 = vadd.f32 %v4712_v41, %v4623_v50  ;;  %v4805_v26 = vsel %vm4797_vm12, %v4787_v48, %v4801_v2  ;;  %v4709_v3 = vmul.f32 0.2, %v4696_v23  ;;  %v4980_v17 = vpop.f32.mrb[85].mxu1  ;;  %vm4798_vm4 = vcmp.ge.f32.partialorder %v4789_v24, 0.0 }
 0x44e   :  { %v4802_v29 = vmul.f32 0.2, %v4789_v24  ;;  %vm4706_vm15 = vcmp.ge.f32.partialorder %v4700_v11, 0.0  ;;  %v4710_v38 = vmul.f32 0.2, %v4700_v11  ;;  %v4793_v6 = vadd.f32 %v4792_v7, %v8385_v32 }
 0x44f   :  { %v4809_v18 = vadd.f32 %v4805_v26, %v4716_v51  ;;  %v4713_v37 = vsel %vm4705_vm14, %v4696_v23, %v4709_v3  ;;  %v4702_v42 = vadd.f32 %v8312_v45, %v8387_v40  ;;  %v4795_v35 = vadd.f32 %v4794_v4, %v8387_v40 }
 0x450   :  { %v4717_v1 = vadd.f32 %v4713_v37, %v4624_v13  ;;  %v4806_v33 = vsel %vm4798_vm4, %v4789_v24, %v4802_v29  ;;  %v4714_v44 = vsel %vm4706_vm15, %v4700_v11, %v4710_v38  ;;  %vm4799_vm5 = vcmp.ge.f32.partialorder %v4793_v6, 0.0 }
 0x451   :  { %v4718_v31 = vadd.f32 %v4714_v44, %v4625_v8  ;;  %v4803_v20 = vmul.f32 0.2, %v4793_v6  ;;  %vm4707_vm6 = vcmp.ge.f32.partialorder %v4702_v42, 0.0  ;;  %v4711_v50 = vmul.f32 0.2, %v4702_v42 }
 0x452   :  { %v4810_v34 = vadd.f32 %v4806_v33, %v4717_v1  ;;  %vm4800_vm7 = vcmp.ge.f32.partialorder %v4795_v35, 0.0  ;;  %v4804_v12 = vmul.f32 0.2, %v4795_v35  ;;  %v4902_v55 = vadd.f32 %v8390_v60, %v4809_v18 }
 0x453   :  { %v4807_v0 = vsel %vm4799_vm5, %v4793_v6, %v4803_v20  ;;  %v4973_v7 = vadd.f32 %v4972_v62, %v8361_v25  ;;  %v4975_v45 = vadd.f32 %v4974_v10, %v8363_v28  ;;  %v4715_v27 = vsel %vm4707_vm6, %v4702_v42, %v4711_v50 }
 0x454   :  { %v4811_v49 = vadd.f32 %v4807_v0, %v4718_v31  ;;  %v4808_v9 = vsel %vm4800_vm7, %v4795_v35, %v4804_v12  ;;  %v4903_v4 = vadd.f32 %v8398_v36, %v4810_v34  ;;  %v4719_v14 = vadd.f32 %v4715_v27, %v4626_v22  ;;  %v7210_v0 = vld [vmem:[%s8856_s3 + $0x10] sm:$0x3f] }
 0x455   :  { %vm4983_vm8 = vcmp.ge.f32.partialorder %v4973_v7, 0.0  ;;  %v4987_v13 = vmul.f32 0.2, %v4973_v7  ;;  %vm4984_vm12 = vcmp.ge.f32.partialorder %v4975_v45, 0.0  ;;  %v4988_v56 = vmul.f32 0.2, %v4975_v45  ;;  %6785 = vperm.xlu1 %7318, %v7210_v0   ;;  %6956 = vperm.xlu0 %7321, %v7210_v0  }
 0x456   :  { %v4904_v39 = vadd.f32 %v8405_v19, %v4811_v49  ;;  %v4979_v59 = vadd.f32 %v4978_v61, %v8385_v32  ;;  %v4981_v60 = vadd.f32 %v4980_v17, %v8387_v40  ;;  %v4901_v25 = vsel %vm4893_vm13, %v8394_v58, %v8402_v16  ;;  %v7369_v58 = vld [vmem:[%s8856_s3 + $0x8] sm:$0x3f]  ;;  %v5002_v16 = vpop.permute.xlu1 %5001 }
 0x457   :  { %v4812_v28 = vadd.f32 %v4808_v9, %v4719_v14  ;;  %v4991_v62 = vsel %vm4983_vm8, %v4973_v7, %v4987_v13  ;;  %v4992_v36 = vsel %vm4984_vm12, %v4975_v45, %v4988_v56 }
 0x458   :  { %v4995_v63 = vadd.f32 %v4991_v62, %v4902_v55  ;;  %vm4985_vm14 = vcmp.ge.f32.partialorder %v4979_v59, 0.0  ;;  %v4989_v15 = vmul.f32 0.2, %v4979_v59  ;;  %v4996_v53 = vadd.f32 %v4992_v36, %v4903_v4  ;;  %v8522_v55 = vpop.f32.mrb[86].mxu1 }
 0x459   :  { %v4905_v48 = vadd.f32 %v4901_v25, %v4812_v28  ;;  %vm4986_vm4 = vcmp.ge.f32.partialorder %v4981_v60, 0.0  ;;  %v4990_v10 = vmul.f32 0.2, %v4981_v60  ;;  %v8524_v49 = vpop.f32.mrb[87].mxu1  ;;  %7320 = vset.pattern.permute.xlu1 %v7418_v47 }
 0x45a   :  { %v4993_v19 = vsel %vm4985_vm14, %v4979_v59, %v4989_v15  ;;  %v8526_v4 = vpop.f32.mrb[88].mxu1  ;;  %6950 = vperm.xlu1 %7320, %v7210_v0  }
 0x45b   :  { %v4997_v46 = vadd.f32 %v4993_v19, %v4904_v39  ;;  %v4994_v32 = vsel %vm4986_vm4, %v4981_v60, %v4990_v10  ;;  %v8528_v56 = vpop.f32.mrb[89].mxu1 }
 0x45c   :  { %v4998_v57 = vadd.f32 %v4994_v32, %v4905_v48  ;;  %v8530_v59 = vpop.f32.mrb[90].mxu1 }
 0x45d   :  { %v7291_v40 = vpack.c.bf16 %v4997_v46, %v4995_v63  ;;  %v8532_v25 = vpop.f32.mrb[91].mxu1 }
 0x45e   :  { %v7288_v21 = vpack.c.bf16 %v4998_v57, %v4996_v53  ;;  %v8535_v62 = vpop.f32.mrb[92].mxu1 }
 0x45f   :  { %v8539_v36 = vpop.f32.mrb[93].mxu1 }
 0x460   :  { %7290 = vmatprep.subr.msk.bf16.mxu0 %vm8092_vm9, %v7288_v21  ;;  %v8543_v48 = vpop.f32.mrb[94].mxu1 }
 0x461   :  { %7293 = vmatpush1.bf16.msk.msra.mxu0 %vm8092_vm9, %v7291_v40  ;;  %v8545_v19 = vpop.f32.mrb[95].mxu1 }
 0x464   :  { %7207 = vmatmul.mubr.msk.f32.vlgmr.msra.gmra.mrb[84].mxu0 %vm3216_vm10, %v7369_v58  ;;  %v8549_v47 = vpop.f32.mrb[96].mxu1 }
 0x465   :  { %5278 = vmatprep.mubr.f32.mxu0 %v7413_v5  ;;  %v8551_v57 = vpop.f32.mrb[97].mxu1 }
 0x468   :  { %v8555_v21 = vpop.f32.mrb[98].mxu1 }
 0x537   :  { %v5078_v8 = vpop.f32.mrb[84].mxu0 }
 0x538   :  { %v5079_v2 = vadd.f32 %v5078_v8, %v5002_v16  ;;  %v5080_v23 = vpop.f32.mrb[85].mxu0 }
 0x539   :  { %v5081_v22 = vadd.f32 %v5080_v23, %v5002_v16  ;;  %v8557_v16 = vpop.f32.mrb[99].mxu1 }
 0x53a   :  { %v5083_v41 = vsel %vm1510_vm2, %v5079_v2, 0.0  ;;  %v5097_v24 = vsel %vm1487_vm11, %v5079_v2, 0.0 }
 0x53b   :  { %v5084_v11 = vrot.slane %v5083_v41, 4  ;;  %v5099_v61 = vsel %vm1510_vm2, %v5097_v24, 0.0  ;;  %v5090_v51 = vsel %vm1510_vm2, %v5081_v22, 0.0  ;;  %v5098_v26 = vsel %vm1487_vm11, %v5081_v22, 0.0 }
 0x53c   :  { %v5100_v3 = vrot.slane %v5099_v61, 4  ;;  %v5091_v17 = vrot.slane %v5090_v51, 4  ;;  %v5106_v29 = vsel %vm1510_vm2, %v5098_v26, 0.0 }
 0x53d   :  { %v5085_v38 = vadd.f32 %v5084_v11, %v5083_v41  ;;  %v5107_v18 = vrot.slane %v5106_v29, 4 }
 0x53e   :  { %v5101_v37 = vadd.f32 %v5100_v3, %v5099_v61  ;;  %v5092_v6 = vadd.f32 %v5091_v17, %v5090_v51 }
 0x53f   :  { %v5086_v42 = vrot.slane %v5085_v38, 2  ;;  %v5108_v1 = vadd.f32 %v5107_v18, %v5106_v29 }
 0x540   :  { %v5102_v33 = vrot.slane %v5101_v37, 2  ;;  %v5093_v44 = vrot.slane %v5092_v6, 2 }
 0x541   :  { %v5087_v35 = vadd.f32 %v5086_v42, %v5085_v38  ;;  %v5109_v31 = vrot.slane %v5108_v1, 2 }
 0x542   :  { %v5103_v20 = vadd.f32 %v5102_v33, %v5101_v37  ;;  %v5094_v34 = vadd.f32 %v5093_v44, %v5092_v6 }
 0x543   :  { %v5088_v50 = vrot.slane %v5087_v35, 1  ;;  %v5110_v12 = vadd.f32 %v5109_v31, %v5108_v1 }
 0x544   :  { %v5104_v7 = vrot.slane %v5103_v20, 1  ;;  %v5095_v45 = vrot.slane %v5094_v34, 1 }
 0x545   :  { %v5089_v27 = vadd.f32 %v5088_v50, %v5087_v35  ;;  %v5111_v9 = vrot.slane %v5110_v12, 1 }
 0x546   :  { %v5105_v14 = vadd.f32 %v5104_v7, %v5103_v20  ;;  %v5096_v13 = vadd.f32 %v5095_v45, %v5094_v34 }
 0x547   :  { %v5112_v39 = vadd.f32 %v5111_v9, %v5110_v12 }
 0x548   :  { %v5113_v60 = vsub.f32 %v5089_v27, %v5105_v14 }
 0x549   :  { %v5114_v28 = vsub.f32 %v5096_v13, %v5112_v39 }
 0x54a   :  { %v5115_v63 = vsel %vm1487_vm11, %v5105_v14, %v5113_v60 }
 0x54b   :  { %v5117_v15 = vmul.f32 0.33333334, %v5115_v63  ;;  %v5116_v53 = vsel %vm1487_vm11, %v5112_v39, %v5114_v28 }
 0x54c   :  { %v5118_v10 = vmul.f32 0.33333334, %v5116_v53 }
 0x54d   :  { %v8547_v46 = vsub.f32 %v5079_v2, %v5117_v15  ;;  %v8562_v2 = vpop.f32.mrb[100].mxu1 }
 0x54e   :  { %v5120_v32 = vsub.f32 %v5081_v22, %v5118_v10  ;;  %v8568_v61 = vpop.f32.mrb[101].mxu1 }
 0x54f   :  { %v5121_v40 = vmul.f32 %v8547_v46, %v8547_v46  ;;  %v8571_v17 = vpop.f32.mrb[102].mxu1 }
 0x550   :  { %v5122_v58 = vmul.f32 %v5120_v32, %v5120_v32  ;;  %v8573_v18 = vpop.f32.mrb[103].mxu1 }
 0x551   :  { %v5123_v8 = vsel %vm1510_vm2, %v5121_v40, 0.0  ;;  %v5137_v23 = vsel %vm1487_vm11, %v5121_v40, 0.0  ;;  %v8575_v42 = vpop.f32.mrb[104].mxu1 }
 0x552   :  { %v5124_v41 = vrot.slane %v5123_v8, 4  ;;  %v5139_v22 = vsel %vm1510_vm2, %v5137_v23, 0.0  ;;  %v5130_v24 = vsel %vm1510_vm2, %v5122_v58, 0.0  ;;  %v5138_v11 = vsel %vm1487_vm11, %v5122_v58, 0.0  ;;  %v8577_v44 = vpop.f32.mrb[105].mxu1 }
 0x553   :  { %v5140_v51 = vrot.slane %v5139_v22, 4  ;;  %v5131_v26 = vrot.slane %v5130_v24, 4  ;;  %v5146_v3 = vsel %vm1510_vm2, %v5138_v11, 0.0  ;;  %v8579_v20 = vpop.f32.mrb[106].mxu1 }
 0x554   :  { %v5125_v29 = vadd.f32 %v5124_v41, %v5123_v8  ;;  %v5147_v38 = vrot.slane %v5146_v3, 4  ;;  %v8581_v12 = vpop.f32.mrb[107].mxu1 }
 0x555   :  { %v5141_v37 = vadd.f32 %v5140_v51, %v5139_v22  ;;  %v5132_v6 = vadd.f32 %v5131_v26, %v5130_v24  ;;  %v8583_v45 = vpop.f32.mrb[108].mxu1 }
 0x556   :  { %v5126_v1 = vrot.slane %v5125_v29, 2  ;;  %v5148_v33 = vadd.f32 %v5147_v38, %v5146_v3  ;;  %v8585_v14 = vpop.f32.mrb[109].mxu1  ;;  %v5167_v3 = vpop.permute.xlu0 %5166 }
 0x557   :  { %v5142_v35 = vrot.slane %v5141_v37, 2  ;;  %v5133_v31 = vrot.slane %v5132_v6, 2  ;;  %v8587_v60 = vpop.f32.mrb[110].mxu1 }
 0x558   :  { %v5127_v34 = vadd.f32 %v5126_v1, %v5125_v29  ;;  %v5149_v50 = vrot.slane %v5148_v33, 2  ;;  %v8589_v15 = vpop.f32.mrb[111].mxu1 }
 0x559   :  { %v5143_v0 = vadd.f32 %v5142_v35, %v5141_v37  ;;  %v5134_v7 = vadd.f32 %v5133_v31, %v5132_v6  ;;  %v5173_v6 = vpop.permute.xlu1 %5172 }
 0x55a   :  { %v5128_v27 = vrot.slane %v5127_v34, 1  ;;  %v5150_v9 = vadd.f32 %v5149_v50, %v5148_v33 }
 0x55b   :  { %v5144_v13 = vrot.slane %v5143_v0, 1  ;;  %v5135_v39 = vrot.slane %v5134_v7, 1 }
 0x55c   :  { %v5129_v28 = vadd.f32 %v5128_v27, %v5127_v34  ;;  %v5151_v63 = vrot.slane %v5150_v9, 1 }
 0x55d   :  { %v5145_v53 = vadd.f32 %v5144_v13, %v5143_v0  ;;  %v5136_v10 = vadd.f32 %v5135_v39, %v5134_v7  ;;  %v5201_v13 = vpop.permute.xlu1 %5200  ;;  %v7373_v39 = vld [vmem:[%s8855_s2 + $0x20] sm:$0xff] }
 0x55e   :  { %v5152_v40 = vadd.f32 %v5151_v63, %v5150_v9  ;;  %v7375_v63 = vld [vmem:[#allocation2 + $0x58] sm:$0x7f] }
 0x55f   :  { %v5153_v58 = vsub.f32 %v5129_v28, %v5145_v53  ;;  %v7374_v28 = vld [vmem:[#allocation2 + $0x30] sm:$0x7f] }
 0x560   :  { %v5154_v8 = vsub.f32 %v5136_v10, %v5152_v40  ;;  %v7377_v10 = vld [vmem:[#allocation2 + $0x50] sm:$0x7f] }
 0x561   :  { %v5155_v23 = vsel %vm1487_vm11, %v5145_v53, %v5153_v58  ;;  %v7376_v53 = vld [vmem:[%s8855_s2 + $0x28] sm:$0x1f]  ;;  %v7379_v58 = vld [vmem:[#allocation2 + $0x70] sm:$0x7f] }
 0x562   :  { %v5156_v41 = vsel %vm1487_vm11, %v5152_v40, %v5154_v8  ;;  %v5157_v22 = vmul.f32 0.33333334, %v5155_v23  ;;  %v7378_v40 = vld [vmem:[#allocation2 + $0x78] sm:$0x7f]  ;;  %v7381_v23 = vld [vmem:[#allocation2 + $0x90] sm:$0x7f] }
 0x563   :  { %v5158_v24 = vmul.f32 0.33333334, %v5156_v41  ;;  %v7380_v8 = vld [vmem:[#allocation2 + $0x98] sm:$0x7f] }
 0x564   :  { %v5159_v11 = vadd.f32 1e-05, %v5157_v22  ;;  %v7382_v41 = vld [vmem:[#allocation2 + $0xb8] sm:$0x7f]  ;;  %v7383_v22 = vld [vmem:[#allocation2 + $0xb0] sm:$0x7f] }
 0x565   :  { %v5160_v51 = vadd.f32 1e-05, %v5158_v24  ;;  %v7384_v24 = vld [vmem:[#allocation2 + $0xd8] sm:$0x7f] }
 0x566   :  { %7326 = vrsqrt.f32 %v5159_v11  ;;  %v7385_v11 = vld [vmem:[#allocation2 + $0xd0] sm:$0x7f] }
 0x567   :  { %7328 = vrsqrt.f32 %v5160_v51  ;;  %v7386_v51 = vld [vmem:[#allocation2 + $0xf8] sm:$0x7f] }
 0x570   :  { %v7327_v26 = vpop.eup %7326 }
 0x571   :  { %v7329_v29 = vpop.eup %7328  ;;  %v5163_v38 = vmul.f32 %v7327_v26, %v8547_v46  ;;  %v7370_v46 = vld [vmem:[#allocation2 + $0x18] sm:$0x7f]  ;;  %v7387_v26 = vld [vmem:[#allocation2 + $0xf0] sm:$0x7f] }
 0x572   :  { %v5164_v37 = vmul.f32 %v7329_v29, %v5120_v32  ;;  %v7371_v32 = vld [vmem:[#allocation2 + $0x10] sm:$0x7f] }
 0x573   :  { %v5169_v1 = vmul.f32 %v5167_v3, %v5163_v38 }
 0x574   :  { %v5170_v33 = vmul.f32 %v5167_v3, %v5164_v37  ;;  %v8663_v3 = vpop.f32.mrb[112].mxu1 }
 0x575   :  { %v5175_v35 = vadd.f32 %v5173_v6, %v5169_v1  ;;  %v8665_v29 = vpop.f32.mrb[113].mxu1 }
 0x576   :  { %v5176_v31 = vadd.f32 %v5173_v6, %v5170_v33  ;;  %v6663_v38 = vpop.f32.mrb[114].mxu1  ;;  %v5193_v33 = vpop.permute.xlu1 %5192 }
 0x577   :  { %vm5177_vm13 = vcmp.ge.f32.partialorder %v5175_v35, 0.0  ;;  %v5179_v34 = vmul.f32 0.2, %v5175_v35  ;;  %v6665_v37 = vpop.f32.mrb[115].mxu1 }
 0x578   :  { %vm5178_vm15 = vcmp.ge.f32.partialorder %v5176_v31, 0.0  ;;  %v5180_v50 = vmul.f32 0.2, %v5176_v31  ;;  %v6669_v6 = vpop.f32.mrb[116].mxu1 }
 0x579   :  { %v5181_v0 = vsel %vm5177_vm13, %v5175_v35, %v5179_v34  ;;  %v6671_v1 = vpop.f32.mrb[117].mxu1 }
 0x57a   :  { %v5182_v7 = vsel %vm5178_vm15, %v5176_v31, %v5180_v50  ;;  %v8600_v9 = vadd.f32 %v5181_v0, %v8143_v54  ;;  %v7372_v54 = vld [vmem:[#allocation2 + $0x38] sm:$0x7f] }
 0x57b   :  { %v8597_v27 = vadd.f32 %v5182_v7, %v8139_v52  ;;  %v5203_v52 = vpop.permute.xlu0 %5202 }
 0x57d   :  { %7211 = vmatprep.subr.msk.mxu0 %vm1510_vm2, %v8597_v27 }
 0x57e   :  { %7212 = vmatpush1.msk.msra.mxu0 %vm1510_vm2, %v8600_v9 }
 0x57f   :  { %7213 = vmatmul.mubr.msk.f32.vlgmr.msra.gmra.mrb[86].mxu0 %vm1505_vm3, %v5201_v13  ;;  %7219 = vmatprep.subr.msk.mxu0 %vm32_vm0, %v7370_v46  ;;  %v5198_v0 = vpop.permute.xlu0 %5197 }
 0x580   :  { %7220 = vmatpush1.msk.msra.mxu0 %vm32_vm0, %v7371_v32  ;;  %5284 = vmatprep.mubr.f32.mxu0 %v7413_v5 }
 0x581   :  { %7227 = vmatprep.subr.msk.mxu0 %vm32_vm0, %v7372_v54 }
 0x583   :  { %7214 = vmatmul.mubr.msk.f32.gmra.mrb[88].mxu0 %vm1505_vm3, %v5203_v52 }
 0x584   :  { %5452 = vmatprep.mubr.f32.mxu0 %v7413_v5 }
 0x587   :  { %7221 = vmatmul.mubr.msk.f32.vlgmr.msra.gmra.mrb[90].mxu0 %vm29_vm1, %v7373_v39 }
 0x588   :  { %7228 = vmatpush1.msk.msra.mxu0 %vm32_vm0, %v7374_v28  ;;  %5458 = vmatprep.mubr.f32.mxu0 %v7413_v5 }
 0x589   :  { %7235 = vmatprep.subr.msk.mxu0 %vm32_vm0, %v7375_v63 }
 0x58b   :  { %7222 = vmatmul.mubr.msk.f32.gmra.mrb[92].mxu0 %vm29_vm1, %v7376_v53 }
 0x58c   :  { %5638 = vmatprep.mubr.f32.mxu0 %v7413_v5 }
 0x58f   :  { %7229 = vmatmul.mubr.msk.f32.vlgmr.msra.gmra.mrb[94].mxu0 %vm29_vm1, %v7373_v39 }
 0x590   :  { %7236 = vmatpush1.msk.msra.mxu0 %vm32_vm0, %v7377_v10  ;;  %5644 = vmatprep.mubr.f32.mxu0 %v7413_v5 }
 0x591   :  { %7243 = vmatprep.subr.msk.mxu0 %vm32_vm0, %v7378_v40 }
 0x593   :  { %7230 = vmatmul.mubr.msk.f32.gmra.mrb[96].mxu0 %vm29_vm1, %v7376_v53 }
 0x594   :  { %5824 = vmatprep.mubr.f32.mxu0 %v7413_v5 }
 0x597   :  { %7237 = vmatmul.mubr.msk.f32.vlgmr.msra.gmra.mrb[98].mxu0 %vm29_vm1, %v7373_v39 }
 0x598   :  { %7244 = vmatpush1.msk.msra.mxu0 %vm32_vm0, %v7379_v58  ;;  %5830 = vmatprep.mubr.f32.mxu0 %v7413_v5 }
 0x599   :  { %7251 = vmatprep.subr.msk.mxu0 %vm32_vm0, %v7380_v8 }
 0x59b   :  { %7238 = vmatmul.mubr.msk.f32.gmra.mrb[100].mxu0 %vm29_vm1, %v7376_v53 }
 0x59c   :  { %6010 = vmatprep.mubr.f32.mxu0 %v7413_v5 }
 0x59f   :  { %7245 = vmatmul.mubr.msk.f32.vlgmr.msra.gmra.mrb[102].mxu0 %vm29_vm1, %v7373_v39 }
 0x5a0   :  { %7252 = vmatpush1.msk.msra.mxu0 %vm32_vm0, %v7381_v23  ;;  %6016 = vmatprep.mubr.f32.mxu0 %v7413_v5 }
 0x5a1   :  { %7259 = vmatprep.subr.msk.mxu0 %vm32_vm0, %v7382_v41 }
 0x5a3   :  { %7246 = vmatmul.mubr.msk.f32.gmra.mrb[104].mxu0 %vm29_vm1, %v7376_v53 }
 0x5a4   :  { %6196 = vmatprep.mubr.f32.mxu0 %v7413_v5 }
 0x5a7   :  { %7253 = vmatmul.mubr.msk.f32.vlgmr.msra.gmra.mrb[106].mxu0 %vm29_vm1, %v7373_v39 }
 0x5a8   :  { %7260 = vmatpush1.msk.msra.mxu0 %vm32_vm0, %v7383_v22  ;;  %6202 = vmatprep.mubr.f32.mxu0 %v7413_v5 }
 0x5a9   :  { %7267 = vmatprep.subr.msk.mxu0 %vm32_vm0, %v7384_v24 }
 0x5ab   :  { %7254 = vmatmul.mubr.msk.f32.gmra.mrb[108].mxu0 %vm29_vm1, %v7376_v53 }
 0x5ac   :  { %6382 = vmatprep.mubr.f32.mxu0 %v7413_v5 }
 0x5af   :  { %7261 = vmatmul.mubr.msk.f32.vlgmr.msra.gmra.mrb[110].mxu0 %vm29_vm1, %v7373_v39 }
 0x5b0   :  { %7268 = vmatpush1.msk.msra.mxu0 %vm32_vm0, %v7385_v11  ;;  %6388 = vmatprep.mubr.f32.mxu0 %v7413_v5 }
 0x5b1   :  { %7275 = vmatprep.subr.msk.mxu0 %vm32_vm0, %v7386_v51 }
 0x5b3   :  { %7262 = vmatmul.mubr.msk.f32.gmra.mrb[112].mxu0 %vm29_vm1, %v7376_v53 }
 0x5b4   :  { %6568 = vmatprep.mubr.f32.mxu0 %v7413_v5 }
 0x5b7   :  { %7269 = vmatmul.mubr.msk.f32.vlgmr.msra.gmra.mrb[114].mxu0 %vm29_vm1, %v7373_v39 }
 0x5b8   :  { %7276 = vmatpush1.msk.msra.mxu0 %vm32_vm0, %v7387_v26  ;;  %6574 = vmatprep.mubr.f32.mxu0 %v7413_v5 }
 0x5bb   :  { %7270 = vmatmul.mubr.msk.f32.gmra.mrb[116].mxu0 %vm29_vm1, %v7376_v53 }
 0x5bc   :  { %6754 = vmatprep.mubr.f32.mxu0 %v7413_v5 }
 0x5bf   :  { %7277 = vmatmul.mubr.msk.f32.vlgmr.msra.gmra.mrb[118].mxu0 %vm29_vm1, %v7373_v39 }
 0x5c0   :  { %6760 = vmatprep.mubr.f32.mxu0 %v7413_v5 }
 0x5c3   :  { %7278 = vmatmul.mubr.msk.f32.gmra.mrb[120].mxu0 %vm29_vm1, %v7376_v53 }
 0x652   :  { %v5280_v35 = vpop.f32.mrb[86].mxu0 }
 0x653   :  { %v8667_v31 = vadd.f32 %v5280_v35, %v5193_v33  ;;  %v5282_v34 = vpop.f32.mrb[87].mxu0 }
 0x654   :  { %v8669_v50 = vadd.f32 %v5282_v34, %v5193_v33 }
 0x655   :  { %v6664_v5 = vadd.f32 %v6663_v38, %v8667_v31  ;;  %v5362_v7 = vadd.f32 %v8522_v55, %v8667_v31  ;;  %v8676_v13 = vadd.f32 %v8530_v59, %v8667_v31  ;;  %v8680_v46 = vadd.f32 %v8543_v48, %v8667_v31 }
 0x656   :  { %v6666_v32 = vadd.f32 %v6665_v37, %v8669_v50  ;;  %v5286_v52 = vpop.f32.mrb[88].mxu0  ;;  %v5364_v54 = vadd.f32 %v8524_v49, %v8669_v50  ;;  %v5550_v39 = vadd.f32 %v8532_v25, %v8669_v50  ;;  %v8689_v55 = vadd.f32 %v8545_v19, %v8669_v50 }
 0x657   :  { %vm6674_vm0 = vcmp.ge.f32.partialorder %v6664_v5, 0.0  ;;  %v6678_v59 = vmul.f32 0.2, %v6664_v5  ;;  %v8691_v28 = vadd.f32 %v5286_v52, %v5198_v0  ;;  %v5288_v63 = vpop.f32.mrb[89].mxu0  ;;  %v5376_v10 = vmul.f32 0.2, %v5362_v7 }
 0x658   :  { %vm6675_vm1 = vcmp.ge.f32.partialorder %v6666_v32, 0.0  ;;  %v6679_v48 = vmul.f32 0.2, %v6666_v32  ;;  %v8693_v53 = vadd.f32 %v5288_v63, %v5198_v0  ;;  %vm5372_vm3 = vcmp.ge.f32.partialorder %v5362_v7, 0.0 }
 0x659   :  { %v6670_v40 = vadd.f32 %v6669_v6, %v8691_v28  ;;  %v5377_v49 = vmul.f32 0.2, %v5364_v54  ;;  %v8696_v58 = vsel %vm6674_vm0, %v6664_v5, %v6678_v59  ;;  %vm5373_vm5 = vcmp.ge.f32.partialorder %v5364_v54, 0.0 }
 0x65a   :  { %v8699_v25 = vadd.f32 %v6671_v1, %v8693_v53  ;;  %v5454_v19 = vpop.f32.mrb[90].mxu0  ;;  %v5368_v8 = vadd.f32 %v8526_v4, %v8691_v28  ;;  %v8703_v23 = vsel %vm6675_vm1, %v6666_v32, %v6679_v48  ;;  %v5380_v51 = vsel %vm5372_vm3, %v5362_v7, %v5376_v10 }
 0x65b   :  { %vm6676_vm6 = vcmp.ge.f32.partialorder %v6670_v40, 0.0  ;;  %v6680_v41 = vmul.f32 0.2, %v6670_v40  ;;  %v5455_v22 = vadd.f32 %v5454_v19, %v8667_v31  ;;  %v5456_v24 = vpop.f32.mrb[91].mxu0  ;;  %v5381_v37 = vsel %vm5373_vm5, %v5364_v54, %v5377_v49 }
 0x65c   :  { %v8707_v11 = vmul.f32 0.2, %v8699_v25  ;;  %v5457_v26 = vadd.f32 %v5456_v24, %v8669_v50  ;;  %vm5374_vm7 = vcmp.ge.f32.partialorder %v5368_v8, 0.0  ;;  %v5378_v6 = vmul.f32 0.2, %v5368_v8 }
 0x65d   :  { %vm5465_vm8 = vcmp.ge.f32.partialorder %v5455_v22, 0.0  ;;  %v5469_v38 = vmul.f32 0.2, %v5455_v22  ;;  %v8710_v1 = vsel %vm6676_vm6, %v6670_v40, %v6680_v41  ;;  %v5370_v35 = vadd.f32 %v8528_v56, %v8693_v53 }
 0x65e   :  { %vm5466_vm12 = vcmp.ge.f32.partialorder %v5457_v26, 0.0  ;;  %v5470_v4 = vmul.f32 0.2, %v5457_v26  ;;  %v5460_v33 = vpop.f32.mrb[92].mxu0  ;;  %v5382_v0 = vsel %vm5374_vm7, %v5368_v8, %v5378_v6  ;;  %vm5558_vm14 = vcmp.ge.f32.partialorder %v8676_v13, 0.0 }
 0x65f   :  { %v5473_v34 = vsel %vm5465_vm8, %v5455_v22, %v5469_v38  ;;  %v5461_v5 = vadd.f32 %v5460_v33, %v8691_v28  ;;  %v5462_v7 = vpop.f32.mrb[93].mxu0  ;;  %vm5375_vm4 = vcmp.ge.f32.partialorder %v5370_v35, 0.0  ;;  %v5379_v54 = vmul.f32 0.2, %v5370_v35 }
 0x660   :  { %v5477_v32 = vadd.f32 %v5473_v34, %v5380_v51  ;;  %v5474_v52 = vsel %vm5466_vm12, %v5457_v26, %v5470_v4  ;;  %v5463_v48 = vadd.f32 %v5462_v7, %v8693_v53  ;;  %v5562_v40 = vmul.f32 0.2, %v8676_v13 }
 0x661   :  { %v5478_v59 = vadd.f32 %v5474_v52, %v5381_v37  ;;  %vm5467_vm13 = vcmp.ge.f32.partialorder %v5461_v5, 0.0  ;;  %v5471_v63 = vmul.f32 0.2, %v5461_v5  ;;  %v5383_v10 = vsel %vm5375_vm4, %v5370_v35, %v5379_v54 }
 0x662   :  { %v5640_v56 = vpop.f32.mrb[94].mxu0  ;;  %vm5559_vm15 = vcmp.ge.f32.partialorder %v5550_v39, 0.0  ;;  %v5563_v49 = vmul.f32 0.2, %v5550_v39  ;;  %vm5468_vm0 = vcmp.ge.f32.partialorder %v5463_v48, 0.0  ;;  %v5566_v51 = vsel %vm5558_vm14, %v8676_v13, %v5562_v40 }
 0x663   :  { %v5475_v19 = vsel %vm5467_vm13, %v5461_v5, %v5471_v63  ;;  %v5472_v8 = vmul.f32 0.2, %v5463_v48  ;;  %v5641_v41 = vadd.f32 %v5640_v56, %v8667_v31  ;;  %v5642_v22 = vpop.f32.mrb[95].mxu0  ;;  %v5570_v6 = vadd.f32 %v5566_v51, %v5477_v32 }
 0x664   :  { %v5479_v24 = vadd.f32 %v5475_v19, %v5382_v0  ;;  %v5567_v26 = vsel %vm5559_vm15, %v5550_v39, %v5563_v49  ;;  %v5643_v38 = vadd.f32 %v5642_v22, %v8669_v50  ;;  %v5554_v0 = vadd.f32 %v8535_v62, %v8691_v28 }
 0x665   :  { %v5476_v37 = vsel %vm5468_vm0, %v5463_v48, %v5472_v8  ;;  %vm5651_vm1 = vcmp.ge.f32.partialorder %v5641_v41, 0.0  ;;  %v5655_v4 = vmul.f32 0.2, %v5641_v41  ;;  %v5571_v35 = vadd.f32 %v5567_v26, %v5478_v59 }
 0x666   :  { %v5480_v33 = vadd.f32 %v5476_v37, %v5383_v10  ;;  %vm5652_vm3 = vcmp.ge.f32.partialorder %v5643_v38, 0.0  ;;  %v5656_v34 = vmul.f32 0.2, %v5643_v38  ;;  %v5646_v5 = vpop.f32.mrb[96].mxu0  ;;  %v5556_v13 = vadd.f32 %v8539_v36, %v8693_v53 }
 0x667   :  { %v5659_v7 = vsel %vm5651_vm1, %v5641_v41, %v5655_v4  ;;  %v5647_v52 = vadd.f32 %v5646_v5, %v8691_v28  ;;  %v5648_v39 = vpop.f32.mrb[97].mxu0  ;;  %vm5744_vm5 = vcmp.ge.f32.partialorder %v8680_v46, 0.0  ;;  %vm5560_vm6 = vcmp.ge.f32.partialorder %v5554_v0, 0.0 }
 0x668   :  { %v5663_v54 = vadd.f32 %v5659_v7, %v5570_v6  ;;  %v5660_v63 = vsel %vm5652_vm3, %v5643_v38, %v5656_v34  ;;  %v5649_v32 = vadd.f32 %v5648_v39, %v8693_v53  ;;  %v5564_v48 = vmul.f32 0.2, %v5554_v0 }
 0x669   :  { %v5664_v59 = vadd.f32 %v5660_v63, %v5571_v35  ;;  %vm5653_vm7 = vcmp.ge.f32.partialorder %v5647_v52, 0.0  ;;  %v5657_v10 = vmul.f32 0.2, %v5647_v52  ;;  %vm5561_vm8 = vcmp.ge.f32.partialorder %v5556_v13, 0.0 }
 0x66a   :  { %v5565_v40 = vmul.f32 0.2, %v5556_v13  ;;  %vm5654_vm12 = vcmp.ge.f32.partialorder %v5649_v32, 0.0  ;;  %v5568_v62 = vsel %vm5560_vm6, %v5554_v0, %v5564_v48  ;;  %v5658_v56 = vmul.f32 0.2, %v5649_v32  ;;  %v5826_v36 = vpop.f32.mrb[98].mxu0 }
 0x66b   :  { %v5748_v49 = vmul.f32 0.2, %v8680_v46  ;;  %vm5745_vm14 = vcmp.ge.f32.partialorder %v8689_v55, 0.0  ;;  %v5572_v19 = vadd.f32 %v5568_v62, %v5479_v24  ;;  %v5661_v8 = vsel %vm5653_vm7, %v5647_v52, %v5657_v10  ;;  %v5828_v51 = vpop.f32.mrb[99].mxu0 }
 0x66c   :  { %v5569_v41 = vsel %vm5561_vm8, %v5556_v13, %v5565_v40  ;;  %v5827_v22 = vadd.f32 %v5826_v36, %v8667_v31  ;;  %v5662_v38 = vsel %vm5654_vm12, %v5649_v32, %v5658_v56  ;;  %v5749_v6 = vmul.f32 0.2, %v8689_v55 }
 0x66d   :  { %v5573_v26 = vadd.f32 %v5569_v41, %v5480_v33  ;;  %v5752_v37 = vsel %vm5744_vm5, %v8680_v46, %v5748_v49  ;;  %v5665_v4 = vadd.f32 %v5661_v8, %v5572_v19  ;;  %v5829_v0 = vadd.f32 %v5828_v51, %v8669_v50 }
 0x66e   :  { %v5756_v35 = vadd.f32 %v5752_v37, %v5663_v54  ;;  %vm5837_vm4 = vcmp.ge.f32.partialorder %v5827_v22, 0.0  ;;  %v5841_v34 = vmul.f32 0.2, %v5827_v22  ;;  %v5832_v5 = vpop.f32.mrb[100].mxu0  ;;  %v5753_v24 = vsel %vm5745_vm14, %v8689_v55, %v5749_v6 }
 0x66f   :  { %v5666_v7 = vadd.f32 %v5662_v38, %v5573_v26  ;;  %v5740_v33 = vadd.f32 %v8549_v47, %v8691_v28  ;;  %v5834_v52 = vpop.f32.mrb[101].mxu0  ;;  %v5757_v46 = vadd.f32 %v5753_v24, %v5664_v59  ;;  %v5833_v39 = vadd.f32 %v5832_v5, %v8691_v28 }
 0x670   :  { %v5845_v13 = vsel %vm5837_vm4, %v5827_v22, %v5841_v34  ;;  %v5742_v54 = vadd.f32 %v8551_v57, %v8693_v53  ;;  %vm5838_vm13 = vcmp.ge.f32.partialorder %v5829_v0, 0.0  ;;  %v5842_v32 = vmul.f32 0.2, %v5829_v0 }
 0x671   :  { %v5849_v63 = vadd.f32 %v5845_v13, %v5756_v35  ;;  %vm5746_vm15 = vcmp.ge.f32.partialorder %v5740_v33, 0.0  ;;  %v5750_v48 = vmul.f32 0.2, %v5740_v33  ;;  %vm5839_vm0 = vcmp.ge.f32.partialorder %v5833_v39, 0.0 }
 0x672   :  { %v5843_v55 = vmul.f32 0.2, %v5833_v39  ;;  %vm5747_vm1 = vcmp.ge.f32.partialorder %v5742_v54, 0.0  ;;  %v5846_v10 = vsel %vm5838_vm13, %v5829_v0, %v5842_v32  ;;  %v5751_v40 = vmul.f32 0.2, %v5742_v54  ;;  %v6012_v62 = vpop.f32.mrb[102].mxu0 }
 0x673   :  { %v5835_v47 = vadd.f32 %v5834_v52, %v8693_v53  ;;  %v5920_v59 = vadd.f32 %v8555_v21, %v8667_v31  ;;  %v5850_v56 = vadd.f32 %v5846_v10, %v5757_v46  ;;  %v5754_v49 = vsel %vm5746_vm15, %v5740_v33, %v5750_v48  ;;  %v6014_v19 = vpop.f32.mrb[103].mxu0 }
 0x674   :  { %v5847_v36 = vsel %vm5839_vm0, %v5833_v39, %v5843_v55  ;;  %v6013_v57 = vadd.f32 %v6012_v62, %v8667_v31  ;;  %v5758_v8 = vadd.f32 %v5754_v49, %v5665_v4  ;;  %v5755_v41 = vsel %vm5747_vm1, %v5742_v54, %v5751_v40 }
 0x675   :  { %vm5840_vm3 = vcmp.ge.f32.partialorder %v5835_v47, 0.0  ;;  %v5844_v22 = vmul.f32 0.2, %v5835_v47  ;;  %v5759_v51 = vadd.f32 %v5755_v41, %v5666_v7  ;;  %vm5930_vm5 = vcmp.ge.f32.partialorder %v5920_v59, 0.0 }
 0x676   :  { %v5934_v26 = vmul.f32 0.2, %v5920_v59  ;;  %vm6023_vm6 = vcmp.ge.f32.partialorder %v6013_v57, 0.0  ;;  %v6018_v38 = vpop.f32.mrb[104].mxu0  ;;  %v5851_v37 = vadd.f32 %v5847_v36, %v5758_v8  ;;  %v6027_v35 = vmul.f32 0.2, %v6013_v57 }
 0x677   :  { %v5848_v6 = vsel %vm5840_vm3, %v5835_v47, %v5844_v22  ;;  %v5922_v21 = vadd.f32 %v8557_v16, %v8669_v50  ;;  %v6020_v34 = vpop.f32.mrb[105].mxu0  ;;  %v6015_v0 = vadd.f32 %v6014_v19, %v8669_v50  ;;  %v5926_v4 = vadd.f32 %v8562_v2, %v8691_v28 }
 0x678   :  { %v5852_v5 = vadd.f32 %v5848_v6, %v5759_v51  ;;  %v5938_v24 = vsel %vm5930_vm5, %v5920_v59, %v5934_v26  ;;  %v6031_v7 = vsel %vm6023_vm6, %v6013_v57, %v6027_v35  ;;  %v6019_v16 = vadd.f32 %v6018_v38, %v8691_v28 }
 0x679   :  { %v5942_v33 = vadd.f32 %v5938_v24, %v5849_v63  ;;  %vm5931_vm7 = vcmp.ge.f32.partialorder %v5922_v21, 0.0  ;;  %v5935_v52 = vmul.f32 0.2, %v5922_v21  ;;  %vm6024_vm8 = vcmp.ge.f32.partialorder %v6015_v0, 0.0 }
 0x67a   :  { %v6028_v13 = vmul.f32 0.2, %v6015_v0  ;;  %vm5932_vm12 = vcmp.ge.f32.partialorder %v5926_v4, 0.0  ;;  %v5936_v46 = vmul.f32 0.2, %v5926_v4  ;;  %v5928_v32 = vadd.f32 %v8568_v61, %v8693_v53  ;;  %v6198_v48 = vpop.f32.mrb[106].mxu0 }
 0x67b   :  { %v6035_v39 = vadd.f32 %v6031_v7, %v5942_v33  ;;  %v5939_v54 = vsel %vm5931_vm7, %v5922_v21, %v5935_v52  ;;  %v6021_v2 = vadd.f32 %v6020_v34, %v8693_v53  ;;  %v6200_v63 = vpop.f32.mrb[107].mxu0  ;;  %vm6025_vm14 = vcmp.ge.f32.partialorder %v6019_v16, 0.0 }
 0x67c   :  { %v5943_v55 = vadd.f32 %v5939_v54, %v5850_v56  ;;  %v6032_v10 = vsel %vm6024_vm8, %v6015_v0, %v6028_v13  ;;  %v5940_v40 = vsel %vm5932_vm12, %v5926_v4, %v5936_v46  ;;  %v6029_v59 = vmul.f32 0.2, %v6019_v16 }
 0x67d   :  { %v5944_v47 = vadd.f32 %v5940_v40, %v5851_v37  ;;  %vm5933_vm4 = vcmp.ge.f32.partialorder %v5928_v32, 0.0  ;;  %v5937_v49 = vmul.f32 0.2, %v5928_v32  ;;  %vm6026_vm13 = vcmp.ge.f32.partialorder %v6021_v2, 0.0 }
 0x67e   :  { %v6036_v62 = vadd.f32 %v6032_v10, %v5943_v55  ;;  %v6030_v36 = vmul.f32 0.2, %v6021_v2  ;;  %v6204_v57 = vpop.f32.mrb[108].mxu0  ;;  %v6033_v19 = vsel %vm6025_vm14, %v6019_v16, %v6029_v59  ;;  %v6106_v61 = vadd.f32 %v8571_v17, %v8667_v31 }
 0x67f   :  { %v6199_v56 = vadd.f32 %v6198_v48, %v8667_v31  ;;  %v6108_v8 = vadd.f32 %v8573_v18, %v8669_v50  ;;  %v6206_v41 = vpop.f32.mrb[109].mxu0  ;;  %v6037_v22 = vadd.f32 %v6033_v19, %v5944_v47  ;;  %v5941_v51 = vsel %vm5933_vm4, %v5928_v32, %v5937_v49 }
 0x680   :  { %v6034_v26 = vsel %vm6026_vm13, %v6021_v2, %v6030_v36  ;;  %v6201_v38 = vadd.f32 %v6200_v63, %v8669_v50  ;;  %v5945_v37 = vadd.f32 %v5941_v51, %v5852_v5  ;;  %vm6116_vm15 = vcmp.ge.f32.partialorder %v6106_v61, 0.0 }
 0x681   :  { %v6120_v6 = vmul.f32 0.2, %v6106_v61  ;;  %vm6209_vm0 = vcmp.ge.f32.partialorder %v6199_v56, 0.0  ;;  %v6213_v35 = vmul.f32 0.2, %v6199_v56  ;;  %vm6117_vm1 = vcmp.ge.f32.partialorder %v6108_v8, 0.0 }
 0x682   :  { %v6121_v21 = vmul.f32 0.2, %v6108_v8  ;;  %vm6210_vm3 = vcmp.ge.f32.partialorder %v6201_v38, 0.0  ;;  %v6038_v17 = vadd.f32 %v6034_v26, %v5945_v37  ;;  %v6214_v24 = vmul.f32 0.2, %v6201_v38  ;;  %v6384_v0 = vpop.f32.mrb[110].mxu0 }
 0x683   :  { %v6124_v34 = vsel %vm6116_vm15, %v6106_v61, %v6120_v6  ;;  %v6112_v18 = vadd.f32 %v8575_v42, %v8691_v28  ;;  %v6217_v33 = vsel %vm6209_vm0, %v6199_v56, %v6213_v35  ;;  %v6205_v52 = vadd.f32 %v6204_v57, %v8691_v28  ;;  %v6386_v5 = vpop.f32.mrb[111].mxu0 }
 0x684   :  { %v6128_v4 = vadd.f32 %v6124_v34, %v6035_v39  ;;  %v6125_v7 = vsel %vm6117_vm1, %v6108_v8, %v6121_v21  ;;  %v6218_v46 = vsel %vm6210_vm3, %v6201_v38, %v6214_v24  ;;  %v6114_v48 = vadd.f32 %v8577_v44, %v8693_v53 }
 0x685   :  { %v6129_v13 = vadd.f32 %v6125_v7, %v6036_v62  ;;  %vm6118_vm5 = vcmp.ge.f32.partialorder %v6112_v18, 0.0  ;;  %v6122_v54 = vmul.f32 0.2, %v6112_v18  ;;  %vm6211_vm6 = vcmp.ge.f32.partialorder %v6205_v52, 0.0 }
 0x686   :  { %v6221_v16 = vadd.f32 %v6217_v33, %v6128_v4  ;;  %v6215_v32 = vmul.f32 0.2, %v6205_v52  ;;  %v6390_v55 = vpop.f32.mrb[112].mxu0  ;;  %v6207_v39 = vadd.f32 %v6206_v41, %v8693_v53  ;;  %v6292_v40 = vadd.f32 %v8579_v20, %v8667_v31 }
 0x687   :  { %v6222_v10 = vadd.f32 %v6218_v46, %v6129_v13  ;;  %v6126_v42 = vsel %vm6118_vm5, %v6112_v18, %v6122_v54  ;;  %v6392_v2 = vpop.f32.mrb[113].mxu0  ;;  %vm6119_vm7 = vcmp.ge.f32.partialorder %v6114_v48, 0.0  ;;  %v6123_v59 = vmul.f32 0.2, %v6114_v48 }
 0x688   :  { %v6130_v63 = vadd.f32 %v6126_v42, %v6037_v22  ;;  %v6219_v47 = vsel %vm6211_vm6, %v6205_v52, %v6215_v32  ;;  %vm6212_vm8 = vcmp.ge.f32.partialorder %v6207_v39, 0.0  ;;  %v6216_v62 = vmul.f32 0.2, %v6207_v39 }
 0x689   :  { %vm6302_vm12 = vcmp.ge.f32.partialorder %v6292_v40, 0.0  ;;  %v6306_v49 = vmul.f32 0.2, %v6292_v40  ;;  %v6127_v57 = vsel %vm6119_vm7, %v6114_v48, %v6123_v59  ;;  %v6385_v44 = vadd.f32 %v6384_v0, %v8667_v31 }
 0x68a   :  { %v6223_v36 = vadd.f32 %v6219_v47, %v6130_v63  ;;  %v6294_v19 = vadd.f32 %v8581_v12, %v8669_v50  ;;  %v6570_v61 = vpop.f32.mrb[114].mxu0  ;;  %v6131_v56 = vadd.f32 %v6127_v57, %v6038_v17  ;;  %v6220_v8 = vsel %vm6212_vm8, %v6207_v39, %v6216_v62 }
 0x68b   :  { %v6310_v20 = vsel %vm6302_vm12, %v6292_v40, %v6306_v49  ;;  %v6387_v41 = vadd.f32 %v6386_v5, %v8669_v50  ;;  %v6572_v22 = vpop.f32.mrb[115].mxu0  ;;  %vm6395_vm14 = vcmp.ge.f32.partialorder %v6385_v44, 0.0  ;;  %v6399_v26 = vmul.f32 0.2, %v6385_v44 }
 0x68c   :  { %v6314_v51 = vadd.f32 %v6310_v20, %v6221_v16  ;;  %vm6303_vm4 = vcmp.ge.f32.partialorder %v6294_v19, 0.0  ;;  %v6224_v38 = vadd.f32 %v6220_v8, %v6131_v56  ;;  %v6307_v37 = vmul.f32 0.2, %v6294_v19 }
 0x68d   :  { %vm6396_vm13 = vcmp.ge.f32.partialorder %v6387_v41, 0.0  ;;  %v6400_v6 = vmul.f32 0.2, %v6387_v41  ;;  %v6403_v35 = vsel %vm6395_vm14, %v6385_v44, %v6399_v26  ;;  %v6298_v21 = vadd.f32 %v8583_v45, %v8691_v28 }
 0x68e   :  { %v6391_v12 = vadd.f32 %v6390_v55, %v8691_v28  ;;  %v6300_v17 = vadd.f32 %v8585_v14, %v8693_v53  ;;  %v6576_v34 = vpop.f32.mrb[116].mxu0  ;;  %v6407_v24 = vadd.f32 %v6403_v35, %v6314_v51  ;;  %v6311_v18 = vsel %vm6303_vm4, %v6294_v19, %v6307_v37 }
 0x68f   :  { %v6404_v0 = vsel %vm6396_vm13, %v6387_v41, %v6400_v6  ;;  %v6393_v4 = vadd.f32 %v6392_v2, %v8693_v53  ;;  %v6578_v33 = vpop.f32.mrb[117].mxu0  ;;  %v6315_v7 = vadd.f32 %v6311_v18, %v6222_v10  ;;  %vm6304_vm15 = vcmp.ge.f32.partialorder %v6298_v21, 0.0 }
 0x690   :  { %v6308_v52 = vmul.f32 0.2, %v6298_v21  ;;  %vm6397_vm0 = vcmp.ge.f32.partialorder %v6391_v12, 0.0  ;;  %v6401_v5 = vmul.f32 0.2, %v6391_v12  ;;  %vm6305_vm1 = vcmp.ge.f32.partialorder %v6300_v17, 0.0 }
 0x691   :  { %v6309_v13 = vmul.f32 0.2, %v6300_v17  ;;  %vm6398_vm3 = vcmp.ge.f32.partialorder %v6393_v4, 0.0  ;;  %v6408_v45 = vadd.f32 %v6404_v0, %v6315_v7  ;;  %v6402_v54 = vmul.f32 0.2, %v6393_v4 }
 0x692   :  { %v6312_v46 = vsel %vm6304_vm15, %v6298_v21, %v6308_v52  ;;  %v6478_v14 = vadd.f32 %v8587_v60, %v8667_v31  ;;  %v6756_v16 = vpop.f32.mrb[118].mxu0  ;;  %v6405_v48 = vsel %vm6397_vm0, %v6391_v12, %v6401_v5  ;;  %v6571_v42 = vadd.f32 %v6570_v61, %v8667_v31 }
 0x693   :  { %v6316_v32 = vadd.f32 %v6312_v46, %v6223_v36  ;;  %v6313_v55 = vsel %vm6305_vm1, %v6300_v17, %v6309_v13  ;;  %v6758_v10 = vpop.f32.mrb[119].mxu0  ;;  %v6406_v40 = vsel %vm6398_vm3, %v6393_v4, %v6402_v54  ;;  %v6480_v59 = vadd.f32 %v8589_v15, %v8669_v50 }
 0x694   :  { %v6317_v39 = vadd.f32 %v6313_v55, %v6224_v38  ;;  %vm6488_vm5 = vcmp.ge.f32.partialorder %v6478_v14, 0.0  ;;  %v6492_v2 = vmul.f32 0.2, %v6478_v14  ;;  %vm6581_vm6 = vcmp.ge.f32.partialorder %v6571_v42, 0.0 }
 0x695   :  { %v6409_v63 = vadd.f32 %v6405_v48, %v6316_v32  ;;  %v6585_v47 = vmul.f32 0.2, %v6571_v42  ;;  %vm6677_vm7 = vcmp.ge.f32.partialorder %v8699_v25, 0.0  ;;  %v6573_v49 = vadd.f32 %v6572_v22, %v8669_v50 }
 0x696   :  { %v6410_v60 = vadd.f32 %v6406_v40, %v6317_v39  ;;  %v6496_v62 = vsel %vm6488_vm5, %v6478_v14, %v6492_v2  ;;  %v6484_v36 = vadd.f32 %v8663_v3, %v8691_v28  ;;  %v6762_v57 = vpop.f32.mrb[120].mxu0  ;;  %vm6489_vm8 = vcmp.ge.f32.partialorder %v6480_v59, 0.0 }
 0x697   :  { %v6500_v44 = vadd.f32 %v6496_v62, %v6407_v24  ;;  %v6589_v19 = vsel %vm6581_vm6, %v6571_v42, %v6585_v47  ;;  %v6493_v61 = vmul.f32 0.2, %v6480_v59  ;;  %v6764_v56 = vpop.f32.mrb[121].mxu0  ;;  %vm6582_vm12 = vcmp.ge.f32.partialorder %v6573_v49, 0.0 }
 0x698   :  { %v6586_v8 = vmul.f32 0.2, %v6573_v49  ;;  %vm6490_vm14 = vcmp.ge.f32.partialorder %v6484_v36, 0.0  ;;  %v6494_v20 = vmul.f32 0.2, %v6484_v36  ;;  %v6577_v51 = vadd.f32 %v6576_v34, %v8691_v28 }
 0x699   :  { %v6593_v15 = vadd.f32 %v6589_v19, %v6500_v44  ;;  %v6497_v41 = vsel %vm6489_vm8, %v6480_v59, %v6493_v61  ;;  %v6486_v22 = vadd.f32 %v8665_v29, %v8693_v53  ;;  %v6579_v37 = vadd.f32 %v6578_v33, %v8693_v53 }
 0x69a   :  { %v6501_v26 = vadd.f32 %v6497_v41, %v6408_v45  ;;  %v6590_v38 = vsel %vm6582_vm12, %v6573_v49, %v6586_v8  ;;  %v6498_v3 = vsel %vm6490_vm14, %v6484_v36, %v6494_v20  ;;  %vm6583_vm4 = vcmp.ge.f32.partialorder %v6577_v51, 0.0 }
 0x69b   :  { %v6502_v6 = vadd.f32 %v6498_v3, %v6409_v63  ;;  %v6587_v35 = vmul.f32 0.2, %v6577_v51  ;;  %vm6491_vm13 = vcmp.ge.f32.partialorder %v6486_v22, 0.0  ;;  %v6495_v12 = vmul.f32 0.2, %v6486_v22 }
 0x69c   :  { %v6594_v21 = vadd.f32 %v6590_v38, %v6501_v26  ;;  %vm6584_vm15 = vcmp.ge.f32.partialorder %v6579_v37, 0.0  ;;  %v6588_v17 = vmul.f32 0.2, %v6579_v37  ;;  %v6686_v18 = vadd.f32 %v8696_v58, %v6593_v15 }
 0x69d   :  { %v6591_v24 = vsel %vm6583_vm4, %v6577_v51, %v6587_v35  ;;  %v6757_v34 = vadd.f32 %v6756_v16, %v8667_v31  ;;  %v6759_v29 = vadd.f32 %v6758_v10, %v8669_v50  ;;  %v6499_v4 = vsel %vm6491_vm13, %v6486_v22, %v6495_v12 }
 0x69e   :  { %v6595_v0 = vadd.f32 %v6591_v24, %v6502_v6  ;;  %v6592_v7 = vsel %vm6584_vm15, %v6579_v37, %v6588_v17  ;;  %v6687_v33 = vadd.f32 %v8703_v23, %v6594_v21  ;;  %v6503_v52 = vadd.f32 %v6499_v4, %v6410_v60 }
 0x69f   :  { %vm6767_vm0 = vcmp.ge.f32.partialorder %v6757_v34, 0.0  ;;  %v6771_v5 = vmul.f32 0.2, %v6757_v34  ;;  %vm6768_vm1 = vcmp.ge.f32.partialorder %v6759_v29, 0.0  ;;  %v6772_v13 = vmul.f32 0.2, %v6759_v29 }
 0x6a0   :  { %v6688_v45 = vadd.f32 %v8710_v1, %v6595_v0  ;;  %v6763_v46 = vadd.f32 %v6762_v57, %v8691_v28  ;;  %v6765_v58 = vadd.f32 %v6764_v56, %v8693_v53  ;;  %v6685_v31 = vsel %vm6677_vm7, %v8699_v25, %v8707_v11  ;;  %v7388_v25 = vld [vmem:[%s8856_s3 + $0x10] sm:$0x3f]  ;;  %v6786_v11 = vpop.permute.xlu1 %6785  ;;  %s7421_s3 = smov [#allocation3]  }
 0x6a1   :  { %v6596_v50 = vadd.f32 %v6592_v7, %v6503_v52  ;;  %v6775_v54 = vsel %vm6767_vm0, %v6757_v34, %v6771_v5  ;;  %v6776_v23 = vsel %vm6768_vm1, %v6759_v29, %v6772_v13  ;;  %s6977_s29 = sshll.u32 %s7421_s3, 4  ;;  %s6978_s29 = int_to_ptr.vmem [resolvable:$true] %s6977_s29 }
 0x6a2   :  { %v6779_v14 = vadd.f32 %v6775_v54, %v6686_v18  ;;  %vm6769_vm3 = vcmp.ge.f32.partialorder %v6763_v46, 0.0  ;;  %v6773_v16 = vmul.f32 0.2, %v6763_v46  ;;  %v6780_v32 = vadd.f32 %v6776_v23, %v6687_v33  ;;  %s7389_s30 = scalar_lea.vmem %s6978_s29, 256  ;;  %p7394_p1 = scmp.lt.s32.totalorder %s6978_s29, %s6978_s29 }
 0x6a3   :  { %v6689_v48 = vadd.f32 %v6685_v31, %v6596_v50  ;;  %vm6770_vm5 = vcmp.ge.f32.partialorder %v6765_v58, 0.0  ;;  %v6774_v55 = vmul.f32 0.2, %v6765_v58  ;;  %p7390_p0 = scmp.ne.s32.totalorder %s6978_s29, %s7389_s30  ;;  %p7395_p2 = scmp.lt.s32.totalorder %s7389_s30, %s7389_s30 }
 0x6a4   :  { %v6777_v1 = vsel %vm6769_vm3, %v6763_v46, %v6773_v16 }
 0x6a5   :  { %v6781_v42 = vadd.f32 %v6777_v1, %v6688_v45  ;;  %v6778_v28 = vsel %vm6770_vm5, %v6765_v58, %v6774_v55  ;;  %p7396_p3 = por %p7395_p2, %p7394_p1 }
 0x6a6   :  { %v6782_v10 = vadd.f32 %v6778_v28, %v6689_v48 }
 0x6a7   :  { %v7297_v53 = vpack.c.bf16 %v6781_v42, %v6779_v14  ;;  %p7397_p4 = pnand %p7396_p3, %p7390_p0 }
 0x6a8   :  { %v7294_v39 = vpack.c.bf16 %v6782_v10, %v6780_v32 }
 0x6aa   :  { %7296 = vmatprep.subr.msk.bf16.mxu1 %vm8092_vm9, %v7294_v39 }
 0x6ab   :  { %7299 = vmatpush1.bf16.msk.msra.mxu1 %vm8092_vm9, %v7297_v53 }
 0x6ae   :  { %7281 = vmatmul.mubr.msk.f32.vlgmr.msra.gmra.mrb[118].mxu1 %vm3216_vm10, %v7388_v25 }
 0x781   :  { %v6862_v40 = vpop.f32.mrb[118].mxu1 }
 0x782   :  { %v6863_v2 = vadd.f32 %v6862_v40, %v6786_v11  ;;  %v6864_v63 = vpop.f32.mrb[119].mxu1 }
 0x783   :  { %v6865_v47 = vadd.f32 %v6864_v63, %v6786_v11 }
 0x784   :  { %v6867_v59 = vsel %vm1510_vm2, %v6863_v2, 0.0  ;;  %v6881_v60 = vsel %vm1487_vm11, %v6863_v2, 0.0 }
 0x785   :  { %v6868_v62 = vrot.slane %v6867_v59, 4  ;;  %v6883_v30 = vsel %vm1510_vm2, %v6881_v60, 0.0  ;;  %v6874_v49 = vsel %vm1510_vm2, %v6865_v47, 0.0  ;;  %v6882_v36 = vsel %vm1487_vm11, %v6865_v47, 0.0 }
 0x786   :  { %v6884_v57 = vrot.slane %v6883_v30, 4  ;;  %v6875_v44 = vrot.slane %v6874_v49, 4  ;;  %v6890_v19 = vsel %vm1510_vm2, %v6882_v36, 0.0 }
 0x787   :  { %v6869_v61 = vadd.f32 %v6868_v62, %v6867_v59  ;;  %v6891_v56 = vrot.slane %v6890_v19, 4 }
 0x788   :  { %v6885_v8 = vadd.f32 %v6884_v57, %v6883_v30  ;;  %v6876_v20 = vadd.f32 %v6875_v44, %v6874_v49 }
 0x789   :  { %v6870_v15 = vrot.slane %v6869_v61, 2  ;;  %v6892_v41 = vadd.f32 %v6891_v56, %v6890_v19 }
 0x78a   :  { %v6886_v51 = vrot.slane %v6885_v8, 2  ;;  %v6877_v22 = vrot.slane %v6876_v20, 2 }
 0x78b   :  { %v6871_v26 = vadd.f32 %v6870_v15, %v6869_v61  ;;  %v6893_v38 = vrot.slane %v6892_v41, 2 }
 0x78c   :  { %v6887_v3 = vadd.f32 %v6886_v51, %v6885_v8  ;;  %v6878_v37 = vadd.f32 %v6877_v22, %v6876_v20 }
 0x78d   :  { %v6872_v6 = vrot.slane %v6871_v26, 1  ;;  %v6894_v35 = vadd.f32 %v6893_v38, %v6892_v41  ;;  %v6951_v38 = vpop.permute.xlu1 %6950 }
 0x78e   :  { %v6888_v21 = vrot.slane %v6887_v3, 1  ;;  %v6879_v12 = vrot.slane %v6878_v37, 1 }
 0x78f   :  { %v6873_v17 = vadd.f32 %v6872_v6, %v6871_v26  ;;  %v6895_v24 = vrot.slane %v6894_v35, 1 }
 0x790   :  { %v6889_v18 = vadd.f32 %v6888_v21, %v6887_v3  ;;  %v6880_v34 = vadd.f32 %v6879_v12, %v6878_v37 }
 0x791   :  { %v6896_v29 = vadd.f32 %v6895_v24, %v6894_v35  ;;  %v6957_v35 = vpop.permute.xlu0 %6956 }
 0x792   :  { %v6897_v0 = vsub.f32 %v6873_v17, %v6889_v18 }
 0x793   :  { %v6898_v4 = vsub.f32 %v6880_v34, %v6896_v29 }
 0x794   :  { %v6899_v7 = vsel %vm1487_vm11, %v6889_v18, %v6897_v0 }
 0x795   :  { %v6900_v33 = vsel %vm1487_vm11, %v6896_v29, %v6898_v4  ;;  %v6901_v52 = vmul.f32 0.33333334, %v6899_v7 }
 0x796   :  { %v6902_v5 = vmul.f32 0.33333334, %v6900_v33 }
 0x797   :  { %v6903_v13 = vsub.f32 %v6863_v2, %v6901_v52 }
 0x798   :  { %v6904_v45 = vsub.f32 %v6865_v47, %v6902_v5 }
 0x799   :  { %v6905_v46 = vmul.f32 %v6903_v13, %v6903_v13 }
 0x79a   :  { %v6906_v58 = vmul.f32 %v6904_v45, %v6904_v45 }
 0x79b   :  { %v6907_v31 = vsel %vm1510_vm2, %v6905_v46, 0.0  ;;  %v6921_v50 = vsel %vm1487_vm11, %v6905_v46, 0.0 }
 0x79c   :  { %v6908_v54 = vrot.slane %v6907_v31, 4  ;;  %v6914_v14 = vsel %vm1510_vm2, %v6906_v58, 0.0  ;;  %v6922_v23 = vsel %vm1487_vm11, %v6906_v58, 0.0  ;;  %v6923_v16 = vsel %vm1510_vm2, %v6921_v50, 0.0 }
 0x79d   :  { %v6915_v32 = vrot.slane %v6914_v14, 4  ;;  %v6924_v48 = vrot.slane %v6923_v16, 4  ;;  %v6930_v55 = vsel %vm1510_vm2, %v6922_v23, 0.0 }
 0x79e   :  { %v6909_v1 = vadd.f32 %v6908_v54, %v6907_v31  ;;  %v6931_v42 = vrot.slane %v6930_v55, 4 }
 0x79f   :  { %v6916_v28 = vadd.f32 %v6915_v32, %v6914_v14  ;;  %v6925_v10 = vadd.f32 %v6924_v48, %v6923_v16 }
 0x7a0   :  { %v6910_v53 = vrot.slane %v6909_v1, 2  ;;  %v6932_v39 = vadd.f32 %v6931_v42, %v6930_v55 }
 0x7a1   :  { %v6917_v25 = vrot.slane %v6916_v28, 2  ;;  %v6926_v11 = vrot.slane %v6925_v10, 2 }
 0x7a2   :  { %v6911_v40 = vadd.f32 %v6910_v53, %v6909_v1  ;;  %v6933_v2 = vrot.slane %v6932_v39, 2 }
 0x7a3   :  { %v6918_v63 = vadd.f32 %v6917_v25, %v6916_v28  ;;  %v6927_v47 = vadd.f32 %v6926_v11, %v6925_v10 }
 0x7a4   :  { %v6912_v59 = vrot.slane %v6911_v40, 1  ;;  %v6934_v60 = vadd.f32 %v6933_v2, %v6932_v39 }
 0x7a5   :  { %v6919_v62 = vrot.slane %v6918_v63, 1  ;;  %v6928_v30 = vrot.slane %v6927_v47, 1 }
 0x7a6   :  { %v6913_v49 = vadd.f32 %v6912_v59, %v6911_v40  ;;  %v6935_v36 = vrot.slane %v6934_v60, 1 }
 0x7a7   :  { %v6920_v57 = vadd.f32 %v6919_v62, %v6918_v63  ;;  %v6929_v44 = vadd.f32 %v6928_v30, %v6927_v47 }
 0x7a8   :  { %v6936_v19 = vadd.f32 %v6935_v36, %v6934_v60 }
 0x7a9   :  { %v6937_v61 = vsub.f32 %v6913_v49, %v6929_v44 }
 0x7aa   :  { %v6938_v56 = vsub.f32 %v6920_v57, %v6936_v19 }
 0x7ab   :  { %v6939_v8 = vsel %vm1487_vm11, %v6929_v44, %v6937_v61 }
 0x7ac   :  { %v6940_v20 = vsel %vm1487_vm11, %v6936_v19, %v6938_v56  ;;  %v6941_v15 = vmul.f32 0.33333334, %v6939_v8 }
 0x7ad   :  { %v6942_v41 = vmul.f32 0.33333334, %v6940_v20 }
 0x7ae   :  { %v6943_v51 = vadd.f32 1e-05, %v6941_v15 }
 0x7af   :  { %v6944_v22 = vadd.f32 1e-05, %v6942_v41 }
 0x7b0   :  { %7330 = vrsqrt.f32 %v6943_v51 }
 0x7b1   :  { %7332 = vrsqrt.f32 %v6944_v22 }
 0x7ba   :  { %v7331_v26 = vpop.eup %7330 }
 0x7bb   :  { %v7333_v3 = vpop.eup %7332  ;;  %v6947_v37 = vmul.f32 %v7331_v26, %v6903_v13 }
 0x7bc   :  { %v6948_v6 = vmul.f32 %v7333_v3, %v6904_v45 }
 0x7bd   :  { %v6953_v21 = vmul.f32 %v6951_v38, %v6947_v37 }
 0x7be   :  { %v6954_v12 = vmul.f32 %v6951_v38, %v6948_v6 }
 0x7bf   :  { %v6959_v17 = vadd.f32 %v6957_v35, %v6953_v21 }
 0x7c0   :  { %v6960_v24 = vadd.f32 %v6957_v35, %v6954_v12 }
 0x7c1   :  { %vm6961_vm2 = vcmp.ge.f32.partialorder %v6959_v17, 0.0  ;;  %v6963_v18 = vmul.f32 0.2, %v6959_v17 }
 0x7c2   :  { %vm6962_vm9 = vcmp.ge.f32.partialorder %v6960_v24, 0.0  ;;  %v6964_v43 = vmul.f32 0.2, %v6960_v24 }
 0x7c3   :  { %v6965_v34 = vsel %vm6961_vm2, %v6959_v17, %v6963_v18 }
 0x7c4   :  { %v6966_v29 = vsel %vm6962_vm9, %v6960_v24, %v6964_v43  ;;  %v6967_v0 = vadd.f32 %v6965_v34, %v8600_v9 }
 0x7c5   :  { %v6968_v4 = vadd.f32 %v6966_v29, %v8597_v27 }
 0x7c6   :  { %6969 = vst [vmem:[#allocation3] sm:$0x3f] %v6967_v0 }
 0x7c7   :  { %6970 = vst [vmem:[#allocation3 + $0x8] sm:$0x3f] %v6968_v4 }
 0x7c8   :  { %7400 = shalt.err (!%p7397_p4)
}
 0x7c9   :  { %s7401_s7 = scalar_lea.hbm %s8857_s4, 256 }
 0x7ca   :  { %p7402_p5 = scmp.ne.s32.totalorder %s8857_s4, %s7401_s7  ;;  %p7405_p6 = scmp.lt.u32.totalorder %s7401_s7, %s8857_s4 }
 0x7cc   :  { %p7407_p7 = pnand %p7405_p6, %p7402_p5 }
 0x7ce   :  { %7410 = shalt.err (!%p7407_p7)
}
 0x7cf   :  { %6980 = dma.vmem_to_hbm [thread:$0]  %s6978_s29, 256, %s8857_s4, [#allocation4]  }
 0x7d0   :  { %7411 = dma.done.wait [#allocation4], 256  }
 0x7d1   :  { %7412 = vsyncadd [#allocation4], 4294967040 }
 0x7d2   :  { %6984 = vsyncpa [#allocation4], 1 }

</bundles_post_ra>
